<compile_context>
chip_gen: v7x
topology: tpu7x:2x2x1
jax: 0.10.0
libtpu: 0.0.40
codegen_flags: <defaults>
</compile_context>

<pallas_src>
import math
import functools

import jax
import jax.numpy as jnp
from jax import lax
from jax.experimental import pallas as pl
from jax.experimental.pallas import tpu as pltpu

CPAD = 128   # lane-dense channel width (multiple of 128)
_COFF = 16   # interior column offset in the halo scratch; multiple of the bf16
             # sublane tiling (16) so the interior store is fully tile-aligned.


# ----------------------------------------------------------------------------
# Kernel 1: 3x3 conv (stride=1, pad=1, no bias) as a single im2col matmul,
#           plus per-batch BatchNorm partial statistics in the epilogue.
# ----------------------------------------------------------------------------
def _conv3x3_bn_kernel(x_ref, w_ref, o_ref, sum_ref, sq_ref, pad_sc):
    # x_ref  : (1, H, W, C) bf16 — unpadded input, one batch element
    # w_ref  : (9*C, C)     bf16 — 3x3 taps flattened into the contraction dim
    # o_ref  : (1, H, W, C) bf16 — raw conv output (pre-BN)
    # sum_ref: (1, 1, C)    f32  — per-batch sum of the f32 accumulator
    # sq_ref : (1, 1, C)    f32  — per-batch sum of squares
    # pad_sc : (H+2, W+2*_COFF, C) bf16 VMEM scratch: zero-halo image
    H, W, C = x_ref.shape[1], x_ref.shape[2], x_ref.shape[3]

    # Build the 1-pixel zero halo in VMEM (no wrapper jnp.pad / extra HBM pass).
    pad_sc[...] = jnp.zeros_like(pad_sc)
    pad_sc[1:H + 1, _COFF:_COFF + W, :] = x_ref[0]       # tile-aligned store

    # im2col: 9 shifted windows concatenated along lanes -> (H*W, 9*C).
    cols = [
        pad_sc[ky:ky + H, _COFF - 1 + kx:_COFF - 1 + kx + W, :].reshape(H * W, C)
        for ky in range(3) for kx in range(3)
    ]
    patches = jnp.concatenate(cols, axis=-1)             # (H*W, 9C) bf16

    # Single MXU matmul with K = 9*C, f32 accumulation.
    acc = jnp.dot(patches, w_ref[...], preferred_element_type=jnp.float32)

    o_ref[0] = acc.reshape(H, W, C).astype(o_ref.dtype)
    # BN partial stats from the exact f32 accumulator (fused epilogue).
    sum_ref[0] = jnp.sum(acc, axis=0, keepdims=True)
    sq_ref[0] = jnp.sum(acc * acc, axis=0, keepdims=True)


def conv3x3_bn_stats_pallas(x_nhwc, w_flat):
    """x_nhwc: (B,H,W,C) bf16; w_flat: (9C,C) bf16 -> (raw bf16, sum f32, sumsq f32)."""
    B, H, W, C = x_nhwc.shape
    return pl.pallas_call(
        _conv3x3_bn_kernel,
        out_shape=(
            jax.ShapeDtypeStruct((B, H, W, C), jnp.bfloat16),
            jax.ShapeDtypeStruct((B, 1, C), jnp.float32),
            jax.ShapeDtypeStruct((B, 1, C), jnp.float32),
        ),
        grid=(B,),
        in_specs=[
            pl.BlockSpec((1, H, W, C), lambda b: (b, 0, 0, 0)),
            pl.BlockSpec((9 * C, C), lambda b: (0, 0)),
        ],
        out_specs=[
            pl.BlockSpec((1, H, W, C), lambda b: (b, 0, 0, 0)),
            pl.BlockSpec((1, 1, C), lambda b: (b, 0, 0)),
            pl.BlockSpec((1, 1, C), lambda b: (b, 0, 0)),
        ],
        scratch_shapes=[pltpu.VMEM((H + 2, W + 2 * _COFF, C), jnp.bfloat16)],
        compiler_params=pltpu.CompilerParams(dimension_semantics=("parallel",)),
    )(x_nhwc, w_flat)


# ----------------------------------------------------------------------------
# Kernel 2: DA attention block with the preceding BatchNorm affine fused into
#           its prologue, fused QKV projection, and fused residual add.
# ----------------------------------------------------------------------------
def _da_attn_kernel(x_ref, scale_ref, bias_ref, wqkv_ref, o_ref, attn_ref):
    # x_ref    : (1, L, C) bf16 — RAW conva output (BN affine applied here)
    # scale/bias: (1, C)   f32  — precomputed BN-a scale / bias
    # wqkv_ref : (C, 3C)   bf16 — fused q|k|v weights (1/sqrt(C) folded into wq)
    # o_ref    : (1, L, C) bf16 — attention output + residual
    # attn_ref : (1, L, L) f32  — softmax attention mask
    C = x_ref.shape[-1]

    # Fused BN-a affine (prologue) — saves a full HBM pass between conv and DA.
    x = x_ref[0].astype(jnp.float32) * scale_ref[...] + bias_ref[...]   # (L, C)

    # One fused QKV projection (N = 3C) on the MXU.
    qkv = jnp.dot(x.astype(jnp.bfloat16), wqkv_ref[...],
                  preferred_element_type=jnp.float32)                    # (L, 3C)
    qkv = qkv.astype(jnp.bfloat16)
    q = qkv[:, :C]
    k = qkv[:, C:2 * C]
    v = qkv[:, 2 * C:]

    # Scores: contract the last dims directly (no explicit k transpose);
    # the 1/sqrt(C) scale is already folded into wq.
    s = lax.dot_general(q, k, (((1,), (1,)), ((), ())),
                        preferred_element_type=jnp.float32)              # (L, L)
    s = s - jnp.max(s, axis=-1, keepdims=True)
    p = jnp.exp(s)
    denom = jnp.sum(p, axis=-1, keepdims=True)
    r = pl.reciprocal(denom, approx=True)      # EUP slot instead of VALU divide
    r = r * (2.0 - denom * r)                  # one Newton step -> ~exact rows
    pn = p * r                                 # softmax attention mask

    o = jnp.dot(pn.astype(jnp.bfloat16), v, preferred_element_type=jnp.float32)

    o_ref[0] = (x + o).astype(o_ref.dtype)     # fused residual add
    attn_ref[0] = pn


def da_block_pallas(x_flat, bn_scale, bn_bias, w_qkv):
    """x_flat: (B, L, C) bf16 -> (y: (B, L, C) bf16, attn: (B, L, L) f32)."""
    B, L, C = x_flat.shape
    return pl.pallas_call(
        _da_attn_kernel,
        out_shape=(
            jax.ShapeDtypeStruct((B, L, C), jnp.bfloat16),
            jax.ShapeDtypeStruct((B, L, L), jnp.float32),
        ),
        grid=(B,),
        in_specs=[
            pl.BlockSpec((1, L, C), lambda b: (b, 0, 0)),
            pl.BlockSpec((1, C), lambda b: (0, 0)),
            pl.BlockSpec((1, C), lambda b: (0, 0)),
            pl.BlockSpec((C, 3 * C), lambda b: (0, 0)),
        ],
        out_specs=[
            pl.BlockSpec((1, L, C), lambda b: (b, 0, 0)),
            pl.BlockSpec((1, L, L), lambda b: (b, 0, 0)),
        ],
        compiler_params=pltpu.CompilerParams(dimension_semantics=("parallel",)),
    )(x_flat, bn_scale, bn_bias, w_qkv)


# ----------------------------------------------------------------------------
# BatchNorm (training-mode batch statistics) scale/bias from in-kernel partials.
# ----------------------------------------------------------------------------
def _bn_scale_bias(sum_x, sum_sq, count, gamma, beta, eps=1e-5):
    mean = jnp.sum(sum_x, axis=(0, 1)) / count
    ex2 = jnp.sum(sum_sq, axis=(0, 1)) / count
    var = jnp.maximum(ex2 - mean * mean, 0.0)       # biased variance, as torch
    scale = gamma * lax.rsqrt(var + eps)
    bias = beta - mean * scale
    return scale, bias


# ----------------------------------------------------------------------------
# Parameter init: real-sized weights zero-padded to lane-dense CPAD channels,
# conv weights pre-reshaped to im2col (9C, C), fused QKV with scale folded in.
# ----------------------------------------------------------------------------
def init_da_module_params(key, in_channels, out_channels):
    ks = jax.random.split(key, 5)
    C = CPAD
    p = {}

    wa = jax.random.normal(ks[0], (3, 3, in_channels, out_channels),
                           jnp.float32) / math.sqrt(9 * in_channels)
    wa_p = jnp.zeros((3, 3, C, C), jnp.float32).at[:, :, :in_channels,
                                                   :out_channels].set(wa)
    p["w_conva"] = wa_p.reshape(9 * C, C).astype(jnp.bfloat16)
    p["gamma_a"] = jnp.zeros((C,), jnp.float32).at[:out_channels].set(
        1.0 + 0.05 * jnp.arange(out_channels, dtype=jnp.float32))
    p["beta_a"] = jnp.zeros((C,), jnp.float32).at[:out_channels].set(
        0.01 * jnp.arange(out_channels, dtype=jnp.float32))

    attn_scale = 1.0 / math.sqrt(out_channels)
    wq = jax.random.normal(ks[1], (out_channels, out_channels),
                           jnp.float32) / math.sqrt(out_channels)
    wk = jax.random.normal(ks[2], (out_channels, out_channels),
                           jnp.float32) / math.sqrt(out_channels)
    wv = jax.random.normal(ks[3], (out_channels, out_channels),
                           jnp.float32) / math.sqrt(out_channels)
    wqkv = jnp.zeros((C, 3 * C), jnp.float32)
    wqkv = wqkv.at[:out_channels, 0:out_channels].set(wq * attn_scale)  # fold scale
    wqkv = wqkv.at[:out_channels, C:C + out_channels].set(wk)
    wqkv = wqkv.at[:out_channels, 2 * C:2 * C + out_channels].set(wv)
    p["w_qkv"] = wqkv.astype(jnp.bfloat16)

    wb = jax.random.normal(ks[4], (3, 3, out_channels, out_channels),
                           jnp.float32) / math.sqrt(9 * out_channels)
    wb_p = jnp.zeros((3, 3, C, C), jnp.float32).at[:, :, :out_channels,
                                                   :out_channels].set(wb)
    p["w_convb"] = wb_p.reshape(9 * C, C).astype(jnp.bfloat16)
    p["gamma_b"] = jnp.zeros((C,), jnp.float32).at[:out_channels].set(
        1.0 - 0.03 * jnp.arange(out_channels, dtype=jnp.float32))
    p["beta_b"] = jnp.zeros((C,), jnp.float32).at[:out_channels].set(
        -0.02 * jnp.arange(out_channels, dtype=jnp.float32))
    return p


# ----------------------------------------------------------------------------
# DAModule forward: conva(+BN stats) -> DABlock(BN-a fused) -> convb(+BN stats)
# ----------------------------------------------------------------------------
@functools.partial(jax.jit, static_argnums=2)
def da_module_forward(params, x_nchw, out_channels):
    B, cin, H, W = x_nchw.shape
    C = CPAD
    count = float(B * H * W)

    # NCHW -> NHWC + channel pad to lane width + bf16 cast (one fused XLA op;
    # the spatial halo is handled inside the conv kernel, not here).
    x = jnp.transpose(x_nchw, (0, 2, 3, 1))
    x = jnp.pad(x, ((0, 0), (0, 0), (0, 0), (0, C - cin))).astype(jnp.bfloat16)

    # conva: im2col conv + per-batch BN partial stats in-kernel
    h_raw, sa, sqa = conv3x3_bn_stats_pallas(x, params["w_conva"])
    scale_a, bias_a = _bn_scale_bias(sa, sqa, count,
                                     params["gamma_a"], params["beta_a"])

    # DA block: BN-a affine fused into the prologue, fused QKV, fused residual
    y_flat, att_mask = da_block_pallas(
        h_raw.reshape(B, H * W, C),
        scale_a.reshape(1, C), bias_a.reshape(1, C), params["w_qkv"])

    # convb: im2col conv + BN partial stats; BN-b affine is folded into the
    # (already required) channel-slice + NHWC->NCHW output transform below.
    g_raw, sb, sqb = conv3x3_bn_stats_pallas(y_flat.reshape(B, H, W, C),
                                             params["w_convb"])
    scale_b, bias_b = _bn_scale_bias(sb, sqb, count,
                                     params["gamma_b"], params["beta_b"])
    out = g_raw.astype(jnp.float32) * scale_b + bias_b
    out = jnp.transpose(out[..., :out_channels], (0, 3, 1, 2))
    return out, att_mask


if __name__ == "__main__":
    B, Cin, Cout, FMAP = 2, 4, 8, 16   # small synthetic shapes

    key = jax.random.PRNGKey(0)
    k_params, k_x = jax.random.split(key)
    params = init_da_module_params(k_params, Cin, Cout)
    x = jax.random.normal(k_x, (B, Cin, FMAP, FMAP), jnp.float32)  # NCHW input

    out, att_mask = da_module_forward(params, x, Cout)
    jax.block_until_ready((out, att_mask))

    assert out.shape == (B, Cout, FMAP, FMAP)
    assert att_mask.shape == (B, FMAP * FMAP, FMAP * FMAP)
    assert bool(jnp.all(jnp.isfinite(out)))
    # attention rows sum to 1 (EUP reciprocal + one Newton refinement step)
    assert bool(jnp.allclose(jnp.sum(att_mask, axis=-1), 1.0, atol=1e-3))

    print("KERNEL_OK")
</pallas_src>

<mosaic_0001>
module attributes {stable_mosaic.version = 11 : i64} {
  func.func @_conv3x3_bn_kernel(%arg0: i32, %arg1: memref<1x16x16x128xbf16, #tpu.memory_space<vmem>>, %arg2: memref<1152x128xbf16, #tpu.memory_space<vmem>>, %arg3: memref<1x16x16x128xbf16, #tpu.memory_space<vmem>>, %arg4: memref<1x1x128xf32, #tpu.memory_space<vmem>>, %arg5: memref<1x1x128xf32, #tpu.memory_space<vmem>>, %arg6: memref<18x48x128xbf16, #tpu.memory_space<vmem>>) attributes {dimension_semantics = [#tpu.dimension_semantics<parallel>], iteration_bounds = array<i64: 2>, scalar_prefetch = 0 : i64, scratch_operands = 1 : i64, tpu.core_type = #tpu.core_type<tc>, window_params = [{transform_indices = @transform_0, window_bounds = array<i64: 1, 16, 16, 128>}, {pipeline_mode = #tpu.pipeline_mode<synchronous>, transform_indices = @transform_1, window_bounds = array<i64: 1152, 128>}, {transform_indices = @transform_2, window_bounds = array<i64: 1, 16, 16, 128>}, {transform_indices = @transform_3, window_bounds = array<i64: 1, 1, 128>}, {transform_indices = @transform_4, window_bounds = array<i64: 1, 1, 128>}]} {
    %cst = arith.constant 0.000000e+00 : bf16
    %0 = vector.broadcast %cst : bf16 to vector<18x48x128xbf16>
    %c0 = arith.constant 0 : index
    %c0_0 = arith.constant 0 : index
    %c0_1 = arith.constant 0 : index
    %1 = vector.load %arg6[%c0, %c0_0, %c0_1] : memref<18x48x128xbf16, #tpu.memory_space<vmem>>, vector<18x48x128xbf16>
    tpu.vector_store %arg6[%c0, %c0_0, %c0_1], %0 {strides = array<i32>} : memref<18x48x128xbf16, #tpu.memory_space<vmem>>, vector<18x48x128xbf16>,
    %c0_2 = arith.constant 0 : index
    %c0_3 = arith.constant 0 : index
    %c0_4 = arith.constant 0 : index
    %c0_5 = arith.constant 0 : index
    %2 = vector.load %arg1[%c0_2, %c0_3, %c0_4, %c0_5] : memref<1x16x16x128xbf16, #tpu.memory_space<vmem>>, vector<1x16x16x128xbf16>
    %3 = vector.shape_cast %2 : vector<1x16x16x128xbf16> to vector<16x16x128xbf16>
    %c1 = arith.constant 1 : index
    %c16 = arith.constant 16 : index
    %c0_6 = arith.constant 0 : index
    %4 = vector.load %arg6[%c1, %c16, %c0_6] : memref<18x48x128xbf16, #tpu.memory_space<vmem>>, vector<16x16x128xbf16>
    tpu.vector_store %arg6[%c1, %c16, %c0_6], %3 {strides = array<i32>} : memref<18x48x128xbf16, #tpu.memory_space<vmem>>, vector<16x16x128xbf16>,
    %c0_7 = arith.constant 0 : index
    %c15 = arith.constant 15 : index
    %c0_8 = arith.constant 0 : index
    %5 = vector.load %arg6[%c0_7, %c15, %c0_8] : memref<18x48x128xbf16, #tpu.memory_space<vmem>>, vector<16x16x128xbf16>
    %6 = vector.shape_cast %5 : vector<16x16x128xbf16> to vector<256x128xbf16>
    %c0_9 = arith.constant 0 : index
    %c16_10 = arith.constant 16 : index
    %c0_11 = arith.constant 0 : index
    %7 = vector.load %arg6[%c0_9, %c16_10, %c0_11] : memref<18x48x128xbf16, #tpu.memory_space<vmem>>, vector<16x16x128xbf16>
    %8 = vector.shape_cast %7 : vector<16x16x128xbf16> to vector<256x128xbf16>
    %c0_12 = arith.constant 0 : index
    %c17 = arith.constant 17 : index
    %c0_13 = arith.constant 0 : index
    %9 = vector.load %arg6[%c0_12, %c17, %c0_13] : memref<18x48x128xbf16, #tpu.memory_space<vmem>>, vector<16x16x128xbf16>
    %10 = vector.shape_cast %9 : vector<16x16x128xbf16> to vector<256x128xbf16>
    %c1_14 = arith.constant 1 : index
    %c15_15 = arith.constant 15 : index
    %c0_16 = arith.constant 0 : index
    %11 = vector.load %arg6[%c1_14, %c15_15, %c0_16] : memref<18x48x128xbf16, #tpu.memory_space<vmem>>, vector<16x16x128xbf16>
    %12 = vector.shape_cast %11 : vector<16x16x128xbf16> to vector<256x128xbf16>
    %c1_17 = arith.constant 1 : index
    %c16_18 = arith.constant 16 : index
    %c0_19 = arith.constant 0 : index
    %13 = vector.load %arg6[%c1_17, %c16_18, %c0_19] : memref<18x48x128xbf16, #tpu.memory_space<vmem>>, vector<16x16x128xbf16>
    %14 = vector.shape_cast %13 : vector<16x16x128xbf16> to vector<256x128xbf16>
    %c1_20 = arith.constant 1 : index
    %c17_21 = arith.constant 17 : index
    %c0_22 = arith.constant 0 : index
    %15 = vector.load %arg6[%c1_20, %c17_21, %c0_22] : memref<18x48x128xbf16, #tpu.memory_space<vmem>>, vector<16x16x128xbf16>
    %16 = vector.shape_cast %15 : vector<16x16x128xbf16> to vector<256x128xbf16>
    %c2 = arith.constant 2 : index
    %c15_23 = arith.constant 15 : index
    %c0_24 = arith.constant 0 : index
    %17 = vector.load %arg6[%c2, %c15_23, %c0_24] : memref<18x48x128xbf16, #tpu.memory_space<vmem>>, vector<16x16x128xbf16>
    %18 = vector.shape_cast %17 : vector<16x16x128xbf16> to vector<256x128xbf16>
    %c2_25 = arith.constant 2 : index
    %c16_26 = arith.constant 16 : index
    %c0_27 = arith.constant 0 : index
    %19 = vector.load %arg6[%c2_25, %c16_26, %c0_27] : memref<18x48x128xbf16, #tpu.memory_space<vmem>>, vector<16x16x128xbf16>
    %20 = vector.shape_cast %19 : vector<16x16x128xbf16> to vector<256x128xbf16>
    %c2_28 = arith.constant 2 : index
    %c17_29 = arith.constant 17 : index
    %c0_30 = arith.constant 0 : index
    %21 = vector.load %arg6[%c2_28, %c17_29, %c0_30] : memref<18x48x128xbf16, #tpu.memory_space<vmem>>, vector<16x16x128xbf16>
    %22 = vector.shape_cast %21 : vector<16x16x128xbf16> to vector<256x128xbf16>
    %23 = tpu.concatenate %6, %8, %10, %12, %14, %16, %18, %20, %22 in 1 : vector<256x128xbf16>, vector<256x128xbf16>, vector<256x128xbf16>, vector<256x128xbf16>, vector<256x128xbf16>, vector<256x128xbf16>, vector<256x128xbf16>, vector<256x128xbf16>, vector<256x128xbf16> -> vector<256x1152xbf16>
    %c0_31 = arith.constant 0 : index
    %c0_32 = arith.constant 0 : index
    %24 = vector.load %arg2[%c0_31, %c0_32] : memref<1152x128xbf16, #tpu.memory_space<vmem>>, vector<1152x128xbf16>
    %cst_33 = arith.constant dense<0.000000e+00> : vector<256x128xf32>
    %25 = tpu.matmul %23, %24, %cst_33 {dimension_numbers = #tpu.dot_dimension_numbers<[1], [0], [0], [1], [0, 0, 1, 1], [], []>} : vector<256x1152xbf16>, vector<1152x128xbf16>, vector<256x128xf32> -> vector<256x128xf32>
    %26 = vector.shape_cast %25 : vector<256x128xf32> to vector<16x16x128xf32>
    %27 = arith.truncf %26 : vector<16x16x128xf32> to vector<16x16x128xbf16>
    %c0_34 = arith.constant 0 : index
    %c0_35 = arith.constant 0 : index
    %c0_36 = arith.constant 0 : index
    %c0_37 = arith.constant 0 : index
    %28 = vector.load %arg3[%c0_34, %c0_35, %c0_36, %c0_37] : memref<1x16x16x128xbf16, #tpu.memory_space<vmem>>, vector<1x16x16x128xbf16>
    %29 = vector.shape_cast %28 : vector<1x16x16x128xbf16> to vector<16x16x128xbf16>
    %30 = vector.shape_cast %27 : vector<16x16x128xbf16> to vector<1x16x16x128xbf16>
    tpu.vector_store %arg3[%c0_34, %c0_35, %c0_36, %c0_37], %30 {strides = array<i32>} : memref<1x16x16x128xbf16, #tpu.memory_space<vmem>>, vector<1x16x16x128xbf16>,
    %cst_38 = arith.constant dense<0.000000e+00> : vector<128xf32>
    %31 = vector.multi_reduction <add>, %25, %cst_38 [0] : vector<256x128xf32> to vector<128xf32>
    %32 = vector.shape_cast %31 : vector<128xf32> to vector<1x128xf32>
    %c0_39 = arith.constant 0 : index
    %c0_40 = arith.constant 0 : index
    %c0_41 = arith.constant 0 : index
    %33 = vector.load %arg4[%c0_39, %c0_40, %c0_41] : memref<1x1x128xf32, #tpu.memory_space<vmem>>, vector<1x1x128xf32>
    %34 = vector.shape_cast %33 : vector<1x1x128xf32> to vector<1x128xf32>
    %35 = vector.shape_cast %32 : vector<1x128xf32> to vector<1x1x128xf32>
    tpu.vector_store %arg4[%c0_39, %c0_40, %c0_41], %35 {strides = array<i32>} : memref<1x1x128xf32, #tpu.memory_space<vmem>>, vector<1x1x128xf32>,
    %36 = arith.mulf %25, %25 : vector<256x128xf32>
    %cst_42 = arith.constant dense<0.000000e+00> : vector<128xf32>
    %37 = vector.multi_reduction <add>, %36, %cst_42 [0] : vector<256x128xf32> to vector<128xf32>
    %38 = vector.shape_cast %37 : vector<128xf32> to vector<1x128xf32>
    %c0_43 = arith.constant 0 : index
    %c0_44 = arith.constant 0 : index
    %c0_45 = arith.constant 0 : index
    %39 = vector.load %arg5[%c0_43, %c0_44, %c0_45] : memref<1x1x128xf32, #tpu.memory_space<vmem>>, vector<1x1x128xf32>
    %40 = vector.shape_cast %39 : vector<1x1x128xf32> to vector<1x128xf32>
    %41 = vector.shape_cast %38 : vector<1x128xf32> to vector<1x1x128xf32>
    tpu.vector_store %arg5[%c0_43, %c0_44, %c0_45], %41 {strides = array<i32>} : memref<1x1x128xf32, #tpu.memory_space<vmem>>, vector<1x1x128xf32>,
    return
  }
  func.func @transform_0(%arg0: i32) -> (i32, i32, i32, i32) {
    %c0_i32 = arith.constant 0 : i32
    %c0_i32_0 = arith.constant 0 : i32
    %c0_i32_1 = arith.constant 0 : i32
    %c0_i32_2 = arith.constant 0 : i32
    return %arg0, %c0_i32, %c0_i32_0, %c0_i32_1 : i32, i32, i32, i32
  }
  func.func @transform_1(%arg0: i32) -> (i32, i32) {
    %c0_i32 = arith.constant 0 : i32
    %c0_i32_0 = arith.constant 0 : i32
    %c0_i32_1 = arith.constant 0 : i32
    return %c0_i32, %c0_i32_0 : i32, i32
  }
  func.func @transform_2(%arg0: i32) -> (i32, i32, i32, i32) {
    %c0_i32 = arith.constant 0 : i32
    %c0_i32_0 = arith.constant 0 : i32
    %c0_i32_1 = arith.constant 0 : i32
    %c0_i32_2 = arith.constant 0 : i32
    return %arg0, %c0_i32, %c0_i32_0, %c0_i32_1 : i32, i32, i32, i32
  }
  func.func @transform_3(%arg0: i32) -> (i32, i32, i32) {
    %c0_i32 = arith.constant 0 : i32
    %c0_i32_0 = arith.constant 0 : i32
    %c0_i32_1 = arith.constant 0 : i32
    return %arg0, %c0_i32, %c0_i32_0 : i32, i32, i32
  }
  func.func @transform_4(%arg0: i32) -> (i32, i32, i32) {
    %c0_i32 = arith.constant 0 : i32
    %c0_i32_0 = arith.constant 0 : i32
    %c0_i32_1 = arith.constant 0 : i32
    return %arg0, %c0_i32, %c0_i32_0 : i32, i32, i32
  }
}

module attributes {stable_mosaic.version = 11 : i64} {
  func.func @_da_attn_kernel(%arg0: i32, %arg1: memref<1x256x128xbf16, #tpu.memory_space<vmem>>, %arg2: memref<1x128xf32, #tpu.memory_space<vmem>>, %arg3: memref<1x128xf32, #tpu.memory_space<vmem>>, %arg4: memref<128x384xbf16, #tpu.memory_space<vmem>>, %arg5: memref<1x256x128xbf16, #tpu.memory_space<vmem>>, %arg6: memref<1x256x256xf32, #tpu.memory_space<vmem>>) attributes {dimension_semantics = [#tpu.dimension_semantics<parallel>], iteration_bounds = array<i64: 2>, scalar_prefetch = 0 : i64, scratch_operands = 0 : i64, tpu.core_type = #tpu.core_type<tc>, window_params = [{transform_indices = @transform_0, window_bounds = array<i64: 1, 256, 128>}, {pipeline_mode = #tpu.pipeline_mode<synchronous>, transform_indices = @transform_1, window_bounds = array<i64: 1, 128>}, {pipeline_mode = #tpu.pipeline_mode<synchronous>, transform_indices = @transform_2, window_bounds = array<i64: 1, 128>}, {pipeline_mode = #tpu.pipeline_mode<synchronous>, transform_indices = @transform_3, window_bounds = array<i64: 128, 384>}, {transform_indices = @transform_4, window_bounds = array<i64: 1, 256, 128>}, {transform_indices = @transform_5, window_bounds = array<i64: 1, 256, 256>}]} {
    %c0 = arith.constant 0 : index
    %c0_0 = arith.constant 0 : index
    %c0_1 = arith.constant 0 : index
    %0 = vector.load %arg1[%c0, %c0_0, %c0_1] : memref<1x256x128xbf16, #tpu.memory_space<vmem>>, vector<1x256x128xbf16>
    %1 = vector.shape_cast %0 : vector<1x256x128xbf16> to vector<256x128xbf16>
    %2 = arith.extf %1 : vector<256x128xbf16> to vector<256x128xf32>
    %c0_2 = arith.constant 0 : index
    %c0_3 = arith.constant 0 : index
    %3 = vector.load %arg2[%c0_2, %c0_3] : memref<1x128xf32, #tpu.memory_space<vmem>>, vector<1x128xf32>
    %4 = vector.broadcast %3 : vector<1x128xf32> to vector<256x128xf32>
    %5 = arith.mulf %2, %4 : vector<256x128xf32>
    %c0_4 = arith.constant 0 : index
    %c0_5 = arith.constant 0 : index
    %6 = vector.load %arg3[%c0_4, %c0_5] : memref<1x128xf32, #tpu.memory_space<vmem>>, vector<1x128xf32>
    %7 = vector.broadcast %6 : vector<1x128xf32> to vector<256x128xf32>
    %8 = arith.addf %5, %7 : vector<256x128xf32>
    %9 = arith.truncf %8 : vector<256x128xf32> to vector<256x128xbf16>
    %c0_6 = arith.constant 0 : index
    %c0_7 = arith.constant 0 : index
    %10 = vector.load %arg4[%c0_6, %c0_7] : memref<128x384xbf16, #tpu.memory_space<vmem>>, vector<128x384xbf16>
    %cst = arith.constant dense<0.000000e+00> : vector<256x384xf32>
    %11 = tpu.matmul %9, %10, %cst {dimension_numbers = #tpu.dot_dimension_numbers<[1], [0], [0], [1], [0, 0, 1, 1], [], []>} : vector<256x128xbf16>, vector<128x384xbf16>, vector<256x384xf32> -> vector<256x384xf32>
    %12 = arith.truncf %11 : vector<256x384xf32> to vector<256x384xbf16>
    %13 = vector.extract_strided_slice %12 {offsets = [0, 0], sizes = [256, 128], strides = [1, 1]} : vector<256x384xbf16> to vector<256x128xbf16>
    %14 = vector.extract_strided_slice %12 {offsets = [0, 128], sizes = [256, 128], strides = [1, 1]} : vector<256x384xbf16> to vector<256x128xbf16>
    %15 = vector.extract_strided_slice %12 {offsets = [0, 256], sizes = [256, 128], strides = [1, 1]} : vector<256x384xbf16> to vector<256x128xbf16>
    %cst_8 = arith.constant dense<0.000000e+00> : vector<256x256xf32>
    %16 = tpu.matmul %13, %14, %cst_8 {dimension_numbers = #tpu.dot_dimension_numbers<[1], [1], [0], [0], [0, 0, 1, 0], [], []>} : vector<256x128xbf16>, vector<256x128xbf16>, vector<256x256xf32> -> vector<256x256xf32>
    %cst_9 = arith.constant dense<0xFF800000> : vector<256xf32>
    %17 = vector.multi_reduction <maximumf>, %16, %cst_9 [1] : vector<256x256xf32> to vector<256xf32>
    %18 = vector.shape_cast %17 : vector<256xf32> to vector<256x1xf32>
    %19 = vector.broadcast %18 : vector<256x1xf32> to vector<256x256xf32>
    %20 = arith.subf %16, %19 : vector<256x256xf32>
    %21 = math.exp %20 : vector<256x256xf32>
    %cst_10 = arith.constant dense<0.000000e+00> : vector<256xf32>
    %22 = vector.multi_reduction <add>, %21, %cst_10 [1] : vector<256x256xf32> to vector<256xf32>
    %23 = vector.shape_cast %22 : vector<256xf32> to vector<256x1xf32>
    %24 = tpu.reciprocal %23 {approx = true} : vector<256x1xf32> -> vector<256x1xf32>
    %25 = arith.mulf %23, %24 : vector<256x1xf32>
    %cst_11 = arith.constant 2.000000e+00 : f32
    %26 = vector.broadcast %cst_11 : f32 to vector<256x1xf32>
    %27 = arith.subf %26, %25 : vector<256x1xf32>
    %28 = arith.mulf %24, %27 : vector<256x1xf32>
    %29 = vector.broadcast %28 : vector<256x1xf32> to vector<256x256xf32>
    %30 = arith.mulf %21, %29 : vector<256x256xf32>
    %31 = arith.truncf %30 : vector<256x256xf32> to vector<256x256xbf16>
    %cst_12 = arith.constant dense<0.000000e+00> : vector<256x128xf32>
    %32 = tpu.matmul %31, %15, %cst_12 {dimension_numbers = #tpu.dot_dimension_numbers<[1], [0], [0], [1], [0, 0, 1, 1], [], []>} : vector<256x256xbf16>, vector<256x128xbf16>, vector<256x128xf32> -> vector<256x128xf32>
    %33 = arith.addf %8, %32 : vector<256x128xf32>
    %34 = arith.truncf %33 : vector<256x128xf32> to vector<256x128xbf16>
    %c0_13 = arith.constant 0 : index
    %c0_14 = arith.constant 0 : index
    %c0_15 = arith.constant 0 : index
    %35 = vector.load %arg5[%c0_13, %c0_14, %c0_15] : memref<1x256x128xbf16, #tpu.memory_space<vmem>>, vector<1x256x128xbf16>
    %36 = vector.shape_cast %35 : vector<1x256x128xbf16> to vector<256x128xbf16>
    %37 = vector.shape_cast %34 : vector<256x128xbf16> to vector<1x256x128xbf16>
    tpu.vector_store %arg5[%c0_13, %c0_14, %c0_15], %37 {strides = array<i32>} : memref<1x256x128xbf16, #tpu.memory_space<vmem>>, vector<1x256x128xbf16>,
    %c0_16 = arith.constant 0 : index
    %c0_17 = arith.constant 0 : index
    %c0_18 = arith.constant 0 : index
    %38 = vector.load %arg6[%c0_16, %c0_17, %c0_18] : memref<1x256x256xf32, #tpu.memory_space<vmem>>, vector<1x256x256xf32>
    %39 = vector.shape_cast %38 : vector<1x256x256xf32> to vector<256x256xf32>
    %40 = vector.shape_cast %30 : vector<256x256xf32> to vector<1x256x256xf32>
    tpu.vector_store %arg6[%c0_16, %c0_17, %c0_18], %40 {strides = array<i32>} : memref<1x256x256xf32, #tpu.memory_space<vmem>>, vector<1x256x256xf32>,
    return
  }
  func.func @transform_0(%arg0: i32) -> (i32, i32, i32) {
    %c0_i32 = arith.constant 0 : i32
    %c0_i32_0 = arith.constant 0 : i32
    %c0_i32_1 = arith.constant 0 : i32
    return %arg0, %c0_i32, %c0_i32_0 : i32, i32, i32
  }
  func.func @transform_1(%arg0: i32) -> (i32, i32) {
    %c0_i32 = arith.constant 0 : i32
    %c0_i32_0 = arith.constant 0 : i32
    %c0_i32_1 = arith.constant 0 : i32
    return %c0_i32, %c0_i32_0 : i32, i32
  }
  func.func @transform_2(%arg0: i32) -> (i32, i32) {
    %c0_i32 = arith.constant 0 : i32
    %c0_i32_0 = arith.constant 0 : i32
    %c0_i32_1 = arith.constant 0 : i32
    return %c0_i32, %c0_i32_0 : i32, i32
  }
  func.func @transform_3(%arg0: i32) -> (i32, i32) {
    %c0_i32 = arith.constant 0 : i32
    %c0_i32_0 = arith.constant 0 : i32
    %c0_i32_1 = arith.constant 0 : i32
    return %c0_i32, %c0_i32_0 : i32, i32
  }
  func.func @transform_4(%arg0: i32) -> (i32, i32, i32) {
    %c0_i32 = arith.constant 0 : i32
    %c0_i32_0 = arith.constant 0 : i32
    %c0_i32_1 = arith.constant 0 : i32
    return %arg0, %c0_i32, %c0_i32_0 : i32, i32, i32
  }
  func.func @transform_5(%arg0: i32) -> (i32, i32, i32) {
    %c0_i32 = arith.constant 0 : i32
    %c0_i32_0 = arith.constant 0 : i32
    %c0_i32_1 = arith.constant 0 : i32
    return %arg0, %c0_i32, %c0_i32_0 : i32, i32, i32
  }
}

</mosaic_0001>

<bundles_post_ra>
// kernel: da_module_forward.4
= control target key start
LH: loop header
LB: loop body
LE: loop exit
PB: predicated region body
PF: predicated region fallthrough
CT: control target
= control target key end

     0   :  { %11 = vsyncpa [#allocation3], 0  ;;  %s4398_s0 = inlined_call_operand.vmem [shape: bf16[2,256,128], index: 0, kind: input, shape index: {}]   ;;  %s4399_s1 = inlined_call_operand.vmem [shape: f32[1,128], index: 1, kind: input, shape index: {}]   ;;  %s4400_s2 = inlined_call_operand.vmem [shape: f32[1,128], index: 2, kind: input, shape index: {}]   ;;  %s4401_s3 = inlined_call_operand.vmem [shape: bf16[128,384], index: 3, kind: input, shape index: {}]   ;;  %s4402_s4 = inlined_call_operand.vmem [shape: bf16[2,256,128], index: 4, kind: output, shape index: {0}]   ;;  %s4403_s5 = inlined_call_operand.hbm [shape: f32[2,256,256], index: 5, kind: output, shape index: {1}]  }
   0x1   :  { %13 = vsyncpa [#allocation3 + $0x1], 0  ;;  %s3177_s18 = smov 0   ;;  %s3179_s19 = smov 0  }
   0x2   :  { %s3181_s20 = smov 0   ;;  %s3183_s21 = smov 0  }
   0x3 LB: > { %s3198_s22 = sadd.s32 4294967295, %s3141_s21   ;;  %s2284_s23 = sadd.s32 4294967294, %s3141_s21   ;;  %s3141_s21 = sphi %s3183_s21, %s4606_s21   ;;  %s3137_s20 = sphi %s3181_s20, %s4605_s20   ;;  %s3133_s19 = sphi %s3179_s19, %s4604_s19   ;;  %s3129_s18 = sphi %s3177_s18, %s4603_s18  }
   0x4   : > { %s3202_s24 = sadd.s32 1, %s3141_s21   ;;  %s141_s25 = sadd.s32 1, %s3137_s20 }
   0x5   : > { %s138_s26 = ssub.s32 %s3141_s21, %s3202_s24  ;;  %p151_p0 = scmp.ne.s32.totalorder %s3137_s20, %s3133_s19 }
   0x6   : > { %p139_p1 = scmp.eq.s32.totalorder %s138_s26, 0  ;;  %p152_p2 = scmp.eq.s32.totalorder %s3198_s22, 1 }
   0x7   : > { %p157_p3 = scmp.ne.s32.totalorder %s3133_s19, %s3129_s18  ;;  %p158_p4 = scmp.eq.s32.totalorder %s2284_s23, 1 }
   0x8   : > { %s3213_s27 = scalar_select %p139_p1, %s3137_s20, %s141_s25  }
   0x9   : > { %p3215_p5 = por %p152_p2, %p151_p0  ;;  %p3219_p6 = por %p158_p4, %p157_p3 }
   0xa   : > { %p2287_p7 = scmp.ge.s32.totalorder %s3141_s21, 1  ;;  %p193_p8 = scmp.lt.s32.totalorder %s3141_s21, 3 }
   0xc   : > { %p194_p9 = pnand %p2287_p7, %p193_p8 }
   0xe   : > { %197 = sbr.rel (%p194_p9) target bundleno = 1354 (0x54a), region = 36 }
  0x15   : > { %v2855_v0 = vld [vmem:[%s4401_s3 + $0x4] ss:$12 sps:$4 sm:$0xff]   ;;  %p226_p10 = scmp.lt.s32.totalorder %s3198_s22, 1  ;;  %v2857_v1 = vld [vmem:[%s4401_s3] ss:$12 sps:$4 sm:$0xff]   ;;  %v3143_v2 = vmov 0  }
  0x16   : > { %587 = vmatprep.mubr.bf16.mxu0 %v3143_v2  ;;  %707 = vmatprep.mubr.bf16.mxu1 %v3143_v2  ;;  %v2858_v3 = vld [vmem:[%s4401_s3 + $0x1c] ss:$12 sps:$4 sm:$0xff]   ;;  %v2860_v4 = vld [vmem:[%s4401_s3 + $0x18] ss:$12 sps:$4 sm:$0xff]   ;;  %v2861_v5 = vld [vmem:[%s4401_s3 + $0x34] ss:$12 sps:$4 sm:$0xff]  }
  0x17   : > { %555 = vmatprep.subr.bf16.mxu0 %v2855_v0  ;;  %2797 = vmatprep.subr.bf16.mxu1 %v2855_v0  ;;  %s3244_s15 = scalar_select %p226_p10, %s3198_s22, 1  ;;  %v2863_v6 = vld [vmem:[%s4401_s3 + $0x30] ss:$12 sps:$4 sm:$0xff]   ;;  %v2864_v7 = vld [vmem:[%s4401_s3 + $0x4c] ss:$12 sps:$4 sm:$0xff]  }
  0x18   : > { %556 = vmatpush1.bf16.msra.mxu0 %v2857_v1  ;;  %2805 = vmatpush1.bf16.msra.mxu1 %v2857_v1  ;;  %v2866_v8 = vld [vmem:[%s4401_s3 + $0x48] ss:$12 sps:$4 sm:$0xff]   ;;  %v2867_v9 = vld [vmem:[%s4401_s3 + $0x64] ss:$12 sps:$4 sm:$0xff]   ;;  %v2869_v11 = vld [vmem:[%s4401_s3 + $0x60] ss:$12 sps:$4 sm:$0xff]  }
  0x19   : > { %557 = vmatprep.subr.bf16.mxu0 %v2858_v3  ;;  %2798 = vmatprep.subr.bf16.mxu1 %v2858_v3  ;;  %s2356_s26 = sshll.u32 %s3244_s15, 7  ;;  %v2870_v12 = vld [vmem:[%s4401_s3 + $0x7c] ss:$12 sps:$4 sm:$0xff]   ;;  %v2872_v13 = vld [vmem:[%s4401_s3 + $0x78] ss:$12 sps:$4 sm:$0xff]   ;;  %s2390_s15 = sshll.u32 %s3198_s22, 13 }
  0x1a   : > { %s3261_s9 = scalar_lea.vmem %s4398_s0, %s2356_s26  ;;  %v3279_v16 = vld [vmem:[%s4399_s1] ss:$0 sm:$0xff]  ;;  %v2875_v19 = vld [vmem:[%s4401_s3 + $0x90] ss:$12 sps:$4 sm:$0xff]   ;;  %v2876_v25 = vld [vmem:[%s4401_s3 + $0xac] ss:$12 sps:$4 sm:$0xff]   ;;  %s4298_s11 = scalar_lea.vmem %s4402_s4, %s2356_s26 }
  0x1b   : > { %v2392_v10 = vld [vmem:[%s3261_s9] sm:$0xff]   ;;  %v2535_v18 = vld [vmem:[%s3261_s9 + $0x8] sm:$0xff]   ;;  %v2544_v27 = vld [vmem:[%s3261_s9 + $0x50] sm:$0xff]   ;;  %s4326_s13 = scalar_lea.hbm %s4403_s5, %s2390_s15  ;;  %s3144_s17 = smov [#allocation2]  }
  0x1c   : > { %558 = vmatpush1.bf16.msra.mxu0 %v2860_v4  ;;  %2806 = vmatpush1.bf16.msra.mxu1 %v2860_v4  ;;  %v2393_v14 = vunpack.c.l.bf16 %v2392_v10  ;;  %v2394_v15 = vunpack.c.h.bf16 %v2392_v10  ;;  %v2873_v17 = vld [vmem:[%s4401_s3 + $0x94] ss:$12 sps:$4 sm:$0xff]   ;;  %v2397_v23 = vunpack.c.l.bf16 %v2535_v18  ;;  %v2543_v24 = vld [vmem:[%s3261_s9 + $0x48] sm:$0xff]   ;;  %v2398_v26 = vunpack.c.h.bf16 %v2535_v18  ;;  %v2545_v30 = vld [vmem:[%s3261_s9 + $0x58] sm:$0xff]   ;;  %s3083_s23 = sshll.u32 %s3144_s17, 4  ;;  %s3084_s23 = int_to_ptr.vmem [resolvable:$false] %s3083_s23 }
  0x1d   : > { %559 = vmatprep.subr.bf16.mxu0 %v2861_v5  ;;  %2799 = vmatprep.subr.bf16.mxu1 %v2861_v5  ;;  %v3293_v22 = vld [vmem:[%s4400_s2] ss:$0 sm:$0xff]  ;;  %v2429_v31 = vunpack.c.l.bf16 %v2543_v24  ;;  %v2430_v32 = vunpack.c.h.bf16 %v2543_v24  ;;  %v2878_v33 = vld [vmem:[%s4401_s3 + $0xa8] ss:$12 sps:$4 sm:$0xff]   ;;  %v2433_v35 = vunpack.c.l.bf16 %v2544_v27  ;;  %v2434_v36 = vunpack.c.h.bf16 %v2544_v27  ;;  %s3085_s25 = scalar_lea.vmem %s3084_s23, 16384 }
  0x1e   : > { %v308_v20 = vmul.f32 %v2393_v14, %v3279_v16  ;;  %v309_v21 = vmul.f32 %v2394_v15, %v3279_v16  ;;  %v310_v34 = vmul.f32 %v2397_v23, %v3279_v16  ;;  %v2546_v37 = vld [vmem:[%s3261_s9 + $0x60] sm:$0xff]   ;;  %v311_v38 = vmul.f32 %v2398_v26, %v3279_v16  ;;  %v2536_v43 = vld [vmem:[%s3261_s9 + $0x10] sm:$0xff]   ;;  %v2547_v51 = vld [vmem:[%s3261_s9 + $0x68] sm:$0xff]  }
  0x1f   : > { %v326_v39 = vmul.f32 %v2429_v31, %v3279_v16  ;;  %v327_v40 = vmul.f32 %v2430_v32, %v3279_v16  ;;  %v2437_v41 = vunpack.c.l.bf16 %v2545_v30  ;;  %v328_v44 = vmul.f32 %v2433_v35, %v3279_v16  ;;  %v2879_v52 = vld [vmem:[%s4401_s3 + $0x8] ss:$12 sps:$4 sm:$0xff]   ;;  %v2537_v14 = vld [vmem:[%s3261_s9 + $0x18] sm:$0xff]  }
  0x20   : > { %560 = vmatpush1.bf16.msra.mxu0 %v2863_v6  ;;  %2807 = vmatpush1.bf16.msra.mxu1 %v2863_v6  ;;  %v3301_v28 = vadd.f32 %v3293_v22, %v308_v20  ;;  %v3304_v29 = vadd.f32 %v3293_v22, %v309_v21  ;;  %v329_v45 = vmul.f32 %v2434_v36, %v3279_v16  ;;  %v2438_v46 = vunpack.c.h.bf16 %v2545_v30  ;;  %v2549_v31 = vld [vmem:[%s3261_s9 + $0x78] sm:$0xff]   ;;  %v2538_v36 = vld [vmem:[%s3261_s9 + $0x20] sm:$0xff]  }
  0x21   : > { %561 = vmatprep.subr.bf16.mxu0 %v2864_v7  ;;  %2800 = vmatprep.subr.bf16.mxu1 %v2864_v7  ;;  %v3323_v47 = vadd.f32 %v3293_v22, %v326_v39  ;;  %v3326_v48 = vadd.f32 %v3293_v22, %v327_v40  ;;  %v330_v49 = vmul.f32 %v2437_v41, %v3279_v16  ;;  %v2441_v50 = vunpack.c.l.bf16 %v2546_v37  ;;  %v2882_v35 = vld [vmem:[%s4401_s3 + $0x50] ss:$12 sps:$4 sm:$0xff]  }
  0x22   : > { %4467 = vst [vmem:[#allocation5_spill] sm:$0xff] %v3301_v28  ;;  %4468 = vst [vmem:[#allocation6_spill] sm:$0xff] %v3304_v29  ;;  %v3317_v42 = vpack.c.bf16 %v3304_v29, %v3301_v28  ;;  %v3334_v53 = vadd.f32 %v3293_v22, %v328_v44  ;;  %v3337_v54 = vadd.f32 %v3293_v22, %v329_v45  ;;  %v2401_v56 = vunpack.c.l.bf16 %v2536_v43 }
  0x23   : > { %4469 = vst [vmem:[#allocation7_spill] sm:$0xff] %v3323_v47  ;;  %4470 = vst [vmem:[#allocation8_spill] sm:$0xff] %v3326_v48  ;;  %v331_v55 = vmul.f32 %v2438_v46, %v3279_v16  ;;  %v3341_v57 = vadd.f32 %v3293_v22, %v330_v49  ;;  %v2442_v58 = vunpack.c.h.bf16 %v2546_v37  ;;  %v332_v59 = vmul.f32 %v2441_v50, %v3279_v16  ;;  %v2883_v46 = vld [vmem:[%s4401_s3 + $0x68] ss:$12 sps:$4 sm:$0xff]  }
  0x24   : > { %562 = vmatpush1.bf16.msra.mxu0 %v2866_v8  ;;  %2808 = vmatpush1.bf16.msra.mxu1 %v2866_v8  ;;  %4471 = vst [vmem:[#allocation9_spill] sm:$0xff] %v3334_v53  ;;  %4472 = vst [vmem:[#allocation10_spill] sm:$0xff] %v3337_v54  ;;  %v3345_v60 = vadd.f32 %v3293_v22, %v310_v34  ;;  %v2445_v62 = vunpack.c.l.bf16 %v2547_v51  ;;  %v2446_v63 = vunpack.c.h.bf16 %v2547_v51  ;;  %v2402_v1 = vunpack.c.h.bf16 %v2536_v43  ;;  %v2548_v8 = vld [vmem:[%s3261_s9 + $0x70] sm:$0xff]  }
  0x25   : > { %563 = vmatprep.subr.bf16.mxu0 %v2867_v9  ;;  %2801 = vmatprep.subr.bf16.mxu1 %v2867_v9  ;;  %4473 = vst [vmem:[#allocation11_spill] sm:$0xff] %v3341_v57  ;;  %v3348_v61 = vadd.f32 %v3293_v22, %v331_v55  ;;  %v3352_v0 = vadd.f32 %v3293_v22, %v311_v38  ;;  %v2449_v18 = vunpack.c.l.bf16 %v2548_v8  ;;  %v2405_v23 = vunpack.c.l.bf16 %v2537_v14 }
  0x26   : > { %4474 = vst [vmem:[#allocation12_spill] sm:$0xff] %v3345_v60  ;;  %v333_v3 = vmul.f32 %v2442_v58, %v3279_v16  ;;  %v3356_v4 = vadd.f32 %v3293_v22, %v332_v59  ;;  %v334_v6 = vmul.f32 %v2445_v62, %v3279_v16  ;;  %v335_v7 = vmul.f32 %v2446_v63, %v3279_v16  ;;  %v2884_v58 = vld [vmem:[%s4401_s3 + $0x80] ss:$12 sps:$4 sm:$0xff]  }
  0x27   : > { %4475 = vst [vmem:[#allocation13_spill] sm:$0xff] %v3348_v61  ;;  %4476 = vst [vmem:[#allocation14_spill] sm:$0xff] %v3352_v0  ;;  %v3367_v9 = vpack.c.bf16 %v3352_v0, %v3345_v60  ;;  %v312_v10 = vmul.f32 %v2401_v56, %v3279_v16  ;;  %v2406_v24 = vunpack.c.h.bf16 %v2537_v14  ;;  %v336_v27 = vmul.f32 %v2449_v18, %v3279_v16  ;;  %v2539_v59 = vld [vmem:[%s3261_s9 + $0x28] sm:$0xff]   ;;  %v2886_v18 = vld [vmem:[%s4401_s3 + $0xb0] ss:$12 sps:$4 sm:$0xff]  }
  0x28   : > { %564 = vmatpush1.bf16.msra.mxu0 %v2869_v11  ;;  %2809 = vmatpush1.bf16.msra.mxu1 %v2869_v11  ;;  %4477 = vst [vmem:[#allocation15_spill] sm:$0xff] %v3356_v4  ;;  %v3360_v5 = vadd.f32 %v3293_v22, %v333_v3  ;;  %v313_v11 = vmul.f32 %v2402_v1, %v3279_v16  ;;  %v2453_v39 = vunpack.c.l.bf16 %v2549_v31  ;;  %v2454_v40 = vunpack.c.h.bf16 %v2549_v31 }
  0x29   : > { %565 = vmatprep.subr.bf16.mxu0 %v2870_v12  ;;  %2802 = vmatprep.subr.bf16.mxu1 %v2870_v12  ;;  %v3381_v15 = vadd.f32 %v3293_v22, %v334_v6  ;;  %v3389_v20 = vadd.f32 %v3293_v22, %v312_v10  ;;  %v315_v34 = vmul.f32 %v2406_v24, %v3279_v16  ;;  %v2409_v44 = vunpack.c.l.bf16 %v2538_v36 }
  0x2a   : > { %4478 = vst [vmem:[#allocation16_spill] sm:$0xff] %v3360_v5  ;;  %v3373_v12 = vpack.c.bf16 %v3360_v5, %v3356_v4  ;;  %v3392_v21 = vadd.f32 %v3293_v22, %v313_v11  ;;  %v3417_v37 = vadd.f32 %v3293_v22, %v336_v27  ;;  %v2410_v45 = vunpack.c.h.bf16 %v2538_v36 }
  0x2b   : > { %4479 = vst [vmem:[#allocation17_spill] sm:$0xff] %v3381_v15  ;;  %4481 = vst [vmem:[#allocation19_spill] sm:$0xff] %v3389_v20  ;;  %v3428_v43 = vadd.f32 %v3293_v22, %v315_v34  ;;  %v338_v50 = vmul.f32 %v2453_v39, %v3279_v16  ;;  %v339_v51 = vmul.f32 %v2454_v40, %v3279_v16  ;;  %v2413_v6 = vunpack.c.l.bf16 %v2539_v59 }
  0x2c   : > { %566 = vmatpush1.bf16.msra.mxu0 %v2872_v13  ;;  %2810 = vmatpush1.bf16.msra.mxu1 %v2872_v13  ;;  %v2880_v13 = vld [vmem:[%s4401_s3 + $0x20] ss:$12 sps:$4 sm:$0xff]   ;;  %4482 = vst [vmem:[#allocation20_spill] sm:$0xff] %v3392_v21  ;;  %v3407_v32 = vpack.c.bf16 %v3392_v21, %v3389_v20  ;;  %4483 = vst [vmem:[#allocation21_spill] sm:$0xff] %v3417_v37  ;;  %v316_v55 = vmul.f32 %v2409_v44, %v3279_v16 }
  0x2d   : > { %567 = vmatprep.subr.bf16.mxu0 %v2873_v17  ;;  %2803 = vmatprep.subr.bf16.mxu1 %v2873_v17  ;;  %v3384_v17 = vadd.f32 %v3293_v22, %v335_v7  ;;  %4486 = vst [vmem:[#allocation24_spill] sm:$0xff] %v3428_v43  ;;  %v317_v56 = vmul.f32 %v2410_v45, %v3279_v16  ;;  %v2414_v7 = vunpack.c.h.bf16 %v2539_v59  ;;  %v2542_v45 = vld [vmem:[%s3261_s9 + $0x40] sm:$0xff]  }
  0x2e   : > { %v3450_v62 = vadd.f32 %v3293_v22, %v338_v50  ;;  %v3453_v63 = vadd.f32 %v3293_v22, %v339_v51  ;;  %v3457_v1 = vadd.f32 %v3293_v22, %v316_v55  ;;  %v2425_v50 = vunpack.c.l.bf16 %v2542_v45 }
  0x2f   : > { %4480 = vst [vmem:[#allocation18_spill] sm:$0xff] %v3384_v17  ;;  %v3400_v26 = vpack.c.bf16 %v3384_v17, %v3381_v15  ;;  %v3460_v3 = vadd.f32 %v3293_v22, %v317_v56  ;;  %v319_v14 = vmul.f32 %v2414_v7, %v3279_v16  ;;  %v2426_v51 = vunpack.c.h.bf16 %v2542_v45 }
  0x30   : > { %568 = vmatpush1.bf16.msra.mxu0 %v2875_v19  ;;  %2811 = vmatpush1.bf16.msra.mxu1 %v2875_v19  ;;  %v2450_v19 = vunpack.c.h.bf16 %v2548_v8  ;;  %4487 = vst [vmem:[#allocation25_spill] sm:$0xff] %v3450_v62  ;;  %4488 = vst [vmem:[#allocation26_spill] sm:$0xff] %v3453_v63  ;;  %v2885_v8 = vld [vmem:[%s4401_s3 + $0x98] ss:$12 sps:$4 sm:$0xff]   ;;  %v3468_v10 = vpack.c.bf16 %v3453_v63, %v3450_v62  ;;  %v324_v56 = vmul.f32 %v2425_v50, %v3279_v16 }
  0x31   : > { %569 = vmatprep.subr.bf16.mxu0 %v2876_v25  ;;  %2804 = vmatprep.subr.bf16.mxu1 %v2876_v25  ;;  %v2881_v25 = vld [vmem:[%s4401_s3 + $0x38] ss:$12 sps:$4 sm:$0xff]   ;;  %4489 = vst [vmem:[#allocation27_spill] sm:$0xff] %v3457_v1  ;;  %4490 = vst [vmem:[#allocation28_spill] sm:$0xff] %v3460_v3  ;;  %v383_v11 = vpack.c.bf16 %v3460_v3, %v3457_v1  ;;  %v3484_v24 = vadd.f32 %v3293_v22, %v319_v14 }
  0x32   : > { %v337_v30 = vmul.f32 %v2450_v19, %v3279_v16  ;;  %v2540_v19 = vld [vmem:[%s3261_s9 + $0x30] sm:$0xff]   ;;  %v389_v7 = vpack.c.bf16 %v3337_v54, %v3334_v53 }
  0x33   : > { %4492 = vst [vmem:[#allocation30_spill] sm:$0xff] %v3484_v24  ;;  %v2418_v27 = vunpack.c.h.bf16 %v2540_v19 }
  0x34   : > { %570 = vmatpush1.bf16.msra.mxu0 %v2878_v33  ;;  %2812 = vmatpush1.bf16.msra.mxu1 %v2878_v33  ;;  %v314_v33 = vmul.f32 %v2405_v23, %v3279_v16  ;;  %v3420_v38 = vadd.f32 %v3293_v22, %v337_v30 }
  0x35   : > { %2749 = vmatprep.subr.bf16.mxu1 %v2879_v52 }
  0x36   : > { %4484 = vst [vmem:[#allocation22_spill] sm:$0xff] %v3420_v38  ;;  %v3425_v41 = vadd.f32 %v3293_v22, %v314_v33  ;;  %v3436_v49 = vpack.c.bf16 %v3420_v38, %v3417_v37  ;;  %v2541_v33 = vld [vmem:[%s3261_s9 + $0x38] sm:$0xff]   ;;  %s223_s9 = sand.u32 1, %s3133_s19  }
  0x37   : > { %588 = vmatmul.mubr.bf16.vlgmr.msra.gmra.mrb[0].mxu0 %v3317_v42  ;;  %708 = vmatmul.mubr.bf16.vlgmr.msra.gmra.mrb[0].mxu1 %v3373_v12  ;;  %v2421_v36 = vunpack.c.l.bf16 %v2541_v33  ;;  %v2422_v39 = vunpack.c.h.bf16 %v2541_v33  ;;  %s2288_s6 = sshll.u32 %s223_s9, 9  ;;  %s4335_s16 = scalar_lea.sflag [#allocation3], %s223_s9 }
  0x38   : > { %597 = vmatprep.mubr.bf16.mxu0 %v3143_v2  ;;  %717 = vmatprep.mubr.bf16.mxu1 %v3143_v2  ;;  %4485 = vst [vmem:[#allocation23_spill] sm:$0xff] %v3425_v41  ;;  %s4094_s7 = scalar_lea.vmem [#allocation2], %s2288_s6 }
  0x39   : > { %2750 = vmatpush3.bf16.msra.mxu1 %v2879_v52  ;;  %v382_v52 = vpack.c.bf16 %v3428_v43, %v3425_v41  ;;  %v322_v44 = vmul.f32 %v2421_v36, %v3279_v16  ;;  %s2197_s14 = sshll.u32 %s4094_s7, 4  ;;  %s4331_s14 = int_to_ptr.vmem [resolvable:$true] %s2197_s14 }
  0x3a   : > { %2751 = vmatprep.subr.bf16.mxu1 %v2880_v13  ;;  %s3079_s22 = scalar_lea.vmem %s4331_s14, 8192  ;;  %p3086_p0 = scmp.lt.s32.totalorder %s4331_s14, %s3084_s23 }
  0x3b   : > { %p3080_p11 = scmp.ne.s32.totalorder %s4331_s14, %s3079_s22  ;;  %p3087_p1 = scmp.lt.s32.totalorder %s3085_s25, %s3079_s22 }
  0x3d   : > { %2752 = vmatpush3.bf16.msra.mxu1 %v2880_v13  ;;  %v318_v13 = vmul.f32 %v2413_v6, %v3279_v16  ;;  %p3081_p12 = pnand %p3080_p11, %p3215_p5  ;;  %p3088_p2 = por %p3087_p1, %p3086_p0 }
  0x3e   : > { %2753 = vmatprep.subr.bf16.mxu1 %v2881_v25 }
  0x3f   : > { %598 = vmatmul.mubr.bf16.gmra.mrb[4].mxu0 %v3367_v9  ;;  %718 = vmatmul.mubr.bf16.gmra.mrb[4].mxu1 %v3400_v26  ;;  %v3481_v23 = vadd.f32 %v3293_v22, %v318_v13  ;;  %p3082_p13 = pneg %p3081_p12 }
  0x40   : > { %607 = vmatprep.mubr.bf16.mxu0 %v3143_v2  ;;  %727 = vmatprep.mubr.bf16.mxu1 %v3143_v2 }
  0x41   : > { %2754 = vmatpush3.bf16.msra.mxu1 %v2881_v25  ;;  %4491 = vst [vmem:[#allocation29_spill] sm:$0xff] %v3481_v23  ;;  %v2417_v25 = vunpack.c.l.bf16 %v2540_v19  ;;  %v384_v30 = vpack.c.bf16 %v3484_v24, %v3481_v23  ;;  %p3089_p3 = pnand %p3088_p2, %p3082_p13 }
  0x42   : > { %2755 = vmatprep.subr.bf16.mxu1 %v2882_v35 }
  0x43   : > { %v320_v31 = vmul.f32 %v2417_v25, %v3279_v16 }
  0x45   : > { %2756 = vmatpush3.bf16.msra.mxu1 %v2882_v35  ;;  %v3495_v34 = vadd.f32 %v3293_v22, %v320_v31 }
  0x46   : > { %2757 = vmatprep.subr.bf16.mxu1 %v2883_v46 }
  0x47   : > { %608 = vmatmul.mubr.bf16.gmra.mrb[8].mxu0 %v3407_v32  ;;  %728 = vmatmul.mubr.bf16.gmra.mrb[8].mxu1 %v3436_v49  ;;  %4493 = vst [vmem:[#allocation31_spill] sm:$0xff] %v3495_v34 }
  0x48   : > { %617 = vmatprep.mubr.bf16.mxu0 %v3143_v2  ;;  %737 = vmatprep.mubr.bf16.mxu1 %v3143_v2 }
  0x49   : > { %2758 = vmatpush3.bf16.msra.mxu1 %v2883_v46 }
  0x4a   : > { %2759 = vmatprep.subr.bf16.mxu1 %v2884_v58 }
  0x4d   : > { %2760 = vmatpush3.bf16.msra.mxu1 %v2884_v58  ;;  %v325_v58 = vmul.f32 %v2426_v51, %v3279_v16 }
  0x4e   : > { %2761 = vmatprep.subr.bf16.mxu1 %v2885_v8 }
  0x4f   : > { %618 = vmatmul.mubr.bf16.gmra.mrb[12].mxu0 %v382_v52  ;;  %738 = vmatmul.mubr.bf16.gmra.mrb[12].mxu1 %v3468_v10  ;;  %v3521_v59 = vadd.f32 %v3293_v22, %v325_v58 }
  0x50   : > { %627 = vmatprep.mubr.bf16.mxu0 %v3143_v2  ;;  %2765 = vmatprep.mubr.bf16.mxu1 %v3317_v42  ;;  %v321_v42 = vmul.f32 %v2418_v27, %v3279_v16 }
  0x51   : > { %2762 = vmatpush3.bf16.msra.mxu1 %v2885_v8  ;;  %4498 = vst [vmem:[#allocation36_spill] sm:$0xff] %v3521_v59 }
  0x52   : > { %2763 = vmatprep.subr.bf16.mxu1 %v2886_v18  ;;  %v3498_v35 = vadd.f32 %v3293_v22, %v321_v42 }
  0x54   : > { %4494 = vst [vmem:[#allocation32_spill] sm:$0xff] %v3498_v35  ;;  %v385_v40 = vpack.c.bf16 %v3498_v35, %v3495_v34 }
  0x55   : > { %2764 = vmatpush3.bf16.msra.mxu1 %v2886_v18 }
  0x57   : > { %628 = vmatmul.mubr.bf16.gmra.mrb[16].mxu0 %v383_v11 }
  0x58   : > { %637 = vmatprep.mubr.bf16.mxu0 %v3143_v2  ;;  %2766 = vmatmul.mubr.bf16.vlgmr.msra.gmra.mrb[16].mxu1 %v3367_v9  ;;  %v323_v9 = vmul.f32 %v2422_v39, %v3279_v16  ;;  %v388_v16 = vpack.c.bf16 %v3326_v48, %v3323_v47 }
  0x59   : > { %2769 = vmatprep.mubr.bf16.mxu1 %v3407_v32  ;;  %v3507_v32 = vadd.f32 %v3293_v22, %v322_v44 }
  0x5a   : > { %v3510_v46 = vadd.f32 %v3293_v22, %v323_v9 }
  0x5b   : > { %4495 = vst [vmem:[#allocation33_spill] sm:$0xff] %v3507_v32 }
  0x5c   : > { %4496 = vst [vmem:[#allocation34_spill] sm:$0xff] %v3510_v46  ;;  %v386_v55 = vpack.c.bf16 %v3510_v46, %v3507_v32 }
  0x5f   : > { %638 = vmatmul.mubr.bf16.gmra.mrb[20].mxu0 %v384_v30 }
  0x60   : > { %647 = vmatprep.mubr.bf16.mxu0 %v3143_v2  ;;  %2770 = vmatmul.mubr.bf16.gmra.mrb[20].mxu1 %v382_v52  ;;  %v3518_v52 = vadd.f32 %v3293_v22, %v324_v56  ;;  %v390_v22 = vpack.c.bf16 %v3348_v61, %v3341_v57 }
  0x61   : > { %2773 = vmatprep.mubr.bf16.mxu1 %v383_v11 }
  0x62   : > { %4497 = vst [vmem:[#allocation35_spill] sm:$0xff] %v3518_v52  ;;  %v387_v6 = vpack.c.bf16 %v3521_v59, %v3518_v52 }
  0x67   : > { %648 = vmatmul.mubr.bf16.gmra.mrb[24].mxu0 %v385_v40 }
  0x68   : > { %657 = vmatprep.mubr.bf16.mxu0 %v3143_v2  ;;  %2774 = vmatmul.mubr.bf16.gmra.mrb[24].mxu1 %v384_v30 }
  0x69   : > { %2777 = vmatprep.mubr.bf16.mxu1 %v385_v40 }
  0x6f   : > { %658 = vmatmul.mubr.bf16.gmra.mrb[28].mxu0 %v386_v55 }
  0x70   : > { %667 = vmatprep.mubr.bf16.mxu0 %v3143_v2  ;;  %2778 = vmatmul.mubr.bf16.gmra.mrb[28].mxu1 %v386_v55 }
  0x71   : > { %2781 = vmatprep.mubr.bf16.mxu1 %v387_v6 }
  0x77   : > { %668 = vmatmul.mubr.bf16.gmra.mrb[32].mxu0 %v387_v6 }
  0x78   : > { %677 = vmatprep.mubr.bf16.mxu0 %v3143_v2  ;;  %2782 = vmatmul.mubr.bf16.gmra.mrb[32].mxu1 %v388_v16 }
  0x79   : > { %2785 = vmatprep.mubr.bf16.mxu1 %v389_v7 }
  0x7f   : > { %678 = vmatmul.mubr.bf16.gmra.mrb[36].mxu0 %v388_v16 }
  0x80   : > { %687 = vmatprep.mubr.bf16.mxu0 %v3143_v2  ;;  %2786 = vmatmul.mubr.bf16.gmra.mrb[36].mxu1 %v390_v22 }
  0x81   : > { %2789 = vmatprep.mubr.bf16.mxu1 %v3373_v12 }
  0x87   : > { %688 = vmatmul.mubr.bf16.gmra.mrb[40].mxu0 %v389_v7 }
  0x88   : > { %697 = vmatprep.mubr.bf16.mxu0 %v3143_v2  ;;  %2790 = vmatmul.mubr.bf16.gmra.mrb[40].mxu1 %v3400_v26 }
  0x89   : > { %2793 = vmatprep.mubr.bf16.mxu1 %v3436_v49 }
  0x8f   : > { %698 = vmatmul.mubr.bf16.gmra.mrb[44].mxu0 %v390_v22 }
  0x90   : > { %2794 = vmatmul.mubr.bf16.gmra.mrb[44].mxu1 %v3468_v10 }
 0x10a   : > { %v589_v8 = vpop.f32.mrb[0].mxu0  ;;  %v709_v2 = vpop.f32.mrb[0].mxu1 }
 0x10b   : > { %v3539_v11 = vpop.f32.mrb[1].mxu0  ;;  %v3548_v26 = vpop.f32.mrb[1].mxu1 }
 0x10c   : > { %v593_v13 = vpop.f32.mrb[2].mxu0  ;;  %v713_v19 = vpop.f32.mrb[2].mxu1 }
 0x10d   : > { %v3541_v14 = vpack.c.bf16 %v593_v13, %v589_v8  ;;  %v3543_v18 = vpop.f32.mrb[3].mxu0  ;;  %v3552_v10 = vpack.c.bf16 %v713_v19, %v709_v2  ;;  %v3554_v27 = vpop.f32.mrb[3].mxu1 }
 0x10f   : > { %2605 = vmatprep.mubr.bf16.mxu1 %v3541_v14 }
 0x112   : > { %v599_v49 = vpop.f32.mrb[4].mxu0  ;;  %v719_v39 = vpop.f32.mrb[4].mxu1 }
 0x113   : > { %v3550_v25 = vpop.f32.mrb[5].mxu0  ;;  %v3564_v40 = vpop.f32.mrb[5].mxu1 }
 0x114   : > { %v603_v30 = vpop.f32.mrb[6].mxu0  ;;  %v723_v9 = vpop.f32.mrb[6].mxu1 }
 0x115   : > { %v3558_v42 = vpack.c.bf16 %v603_v30, %v599_v49  ;;  %v3560_v33 = vpop.f32.mrb[7].mxu0  ;;  %v3568_v50 = vpack.c.bf16 %v723_v9, %v719_v39  ;;  %v3570_v51 = vpop.f32.mrb[7].mxu1 }
 0x11a   : > { %v609_v44 = vpop.f32.mrb[8].mxu0  ;;  %v729_v7 = vpop.f32.mrb[8].mxu1 }
 0x11b   : > { %v3566_v45 = vpop.f32.mrb[9].mxu0  ;;  %v3580_v22 = vpop.f32.mrb[9].mxu1 }
 0x11c   : > { %v613_v55 = vpop.f32.mrb[10].mxu0  ;;  %v733_v13 = vpop.f32.mrb[10].mxu1 }
 0x11d   : > { %v3574_v58 = vpack.c.bf16 %v613_v55, %v609_v44  ;;  %v3576_v6 = vpop.f32.mrb[11].mxu0  ;;  %v3584_v49 = vpack.c.bf16 %v733_v13, %v729_v7  ;;  %v3586_v19 = vpop.f32.mrb[11].mxu1 }
 0x122   : > { %v619_v8 = vpop.f32.mrb[12].mxu0  ;;  %v739_v56 = vpop.f32.mrb[12].mxu1 }
 0x123   : > { %v3582_v2 = vpop.f32.mrb[13].mxu0  ;;  %v3596_v31 = vpop.f32.mrb[13].mxu1 }
 0x124   : > { %v623_v30 = vpop.f32.mrb[14].mxu0  ;;  %v743_v36 = vpop.f32.mrb[14].mxu1 }
 0x125   : > { %v3590_v44 = vpack.c.bf16 %v623_v30, %v619_v8  ;;  %v3592_v9 = vpop.f32.mrb[15].mxu0  ;;  %v3598_v13 = vpack.c.bf16 %v743_v36, %v739_v56  ;;  %v745_v12 = vpop.f32.mrb[15].mxu1 }
 0x126   : > { %v919_v55 = vpack.c.bf16 %v3592_v9, %v3582_v2  ;;  %v955_v62 = vpack.c.bf16 %v745_v12, %v3596_v31 }
 0x12a   : > { %v629_v16 = vpop.f32.mrb[16].mxu0 }
 0x12b   : > { %v631_v7 = vpop.f32.mrb[17].mxu0 }
 0x12c   : > { %v633_v63 = vpop.f32.mrb[18].mxu0 }
 0x12d   : > { %v3601_v39 = vpack.c.bf16 %v633_v63, %v629_v16  ;;  %v635_v8 = vpop.f32.mrb[19].mxu0 }
 0x12e   : > { %v922_v30 = vpack.c.bf16 %v635_v8, %v631_v7 }
 0x132   : > { %v639_v38 = vpop.f32.mrb[20].mxu0 }
 0x133   : > { %v641_v37 = vpop.f32.mrb[21].mxu0 }
 0x134   : > { %v643_v17 = vpop.f32.mrb[22].mxu0 }
 0x135   : > { %v3603_v2 = vpack.c.bf16 %v643_v17, %v639_v38  ;;  %v645_v9 = vpop.f32.mrb[23].mxu0 }
 0x136   : > { %v925_v15 = vpack.c.bf16 %v645_v9, %v641_v37 }
 0x13a   : > { %v649_v5 = vpop.f32.mrb[24].mxu0 }
 0x13b   : > { %v651_v4 = vpop.f32.mrb[25].mxu0 }
 0x13c   : > { %v653_v61 = vpop.f32.mrb[26].mxu0 }
 0x13d   : > { %v3605_v36 = vpack.c.bf16 %v653_v61, %v649_v5  ;;  %v655_v56 = vpop.f32.mrb[27].mxu0  ;;  %v4499_v61 = vpack.c.bf16 %v3543_v18, %v3539_v11  ;;  %v4501_v18 = vpack.c.bf16 %v3576_v6, %v3566_v45  ;;  %v4504_v45 = vpack.c.bf16 %v3586_v19, %v3580_v22  ;;  %v2767_v6 = vpop.f32.mrb[16].mxu1 }
 0x13e   : > { %v928_v57 = vpack.c.bf16 %v655_v56, %v651_v4 }
 0x142   : > { %v659_v54 = vpop.f32.mrb[28].mxu0 }
 0x143   : > { %v661_v12 = vpop.f32.mrb[29].mxu0 }
 0x144   : > { %v663_v63 = vpop.f32.mrb[30].mxu0 }
 0x145   : > { %v3607_v31 = vpack.c.bf16 %v663_v63, %v659_v54  ;;  %v665_v16 = vpop.f32.mrb[31].mxu0 }
 0x146   : > { %v931_v7 = vpack.c.bf16 %v665_v16, %v661_v12  ;;  %v4500_v12 = vpack.c.bf16 %v3560_v33, %v3550_v25  ;;  %v4502_v33 = vpack.c.bf16 %v3554_v27, %v3548_v26 }
 0x14a   : > { %v669_v8 = vpop.f32.mrb[32].mxu0 }
 0x14b   : > { %v671_v53 = vpop.f32.mrb[33].mxu0 }
 0x14c   : > { %v673_v17 = vpop.f32.mrb[34].mxu0 }
 0x14d   : > { %v3609_v38 = vpack.c.bf16 %v673_v17, %v669_v8  ;;  %v675_v37 = vpop.f32.mrb[35].mxu0 }
 0x14e   : > { %v934_v9 = vpack.c.bf16 %v675_v37, %v671_v53 }
 0x150   : > { %2589 = vmatprep.subr.bf16.mxu1 %v934_v9 }
 0x151   : > { %2590 = vmatpush3.bf16.xpose.msra.mxu1 %v4499_v61 }
 0x152   : > { %v679_v4 = vpop.f32.mrb[36].mxu0 }
 0x153   : > { %v681_v5 = vpop.f32.mrb[37].mxu0 }
 0x154   : > { %v683_v56 = vpop.f32.mrb[38].mxu0 }
 0x155   : > { %v3614_v48 = vpack.c.bf16 %v683_v56, %v679_v4  ;;  %v685_v54 = vpop.f32.mrb[39].mxu0 }
 0x156   : > { %v937_v63 = vpack.c.bf16 %v685_v54, %v681_v5  ;;  %v4503_v54 = vpack.c.bf16 %v3570_v51, %v3564_v40 }
 0x158   : > { %2591 = vmatprep.subr.bf16.mxu1 %v937_v63  ;;  %v782_v63 = vpop.f32.mrb[17].mxu1 }
 0x159   : > { %2592 = vmatpush3.bf16.xpose.msra.mxu1 %v4500_v12 }
 0x15a   : > { %v689_v16 = vpop.f32.mrb[40].mxu0 }
 0x15b   : > { %v691_v8 = vpop.f32.mrb[41].mxu0 }
 0x15c   : > { %v693_v53 = vpop.f32.mrb[42].mxu0 }
 0x15d   : > { %v3619_v17 = vpack.c.bf16 %v693_v53, %v689_v16  ;;  %v695_v37 = vpop.f32.mrb[43].mxu0 }
 0x15e   : > { %v940_v11 = vpack.c.bf16 %v695_v37, %v691_v8 }
 0x160   : > { %2593 = vmatprep.subr.bf16.mxu1 %v940_v11 }
 0x161   : > { %2594 = vmatpush3.bf16.xpose.msra.mxu1 %v4501_v18 }
 0x162   : > { %v699_v9 = vpop.f32.mrb[44].mxu0 }
 0x163   : > { %v701_v61 = vpop.f32.mrb[45].mxu0 }
 0x164   : > { %v703_v4 = vpop.f32.mrb[46].mxu0 }
 0x165   : > { %v3624_v5 = vpack.c.bf16 %v703_v4, %v699_v9  ;;  %v705_v56 = vpop.f32.mrb[47].mxu0 }
 0x166   : > { %v943_v25 = vpack.c.bf16 %v705_v56, %v701_v61 }
 0x168   : > { %2595 = vmatprep.subr.bf16.mxu1 %v943_v25 }
 0x169   : > { %2596 = vmatpush3.bf16.xpose.msra.mxu1 %v919_v55  ;;  %v2768_v55 = vpop.f32.mrb[18].mxu1 }
 0x16a   : > { %2597 = vmatprep.subr.bf16.mxu1 %v4502_v33  ;;  %v914_v12 = vpack.c.bf16 %v2768_v55, %v2767_v6  ;;  %v785_v16 = vpop.f32.mrb[19].mxu1 }
 0x16b   : > { %v911_v26 = vpack.c.bf16 %v785_v16, %v782_v63  ;;  %v2771_v27 = vpop.f32.mrb[20].mxu1 }
 0x171   : > { %2598 = vmatpush3.bf16.xpose.msra.mxu1 %v922_v30  ;;  %v798_v30 = vpop.f32.mrb[21].mxu1 }
 0x172   : > { %2599 = vmatprep.subr.bf16.mxu1 %v4503_v54  ;;  %v2772_v8 = vpop.f32.mrb[22].mxu1 }
 0x173   : > { %v920_v53 = vpack.c.bf16 %v2772_v8, %v2771_v27  ;;  %v801_v40 = vpop.f32.mrb[23].mxu1 }
 0x174   : > { %v2775_v51 = vpop.f32.mrb[24].mxu1 }
 0x179   : > { %2600 = vmatpush3.bf16.xpose.msra.mxu1 %v925_v15  ;;  %v917_v15 = vpack.c.bf16 %v801_v40, %v798_v30 }
 0x17a   : > { %2601 = vmatprep.subr.bf16.mxu1 %v4504_v45 }
 0x181   : > { %2602 = vmatpush3.bf16.xpose.msra.mxu1 %v928_v57  ;;  %v814_v57 = vpop.f32.mrb[25].mxu1 }
 0x182   : > { %2603 = vmatprep.subr.bf16.mxu1 %v955_v62  ;;  %v2776_v62 = vpop.f32.mrb[26].mxu1 }
 0x183   : > { %v926_v22 = vpack.c.bf16 %v2776_v62, %v2775_v51  ;;  %v817_v19 = vpop.f32.mrb[27].mxu1 }
 0x184   : > { %v2779_v37 = vpop.f32.mrb[28].mxu1 }
 0x185   : > { %v830_v11 = vpop.f32.mrb[29].mxu1 }
 0x186   : > { %v2780_v18 = vpop.f32.mrb[30].mxu1 }
 0x187   : > { %v932_v9 = vpack.c.bf16 %v2780_v18, %v2779_v37  ;;  %v833_v61 = vpop.f32.mrb[31].mxu1 }
 0x188   : > { %v929_v4 = vpack.c.bf16 %v833_v61, %v830_v11  ;;  %v2783_v56 = vpop.f32.mrb[32].mxu1 }
 0x189   : > { %2604 = vmatpush3.bf16.xpose.msra.mxu1 %v931_v7  ;;  %v923_v7 = vpack.c.bf16 %v817_v19, %v814_v57 }
 0x190   : > { %2606 = vmatmul.mubr.bf16.vlgmr.msra.gmra.mrb[48].mxu1 %v3541_v14  ;;  %v846_v14 = vpop.f32.mrb[33].mxu1 }
 0x191   : > { %2607 = vmatprep.mubr.bf16.mxu1 %v3558_v42  ;;  %v2784_v25 = vpop.f32.mrb[34].mxu1 }
 0x192   : > { %v938_v33 = vpack.c.bf16 %v2784_v25, %v2783_v56  ;;  %v849_v54 = vpop.f32.mrb[35].mxu1 }
 0x193   : > { %v935_v45 = vpack.c.bf16 %v849_v54, %v846_v14  ;;  %v2787_v6 = vpop.f32.mrb[36].mxu1 }
 0x194   : > { %v862_v63 = vpop.f32.mrb[37].mxu1 }
 0x195   : > { %2637 = vmatprep.subr.bf16.mxu0 %v935_v45  ;;  %v2788_v55 = vpop.f32.mrb[38].mxu1 }
 0x196   : > { %2638 = vmatpush3.bf16.msra.mxu0 %v911_v26  ;;  %v944_v16 = vpack.c.bf16 %v2788_v55, %v2787_v6  ;;  %v865_v27 = vpop.f32.mrb[39].mxu1 }
 0x197   : > { %2639 = vmatprep.subr.bf16.mxu0 %v938_v33  ;;  %v2791_v30 = vpop.f32.mrb[40].mxu1 }
 0x198   : > { %2608 = vmatmul.mubr.bf16.gmra.mrb[52].mxu1 %v3558_v42  ;;  %v941_v42 = vpack.c.bf16 %v865_v27, %v862_v63  ;;  %v878_v8 = vpop.f32.mrb[41].mxu1 }
 0x199   : > { %2609 = vmatprep.mubr.bf16.mxu1 %v3574_v58  ;;  %v2792_v40 = vpop.f32.mrb[42].mxu1 }
 0x19a   : > { %2640 = vmatpush3.bf16.msra.mxu0 %v914_v12  ;;  %v950_v51 = vpack.c.bf16 %v2792_v40, %v2791_v30  ;;  %v881_v57 = vpop.f32.mrb[43].mxu1 }
 0x19b   : > { %2641 = vmatprep.subr.bf16.mxu0 %v941_v42  ;;  %v947_v62 = vpack.c.bf16 %v881_v57, %v878_v8  ;;  %v2795_v19 = vpop.f32.mrb[44].mxu1 }
 0x19c   : > { %v894_v37 = vpop.f32.mrb[45].mxu1 }
 0x19d   : > { %v2796_v11 = vpop.f32.mrb[46].mxu1 }
 0x19e   : > { %2642 = vmatpush3.bf16.msra.mxu0 %v917_v15  ;;  %v956_v26 = vpack.c.bf16 %v2796_v11, %v2795_v19  ;;  %v897_v18 = vpop.f32.mrb[47].mxu1 }
 0x19f   : > { %2643 = vmatprep.subr.bf16.mxu0 %v944_v16 }
 0x1a0   : > { %2610 = vmatmul.mubr.bf16.gmra.mrb[56].mxu1 %v3574_v58  ;;  %v953_v58 = vpack.c.bf16 %v897_v18, %v894_v37 }
 0x1a1   : > { %2611 = vmatprep.mubr.bf16.mxu1 %v3590_v44 }
 0x1a2   : > { %2644 = vmatpush3.bf16.msra.mxu0 %v920_v53 }
 0x1a3   : > { %2645 = vmatprep.subr.bf16.mxu0 %v947_v62 }
 0x1a6   : > { %2646 = vmatpush3.bf16.msra.mxu0 %v923_v7 }
 0x1a7   : > { %2647 = vmatprep.subr.bf16.mxu0 %v950_v51 }
 0x1a8   : > { %2612 = vmatmul.mubr.bf16.gmra.mrb[60].mxu1 %v3590_v44 }
 0x1a9   : > { %2613 = vmatprep.mubr.bf16.mxu1 %v3601_v39 }
 0x1aa   : > { %2648 = vmatpush3.bf16.msra.mxu0 %v926_v22 }
 0x1ab   : > { %2649 = vmatprep.subr.bf16.mxu0 %v953_v58 }
 0x1ae   : > { %2650 = vmatpush3.bf16.msra.mxu0 %v929_v4 }
 0x1af   : > { %2651 = vmatprep.subr.bf16.mxu0 %v956_v26 }
 0x1b0   : > { %2614 = vmatmul.mubr.bf16.gmra.mrb[64].mxu1 %v3601_v39 }
 0x1b1   : > { %2615 = vmatprep.mubr.bf16.mxu1 %v3603_v2 }
 0x1b2   : > { %2652 = vmatpush3.bf16.msra.mxu0 %v932_v9 }
 0x1b8   : > { %2616 = vmatmul.mubr.bf16.gmra.mrb[68].mxu1 %v3603_v2 }
 0x1b9   : > { %2617 = vmatprep.mubr.bf16.mxu1 %v3605_v36 }
 0x1c0   : > { %2618 = vmatmul.mubr.bf16.gmra.mrb[72].mxu1 %v3605_v36 }
 0x1c1   : > { %2619 = vmatprep.mubr.bf16.mxu1 %v3607_v31 }
 0x1c8   : > { %2620 = vmatmul.mubr.bf16.gmra.mrb[76].mxu1 %v3607_v31 }
 0x1c9   : > { %2621 = vmatprep.mubr.bf16.mxu1 %v3609_v38 }
 0x1d0   : > { %2622 = vmatmul.mubr.bf16.gmra.mrb[80].mxu1 %v3609_v38 }
 0x1d1   : > { %2623 = vmatprep.mubr.bf16.mxu1 %v3614_v48 }
 0x1d8   : > { %2624 = vmatmul.mubr.bf16.gmra.mrb[84].mxu1 %v3614_v48 }
 0x1d9   : > { %2625 = vmatprep.mubr.bf16.mxu1 %v3619_v17 }
 0x1e0   : > { %2626 = vmatmul.mubr.bf16.gmra.mrb[88].mxu1 %v3619_v17 }
 0x1e1   : > { %2627 = vmatprep.mubr.bf16.mxu1 %v3624_v5 }
 0x1e8   : > { %2628 = vmatmul.mubr.bf16.gmra.mrb[92].mxu1 %v3624_v5 }
 0x1e9   : > { %2629 = vmatprep.mubr.bf16.mxu1 %v3552_v10 }
 0x1f0   : > { %2630 = vmatmul.mubr.bf16.gmra.mrb[96].mxu1 %v3552_v10 }
 0x1f1   : > { %2631 = vmatprep.mubr.bf16.mxu1 %v3568_v50 }
 0x1f8   : > { %2632 = vmatmul.mubr.bf16.gmra.mrb[100].mxu1 %v3568_v50 }
 0x1f9   : > { %2633 = vmatprep.mubr.bf16.mxu1 %v3584_v49 }
 0x200   : > { %2634 = vmatmul.mubr.bf16.gmra.mrb[104].mxu1 %v3584_v49 }
 0x201   : > { %2635 = vmatprep.mubr.bf16.mxu1 %v3598_v13 }
 0x208   : > { %2636 = vmatmul.mubr.bf16.gmra.mrb[108].mxu1 %v3598_v13 }
 0x263   : > { %v3666_v48 = vpop.f32.mrb[48].mxu1 }
 0x264   : > { %v3668_v39 = vpop.f32.mrb[49].mxu1 }
 0x265   : > { %v3670_v44 = vpop.f32.mrb[50].mxu1  ;;  %v1150_v10 = vmax.f32 %v3666_v48, %v3668_v39 }
 0x266   : > { %v3674_v2 = vpop.f32.mrb[51].mxu1 }
 0x267   : > { %1151 = vmax.xlane.f32.xlu0 %v1150_v10  ;;  %v1153_v50 = vmax.f32 %v3670_v44, %v3674_v2 }
 0x26b   : > { %1154 = vmax.xlane.f32.xlu0 %v1153_v50  ;;  %v3678_v49 = vpop.f32.mrb[52].mxu1 }
 0x26c   : > { %v3680_v36 = vpop.f32.mrb[53].mxu1 }
 0x26d   : > { %v3682_v13 = vpop.f32.mrb[54].mxu1  ;;  %v1156_v31 = vmax.f32 %v3678_v49, %v3680_v36 }
 0x26e   : > { %v3686_v38 = vpop.f32.mrb[55].mxu1 }
 0x26f   : > { %1157 = vmax.xlane.f32.xlu1 %v1156_v31  ;;  %v1159_v17 = vmax.f32 %v3682_v13, %v3686_v38 }
 0x273   : > { %1160 = vmax.xlane.f32.xlu1 %v1159_v17  ;;  %v3690_v5 = vpop.f32.mrb[56].mxu1 }
 0x274   : > { %v3692_v12 = vpop.f32.mrb[57].mxu1 }
 0x275   : > { %v3694_v53 = vpop.f32.mrb[58].mxu1  ;;  %v1162_v15 = vmax.f32 %v3690_v5, %v3692_v12 }
 0x276   : > { %v3698_v22 = vpop.f32.mrb[59].mxu1 }
 0x277   : > { %1163 = vmax.xlane.f32.xlu0 %v1162_v15  ;;  %v1165_v7 = vmax.f32 %v3694_v53, %v3698_v22 }
 0x279   : > { %1166 = vmax.xlane.f32.xlu1 %v1165_v7 }
 0x27b   : > { %v3702_v9 = vpop.f32.mrb[60].mxu1 }
 0x27c   : > { %v3704_v61 = vpop.f32.mrb[61].mxu1 }
 0x27d   : > { %v3706_v4 = vpop.f32.mrb[62].mxu1  ;;  %v1168_v56 = vmax.f32 %v3702_v9, %v3704_v61 }
 0x27e   : > { %v3710_v14 = vpop.f32.mrb[63].mxu1 }
 0x27f   : > { %1169 = vmax.xlane.f32.xlu0 %v1168_v56  ;;  %v1171_v25 = vmax.f32 %v3706_v4, %v3710_v14 }
 0x281   : > { %1172 = vmax.xlane.f32.xlu1 %v1171_v25 }
 0x283   : > { %v3714_v33 = vpop.f32.mrb[64].mxu1 }
 0x284   : > { %v3716_v54 = vpop.f32.mrb[65].mxu1 }
 0x285   : > { %v3718_v45 = vpop.f32.mrb[66].mxu1  ;;  %v1174_v6 = vmax.f32 %v3714_v33, %v3716_v54 }
 0x286   : > { %v3722_v63 = vpop.f32.mrb[67].mxu1 }
 0x287   : > { %1175 = vmax.xlane.f32.xlu0 %v1174_v6  ;;  %v1177_v55 = vmax.f32 %v3718_v45, %v3722_v63 }
 0x289   : > { %1178 = vmax.xlane.f32.xlu1 %v1177_v55 }
 0x28b   : > { %v3726_v16 = vpop.f32.mrb[68].mxu1 }
 0x28c   : > { %v3728_v27 = vpop.f32.mrb[69].mxu1 }
 0x28d   : > { %v3730_v42 = vpop.f32.mrb[70].mxu1  ;;  %v1180_v30 = vmax.f32 %v3726_v16, %v3728_v27 }
 0x28e   : > { %v3734_v8 = vpop.f32.mrb[71].mxu1 }
 0x28f   : > { %1181 = vmax.xlane.f32.xlu0 %v1180_v30  ;;  %v1183_v40 = vmax.f32 %v3730_v42, %v3734_v8 }
 0x291   : > { %1184 = vmax.xlane.f32.xlu1 %v1183_v40 }
 0x293   : > { %v3738_v51 = vpop.f32.mrb[72].mxu1 }
 0x294   : > { %v3740_v57 = vpop.f32.mrb[73].mxu1 }
 0x295   : > { %v3742_v62 = vpop.f32.mrb[74].mxu1  ;;  %v1186_v19 = vmax.f32 %v3738_v51, %v3740_v57 }
 0x296   : > { %v3746_v37 = vpop.f32.mrb[75].mxu1 }
 0x297   : > { %1187 = vmax.xlane.f32.xlu0 %v1186_v19  ;;  %v1189_v11 = vmax.f32 %v3742_v62, %v3746_v37 }
 0x299   : > { %1190 = vmax.xlane.f32.xlu1 %v1189_v11 }
 0x29b   : > { %v3750_v26 = vpop.f32.mrb[76].mxu1 }
 0x29c   : > { %v3752_v18 = vpop.f32.mrb[77].mxu1 }
 0x29d   : > { %v3754_v58 = vpop.f32.mrb[78].mxu1  ;;  %v1192_v10 = vmax.f32 %v3750_v26, %v3752_v18 }
 0x29e   : > { %v3758_v50 = vpop.f32.mrb[79].mxu1 }
 0x29f   : > { %1193 = vmax.xlane.f32.xlu0 %v1192_v10  ;;  %v1195_v31 = vmax.f32 %v3754_v58, %v3758_v50 }
 0x2a1   : > { %1196 = vmax.xlane.f32.xlu1 %v1195_v31 }
 0x2a3   : > { %v3762_v17 = vpop.f32.mrb[80].mxu1 }
 0x2a4   : > { %v3764_v15 = vpop.f32.mrb[81].mxu1 }
 0x2a5   : > { %v3766_v7 = vpop.f32.mrb[82].mxu1  ;;  %v1198_v56 = vmax.f32 %v3762_v17, %v3764_v15 }
 0x2a6   : > { %v3770_v25 = vpop.f32.mrb[83].mxu1 }
 0x2a7   : > { %4505 = vst [vmem:[#allocation37_spill] sm:$0xff] %v3770_v25  ;;  %1199 = vmax.xlane.f32.xlu0 %v1198_v56  ;;  %v1201_v6 = vmax.f32 %v3766_v7, %v3770_v25 }
 0x2a9   : > { %1202 = vmax.xlane.f32.xlu1 %v1201_v6 }
 0x2ab   : > { %v3774_v55 = vpop.f32.mrb[84].mxu1 }
 0x2ac   : > { %4506 = vst [vmem:[#allocation38_spill] sm:$0xff] %v3774_v55  ;;  %v3776_v30 = vpop.f32.mrb[85].mxu1 }
 0x2ad   : > { %4507 = vst [vmem:[#allocation39_spill] sm:$0xff] %v3776_v30  ;;  %v3778_v40 = vpop.f32.mrb[86].mxu1  ;;  %v1204_v19 = vmax.f32 %v3774_v55, %v3776_v30 }
 0x2ae   : > { %4508 = vst [vmem:[#allocation40_spill] sm:$0xff] %v3778_v40  ;;  %v3782_v11 = vpop.f32.mrb[87].mxu1 }
 0x2af   : > { %4509 = vst [vmem:[#allocation41_spill] sm:$0xff] %v3782_v11  ;;  %1205 = vmax.xlane.f32.xlu0 %v1204_v19  ;;  %v1207_v10 = vmax.f32 %v3778_v40, %v3782_v11 }
 0x2b1   : > { %1208 = vmax.xlane.f32.xlu1 %v1207_v10 }
 0x2b3   : > { %v3786_v31 = vpop.f32.mrb[88].mxu1 }
 0x2b4   : > { %4510 = vst [vmem:[#allocation42_spill] sm:$0xff] %v3786_v31  ;;  %v3788_v56 = vpop.f32.mrb[89].mxu1 }
 0x2b5   : > { %4511 = vst [vmem:[#allocation43_spill] sm:$0xff] %v3788_v56  ;;  %v3790_v6 = vpop.f32.mrb[90].mxu1  ;;  %v1210_v47 = vmax.f32 %v3786_v31, %v3788_v56 }
 0x2b6   : > { %4512 = vst [vmem:[#allocation44_spill] sm:$0xff] %v3790_v6  ;;  %v3794_v59 = vpop.f32.mrb[91].mxu1 }
 0x2b7   : > { %4513 = vst [vmem:[#allocation45_spill] sm:$0xff] %v3794_v59  ;;  %1211 = vmax.xlane.f32.xlu0 %v1210_v47  ;;  %v1213_v52 = vmax.f32 %v3790_v6, %v3794_v59 }
 0x2b9   : > { %1214 = vmax.xlane.f32.xlu1 %v1213_v52 }
 0x2bb   : > { %v3798_v19 = vpop.f32.mrb[92].mxu1 }
 0x2bc   : > { %4514 = vst [vmem:[#allocation46_spill] sm:$0xff] %v3798_v19  ;;  %v3800_v46 = vpop.f32.mrb[93].mxu1 }
 0x2bd   : > { %4515 = vst [vmem:[#allocation47_spill] sm:$0xff] %v3800_v46  ;;  %v3802_v10 = vpop.f32.mrb[94].mxu1  ;;  %v1216_v32 = vmax.f32 %v3798_v19, %v3800_v46 }
 0x2be   : > { %4516 = vst [vmem:[#allocation48_spill] sm:$0xff] %v3802_v10  ;;  %v3806_v35 = vpop.f32.mrb[95].mxu1 }
 0x2bf   : > { %4517 = vst [vmem:[#allocation49_spill] sm:$0xff] %v3806_v35  ;;  %1217 = vmax.xlane.f32.xlu0 %v1216_v32  ;;  %v1219_v34 = vmax.f32 %v3802_v10, %v3806_v35 }
 0x2c1   : > { %1220 = vmax.xlane.f32.xlu1 %v1219_v34 }
 0x2c3   : > { %v3810_v47 = vpop.f32.mrb[96].mxu1 }
 0x2c4   : > { %v3812_v24 = vpop.f32.mrb[97].mxu1 }
 0x2c5   : > { %v3814_v52 = vpop.f32.mrb[98].mxu1 }
 0x2c6   : > { %v3818_v3 = vpop.f32.mrb[99].mxu1 }
 0x2cb   : > { %v3822_v43 = vpop.f32.mrb[100].mxu1 }
 0x2cc   : > { %v3824_v32 = vpop.f32.mrb[101].mxu1 }
 0x2cd   : > { %v3826_v41 = vpop.f32.mrb[102].mxu1 }
 0x2ce   : > { %v3830_v21 = vpop.f32.mrb[103].mxu1 }
 0x2d3   : > { %v3834_v23 = vpop.f32.mrb[104].mxu1 }
 0x2d4   : > { %v3836_v0 = vpop.f32.mrb[105].mxu1 }
 0x2d5   : > { %v3838_v60 = vpop.f32.mrb[106].mxu1 }
 0x2d6   : > { %v3842_v29 = vpop.f32.mrb[107].mxu1 }
 0x2db   : > { %v3846_v34 = vpop.f32.mrb[108].mxu1 }
 0x2dc   : > { %v3848_v35 = vpop.f32.mrb[109].mxu1 }
 0x2dd   : > { %v3850_v10 = vpop.f32.mrb[110].mxu1 }
 0x2de   : > { %v3854_v46 = vpop.f32.mrb[111].mxu1 }
 0x2f4   : > { %v1152_v1 = vpop.xlane.xlu0 %1151 }
 0x2f5   : > { %v1246_v59 = vsub.f32 %v3666_v48, %v1152_v1  ;;  %v1247_v6 = vsub.f32 %v3668_v39, %v1152_v1 }
 0x2f7   : > { %v1310_v28 = vmul.f32 1.442695, %v1246_v59  ;;  %v1312_v56 = vmul.f32 1.442695, %v1247_v6 }
 0x2f8   : > { %v1155_v31 = vpop.xlane.xlu0 %1154 }
 0x2f9   : > { %2887 = vpow2.f32 %v1310_v28  ;;  %v1248_v11 = vsub.f32 %v3670_v44, %v1155_v31  ;;  %v1249_v40 = vsub.f32 %v3674_v2, %v1155_v31 }
 0x2fa   : > { %2889 = vpow2.f32 %v1312_v56 }
 0x2fb   : > { %v1314_v20 = vmul.f32 1.442695, %v1248_v11  ;;  %v1316_v30 = vmul.f32 1.442695, %v1249_v40 }
 0x2fc   : > { %v1158_v55 = vpop.xlane.xlu1 %1157 }
 0x2fd   : > { %2891 = vpow2.f32 %v1314_v20  ;;  %v1250_v19 = vsub.f32 %v3678_v49, %v1158_v55  ;;  %v1251_v25 = vsub.f32 %v3680_v36, %v1158_v55 }
 0x2fe   : > { %2893 = vpow2.f32 %v1316_v30 }
 0x2ff   : > { %v1318_v48 = vmul.f32 1.442695, %v1250_v19  ;;  %v1320_v1 = vmul.f32 1.442695, %v1251_v25 }
 0x300   : > { %v1161_v59 = vpop.xlane.xlu1 %1160 }
 0x301   : > { %2895 = vpow2.f32 %v1318_v48  ;;  %v1252_v28 = vsub.f32 %v3682_v13, %v1161_v59  ;;  %v1253_v39 = vsub.f32 %v3686_v38, %v1161_v59 }
 0x302   : > { %2897 = vpow2.f32 %v1320_v1  ;;  %v4518_v1 = vmax.f32 %v3810_v47, %v3812_v24 }
 0x303   : > { %v3866_v44 = vpop.eup %2887  ;;  %v1322_v2 = vmul.f32 1.442695, %v1252_v28  ;;  %v1324_v40 = vmul.f32 1.442695, %v1253_v39 }
 0x304   : > { %v3868_v11 = vpop.eup %2889  ;;  %v1164_v20 = vpop.xlane.xlu0 %1163 }
 0x305   : > { %2899 = vpow2.f32 %v1322_v2  ;;  %v1254_v49 = vsub.f32 %v3690_v5, %v1164_v20  ;;  %v1255_v36 = vsub.f32 %v3692_v12, %v1164_v20  ;;  %v1438_v25 = vadd.f32 %v3868_v11, %v3866_v44 }
 0x306   : > { %2901 = vpow2.f32 %v1324_v40  ;;  %v1167_v13 = vpop.xlane.xlu1 %1166 }
 0x307   : > { %v3874_v55 = vpop.eup %2891  ;;  %v1326_v38 = vmul.f32 1.442695, %v1254_v49  ;;  %v1328_v30 = vmul.f32 1.442695, %v1255_v36  ;;  %v1256_v31 = vsub.f32 %v3694_v53, %v1167_v13  ;;  %v1257_v56 = vsub.f32 %v3698_v22, %v1167_v13  ;;  %1439 = vadd.xlane.f32.xlu0 %v1438_v25 }
 0x308   : > { %v3878_v6 = vpop.eup %2893  ;;  %v4519_v13 = vmax.f32 %v3814_v52, %v3818_v3 }
 0x309   : > { %2903 = vpow2.f32 %v1326_v38  ;;  %v1330_v5 = vmul.f32 1.442695, %v1256_v31  ;;  %v1332_v19 = vmul.f32 1.442695, %v1257_v56  ;;  %v1441_v12 = vadd.f32 %v3878_v6, %v3874_v55 }
 0x30a   : > { %2905 = vpow2.f32 %v1328_v30 }
 0x30b   : > { %v3882_v48 = vpop.eup %2895  ;;  %2907 = vpow2.f32 %v1330_v5  ;;  %1442 = vadd.xlane.f32.xlu1 %v1441_v12  ;;  %1223 = vmax.xlane.f32.xlu0 %v4518_v1 }
 0x30c   : > { %v3887_v53 = vpop.eup %2897  ;;  %2909 = vpow2.f32 %v1332_v19  ;;  %v1170_v22 = vpop.xlane.xlu0 %1169 }
 0x30d   : > { %v1258_v59 = vsub.f32 %v3702_v9, %v1170_v22  ;;  %v1259_v28 = vsub.f32 %v3704_v61, %v1170_v22  ;;  %v1444_v39 = vadd.f32 %v3887_v53, %v3882_v48 }
 0x30e   : > { %v1173_v2 = vpop.xlane.xlu1 %1172 }
 0x30f   : > { %v3893_v40 = vpop.eup %2899  ;;  %v1334_v20 = vmul.f32 1.442695, %v1258_v59  ;;  %v1336_v49 = vmul.f32 1.442695, %v1259_v28  ;;  %v1260_v36 = vsub.f32 %v3706_v4, %v1173_v2  ;;  %v1261_v25 = vsub.f32 %v3710_v14, %v1173_v2  ;;  %1445 = vadd.xlane.f32.xlu0 %v1444_v39  ;;  %1226 = vmax.xlane.f32.xlu1 %v4519_v13 }
 0x310   : > { %v3900_v9 = vpop.eup %2901  ;;  %v4520_v4 = vmax.f32 %v3822_v43, %v3824_v32 }
 0x311   : > { %2911 = vpow2.f32 %v1334_v20  ;;  %v1338_v61 = vmul.f32 1.442695, %v1260_v36  ;;  %v1340_v38 = vmul.f32 1.442695, %v1261_v25  ;;  %v1447_v30 = vadd.f32 %v3900_v9, %v3893_v40 }
 0x312   : > { %2913 = vpow2.f32 %v1336_v49  ;;  %v4521_v49 = vmax.f32 %v3826_v41, %v3830_v21 }
 0x313   : > { %v3904_v31 = vpop.eup %2903  ;;  %2915 = vpow2.f32 %v1338_v61  ;;  %1448 = vadd.xlane.f32.xlu1 %v1447_v30  ;;  %1229 = vmax.xlane.f32.xlu0 %v4520_v4 }
 0x314   : > { %v3909_v14 = vpop.eup %2905  ;;  %2917 = vpow2.f32 %v1340_v38  ;;  %v1176_v56 = vpop.xlane.xlu0 %1175 }
 0x315   : > { %v3911_v5 = vpop.eup %2907  ;;  %v1262_v19 = vsub.f32 %v3714_v33, %v1176_v56  ;;  %v1263_v12 = vsub.f32 %v3716_v54, %v1176_v56  ;;  %v1450_v1 = vadd.f32 %v3909_v14, %v3904_v31 }
 0x316   : > { %v3917_v22 = vpop.eup %2909  ;;  %v1179_v59 = vpop.xlane.xlu1 %1178 }
 0x317   : > { %v1342_v28 = vmul.f32 1.442695, %v1262_v19  ;;  %v1344_v39 = vmul.f32 1.442695, %v1263_v12  ;;  %v1264_v2 = vsub.f32 %v3718_v45, %v1179_v59  ;;  %v1265_v20 = vsub.f32 %v3722_v63, %v1179_v59  ;;  %1451 = vadd.xlane.f32.xlu0 %v1450_v1  ;;  %1232 = vmax.xlane.f32.xlu1 %v4521_v49 }
 0x318   : > { %v1453_v36 = vadd.f32 %v3917_v22, %v3911_v5  ;;  %v4522_v45 = vmax.f32 %v3834_v23, %v3836_v0 }
 0x319   : > { %2919 = vpow2.f32 %v1342_v28  ;;  %v1346_v33 = vmul.f32 1.442695, %v1264_v2  ;;  %v1348_v54 = vmul.f32 1.442695, %v1265_v20 }
 0x31a   : > { %2921 = vpow2.f32 %v1344_v39  ;;  %v4523_v39 = vmax.f32 %v3838_v60, %v3842_v29 }
 0x31b   : > { %v3926_v25 = vpop.eup %2911  ;;  %2923 = vpow2.f32 %v1346_v33  ;;  %1454 = vadd.xlane.f32.xlu1 %v1453_v36  ;;  %1235 = vmax.xlane.f32.xlu0 %v4522_v45 }
 0x31c   : > { %v3931_v63 = vpop.eup %2913  ;;  %2925 = vpow2.f32 %v1348_v54  ;;  %v1182_v13 = vpop.xlane.xlu0 %1181 }
 0x31d   : > { %v3933_v61 = vpop.eup %2915  ;;  %v1266_v38 = vsub.f32 %v3726_v16, %v1182_v13  ;;  %v1267_v30 = vsub.f32 %v3728_v27, %v1182_v13  ;;  %v1456_v4 = vadd.f32 %v3931_v63, %v3926_v25 }
 0x31e   : > { %v3939_v56 = vpop.eup %2917  ;;  %v1185_v19 = vpop.xlane.xlu1 %1184 }
 0x31f   : > { %v1350_v12 = vmul.f32 1.442695, %v1266_v38  ;;  %v1352_v1 = vmul.f32 1.442695, %v1267_v30  ;;  %v1268_v59 = vsub.f32 %v3730_v42, %v1185_v19  ;;  %v1269_v28 = vsub.f32 %v3734_v8, %v1185_v19  ;;  %1457 = vadd.xlane.f32.xlu0 %v1456_v4  ;;  %1238 = vmax.xlane.f32.xlu1 %v4523_v39 }
 0x320   : > { %v1459_v2 = vadd.f32 %v3939_v56, %v3933_v61  ;;  %v4524_v42 = vmax.f32 %v3846_v34, %v3848_v35 }
 0x321   : > { %2927 = vpow2.f32 %v1350_v12  ;;  %v1354_v16 = vmul.f32 1.442695, %v1268_v59  ;;  %v1356_v27 = vmul.f32 1.442695, %v1269_v28 }
 0x322   : > { %2929 = vpow2.f32 %v1352_v1  ;;  %v4525_v1 = vmax.f32 %v3850_v10, %v3854_v46 }
 0x323   : > { %v3948_v20 = vpop.eup %2919  ;;  %2931 = vpow2.f32 %v1354_v16  ;;  %1460 = vadd.xlane.f32.xlu1 %v1459_v2  ;;  %1241 = vmax.xlane.f32.xlu0 %v4524_v42 }
 0x324   : > { %v3953_v8 = vpop.eup %2921  ;;  %2933 = vpow2.f32 %v1356_v27  ;;  %v1188_v49 = vpop.xlane.xlu0 %1187 }
 0x325   : > { %v3955_v33 = vpop.eup %2923  ;;  %v1270_v54 = vsub.f32 %v3738_v51, %v1188_v49  ;;  %v1271_v36 = vsub.f32 %v3740_v57, %v1188_v49  ;;  %v1462_v45 = vadd.f32 %v3953_v8, %v3948_v20 }
 0x326   : > { %v3961_v13 = vpop.eup %2925  ;;  %v1191_v38 = vpop.xlane.xlu1 %1190 }
 0x327   : > { %v1358_v30 = vmul.f32 1.442695, %v1270_v54  ;;  %v1360_v4 = vmul.f32 1.442695, %v1271_v36  ;;  %v1272_v19 = vsub.f32 %v3742_v62, %v1191_v38  ;;  %v1273_v12 = vsub.f32 %v3746_v37, %v1191_v38  ;;  %1463 = vadd.xlane.f32.xlu0 %v1462_v45  ;;  %1244 = vmax.xlane.f32.xlu1 %v4525_v1 }
 0x328   : > { %v1465_v59 = vadd.f32 %v3961_v13, %v3955_v33 }
 0x329   : > { %2935 = vpow2.f32 %v1358_v30  ;;  %v1362_v51 = vmul.f32 1.442695, %v1272_v19  ;;  %v1364_v57 = vmul.f32 1.442695, %v1273_v12 }
 0x32a   : > { %2937 = vpow2.f32 %v1360_v4 }
 0x32b   : > { %v3970_v28 = vpop.eup %2927  ;;  %2939 = vpow2.f32 %v1362_v51  ;;  %1466 = vadd.xlane.f32.xlu1 %v1465_v59 }
 0x32c   : > { %v3972_v39 = vpop.eup %2929  ;;  %2941 = vpow2.f32 %v1364_v57  ;;  %v1194_v62 = vpop.xlane.xlu0 %1193 }
 0x32d   : > { %v3974_v37 = vpop.eup %2931  ;;  %v1274_v16 = vsub.f32 %v3750_v26, %v1194_v62  ;;  %v1275_v27 = vsub.f32 %v3752_v18, %v1194_v62  ;;  %v1468_v2 = vadd.f32 %v3972_v39, %v3970_v28 }
 0x32e   : > { %v3980_v42 = vpop.eup %2933  ;;  %v1197_v49 = vpop.xlane.xlu1 %1196 }
 0x32f   : > { %v1366_v54 = vmul.f32 1.442695, %v1274_v16  ;;  %v1368_v36 = vmul.f32 1.442695, %v1275_v27  ;;  %v1276_v45 = vsub.f32 %v3754_v58, %v1197_v49  ;;  %v1277_v38 = vsub.f32 %v3758_v50, %v1197_v49  ;;  %1469 = vadd.xlane.f32.xlu0 %v1468_v2  ;;  %v4526_v2 = vld [vmem:[#allocation37_spill] sm:$0xff] }
 0x330   : > { %v1471_v30 = vadd.f32 %v3980_v42, %v3974_v37 }
 0x331   : > { %2943 = vpow2.f32 %v1366_v54  ;;  %v1370_v26 = vmul.f32 1.442695, %v1276_v45  ;;  %v1372_v4 = vmul.f32 1.442695, %v1277_v38 }
 0x332   : > { %2945 = vpow2.f32 %v1368_v36  ;;  %1472 = vadd.xlane.f32.xlu1 %v1471_v30 }
 0x333   : > { %v3986_v18 = vpop.eup %2935  ;;  %2947 = vpow2.f32 %v1370_v26 }
 0x334   : > { %v3988_v19 = vpop.eup %2937  ;;  %2949 = vpow2.f32 %v1372_v4  ;;  %v1200_v12 = vpop.xlane.xlu0 %1199  ;;  %v4530_v4 = vld [vmem:[#allocation39_spill] sm:$0xff] }
 0x335   : > { %v3990_v1 = vpop.eup %2939  ;;  %v1278_v58 = vsub.f32 %v3762_v17, %v1200_v12  ;;  %v1279_v50 = vsub.f32 %v3764_v15, %v1200_v12  ;;  %v1474_v51 = vadd.f32 %v3988_v19, %v3986_v18 }
 0x336   : > { %v3996_v57 = vpop.eup %2941  ;;  %v1203_v59 = vpop.xlane.xlu1 %1202 }
 0x337   : > { %v1374_v62 = vmul.f32 1.442695, %v1278_v58  ;;  %v1376_v16 = vmul.f32 1.442695, %v1279_v50  ;;  %v1280_v27 = vsub.f32 %v3766_v7, %v1203_v59  ;;  %v1281_v49 = vsub.f32 %v4526_v2, %v1203_v59  ;;  %1475 = vadd.xlane.f32.xlu0 %v1474_v51  ;;  %v4529_v7 = vld [vmem:[#allocation38_spill] sm:$0xff]  ;;  %v4533_v2 = vld [vmem:[#allocation41_spill] sm:$0xff] }
 0x338   : > { %v1477_v54 = vadd.f32 %v3996_v57, %v3990_v1 }
 0x339   : > { %2951 = vpow2.f32 %v1374_v62  ;;  %v1378_v17 = vmul.f32 1.442695, %v1280_v27  ;;  %v1380_v36 = vmul.f32 1.442695, %v1281_v49 }
 0x33a   : > { %2953 = vpow2.f32 %v1376_v16  ;;  %1478 = vadd.xlane.f32.xlu1 %v1477_v54  ;;  %v4532_v16 = vld [vmem:[#allocation40_spill] sm:$0xff] }
 0x33b   : > { %v4002_v15 = vpop.eup %2943  ;;  %2955 = vpow2.f32 %v1378_v17 }
 0x33c   : > { %4527 = vst [vmem:[#allocation37_spill] sm:$0xff] %v4002_v15  ;;  %v4004_v45 = vpop.eup %2945  ;;  %2957 = vpow2.f32 %v1380_v36  ;;  %v1206_v38 = vpop.xlane.xlu0 %1205 }
 0x33d   : > { %v4006_v30 = vpop.eup %2947  ;;  %v1282_v26 = vsub.f32 %v4529_v7, %v1206_v38  ;;  %v1283_v12 = vsub.f32 %v4530_v4, %v1206_v38  ;;  %v1480_v58 = vadd.f32 %v4004_v45, %v4002_v15 }
 0x33e   : > { %4528 = vst [vmem:[#allocation50_spill] sm:$0xff] %v4006_v30  ;;  %v4012_v50 = vpop.eup %2949  ;;  %v1209_v51 = vpop.xlane.xlu1 %1208 }
 0x33f   : > { %4531 = vst [vmem:[#allocation38_spill] sm:$0xff] %v4012_v50  ;;  %v1382_v59 = vmul.f32 1.442695, %v1282_v26  ;;  %v1384_v62 = vmul.f32 1.442695, %v1283_v12  ;;  %v1284_v27 = vsub.f32 %v4532_v16, %v1209_v51  ;;  %v1285_v49 = vsub.f32 %v4533_v2, %v1209_v51  ;;  %1481 = vadd.xlane.f32.xlu0 %v1480_v58  ;;  %v4537_v12 = vld [vmem:[#allocation42_spill] sm:$0xff] }
 0x340   : > { %v1483_v54 = vadd.f32 %v4012_v50, %v4006_v30  ;;  %v4538_v58 = vld [vmem:[#allocation43_spill] sm:$0xff]  ;;  %v4541_v30 = vld [vmem:[#allocation45_spill] sm:$0xff] }
 0x341   : > { %2959 = vpow2.f32 %v1382_v59  ;;  %v1386_v17 = vmul.f32 1.442695, %v1284_v27  ;;  %v1388_v36 = vmul.f32 1.442695, %v1285_v49 }
 0x342   : > { %2961 = vpow2.f32 %v1384_v62  ;;  %1484 = vadd.xlane.f32.xlu1 %v1483_v54  ;;  %v4540_v54 = vld [vmem:[#allocation44_spill] sm:$0xff] }
 0x343   : > { %v4018_v38 = vpop.eup %2951  ;;  %2963 = vpow2.f32 %v1386_v17 }
 0x344   : > { %4534 = vst [vmem:[#allocation39_spill] sm:$0xff] %v4018_v38  ;;  %v4020_v7 = vpop.eup %2953  ;;  %2965 = vpow2.f32 %v1388_v36  ;;  %v1212_v26 = vpop.xlane.xlu0 %1211 }
 0x345   : > { %4535 = vst [vmem:[#allocation40_spill] sm:$0xff] %v4020_v7  ;;  %v4022_v4 = vpop.eup %2955  ;;  %v1286_v51 = vsub.f32 %v4537_v12, %v1212_v26  ;;  %v1287_v16 = vsub.f32 %v4538_v58, %v1212_v26  ;;  %v1486_v59 = vadd.f32 %v4020_v7, %v4018_v38 }
 0x346   : > { %4536 = vst [vmem:[#allocation41_spill] sm:$0xff] %v4022_v4  ;;  %v4028_v27 = vpop.eup %2957  ;;  %v1215_v62 = vpop.xlane.xlu1 %1214 }
 0x347   : > { %4539 = vst [vmem:[#allocation42_spill] sm:$0xff] %v4028_v27  ;;  %v1390_v2 = vmul.f32 1.442695, %v1286_v51  ;;  %v1392_v49 = vmul.f32 1.442695, %v1287_v16  ;;  %v1288_v17 = vsub.f32 %v4540_v54, %v1215_v62  ;;  %v1289_v50 = vsub.f32 %v4541_v30, %v1215_v62  ;;  %1487 = vadd.xlane.f32.xlu0 %v1486_v59  ;;  %v4543_v54 = vld [vmem:[#allocation46_spill] sm:$0xff] }
 0x348   : > { %v1489_v36 = vadd.f32 %v4028_v27, %v4022_v4  ;;  %v4544_v59 = vld [vmem:[#allocation47_spill] sm:$0xff]  ;;  %v4545_v4 = vld [vmem:[#allocation48_spill] sm:$0xff]  ;;  %v4546_v27 = vld [vmem:[#allocation49_spill] sm:$0xff] }
 0x349   : > { %2967 = vpow2.f32 %v1390_v2  ;;  %v1394_v12 = vmul.f32 1.442695, %v1288_v17  ;;  %v1396_v15 = vmul.f32 1.442695, %v1289_v50 }
 0x34a   : > { %2969 = vpow2.f32 %v1392_v49  ;;  %1490 = vadd.xlane.f32.xlu1 %v1489_v36 }
 0x34b   : > { %v4034_v26 = vpop.eup %2959  ;;  %2971 = vpow2.f32 %v1394_v12 }
 0x34c   : > { %v4036_v58 = vpop.eup %2961  ;;  %2973 = vpow2.f32 %v1396_v15  ;;  %v1218_v51 = vpop.xlane.xlu0 %1217 }
 0x34d   : > { %v4038_v16 = vpop.eup %2963  ;;  %v1290_v30 = vsub.f32 %v4543_v54, %v1218_v51  ;;  %v1291_v62 = vsub.f32 %v4544_v59, %v1218_v51  ;;  %v1492_v2 = vadd.f32 %v4036_v58, %v4034_v26 }
 0x34e   : > { %4542 = vst [vmem:[#allocation43_spill] sm:$0xff] %v4038_v16  ;;  %v4044_v17 = vpop.eup %2965  ;;  %v1221_v50 = vpop.xlane.xlu1 %1220 }
 0x34f   : > { %v1398_v49 = vmul.f32 1.442695, %v1290_v30  ;;  %v1400_v36 = vmul.f32 1.442695, %v1291_v62  ;;  %v1292_v12 = vsub.f32 %v4545_v4, %v1221_v50  ;;  %v1293_v38 = vsub.f32 %v4546_v27, %v1221_v50  ;;  %1493 = vadd.xlane.f32.xlu0 %v1492_v2 }
 0x350   : > { %v1495_v15 = vadd.f32 %v4044_v17, %v4038_v16 }
 0x351   : > { %2975 = vpow2.f32 %v1398_v49  ;;  %v1402_v54 = vmul.f32 1.442695, %v1292_v12  ;;  %v1404_v7 = vmul.f32 1.442695, %v1293_v38 }
 0x352   : > { %2977 = vpow2.f32 %v1400_v36  ;;  %1496 = vadd.xlane.f32.xlu1 %v1495_v15 }
 0x353   : > { %v4050_v51 = vpop.eup %2967  ;;  %2979 = vpow2.f32 %v1402_v54 }
 0x354   : > { %4547 = vst [vmem:[#allocation44_spill] sm:$0xff] %v4050_v51  ;;  %v4052_v59 = vpop.eup %2969  ;;  %2981 = vpow2.f32 %v1404_v7 }
 0x355   : > { %4548 = vst [vmem:[#allocation45_spill] sm:$0xff] %v4052_v59  ;;  %v4054_v30 = vpop.eup %2971  ;;  %v1498_v4 = vadd.f32 %v4052_v59, %v4050_v51 }
 0x356   : > { %4549 = vst [vmem:[#allocation46_spill] sm:$0xff] %v4054_v30  ;;  %v4058_v27 = vpop.eup %2973 }
 0x357   : > { %4550 = vst [vmem:[#allocation47_spill] sm:$0xff] %v4058_v27  ;;  %1499 = vadd.xlane.f32.xlu0 %v1498_v4  ;;  %v1501_v62 = vadd.f32 %v4058_v27, %v4054_v30 }
 0x359   : > { %1502 = vadd.xlane.f32.xlu1 %v1501_v62 }
 0x35b   : > { %v4062_v38 = vpop.eup %2975 }
 0x35c   : > { %4551 = vst [vmem:[#allocation48_spill] sm:$0xff] %v4062_v38  ;;  %v4064_v2 = vpop.eup %2977 }
 0x35d   : > { %4552 = vst [vmem:[#allocation49_spill] sm:$0xff] %v4064_v2  ;;  %v4066_v50 = vpop.eup %2979  ;;  %v1504_v7 = vadd.f32 %v4064_v2, %v4062_v38 }
 0x35e   : > { %4553 = vst [vmem:[#allocation51_spill] sm:$0xff] %v4066_v50  ;;  %v4070_v49 = vpop.eup %2981 }
 0x35f   : > { %4554 = vst [vmem:[#allocation52_spill] sm:$0xff] %v4070_v49  ;;  %1505 = vadd.xlane.f32.xlu0 %v1504_v7  ;;  %v1507_v36 = vadd.f32 %v4070_v49, %v4066_v50 }
 0x361   : > { %1508 = vadd.xlane.f32.xlu1 %v1507_v36 }
 0x394   : > { %v1440_v12 = vpop.xlane.xlu0 %1439 }
 0x395   : > { %2983 = vrcp.f32 %v1440_v12 }
 0x398   : > { %v1443_v15 = vpop.xlane.xlu1 %1442  ;;  %v1224_v54 = vpop.xlane.xlu0 %1223 }
 0x399   : > { %2985 = vrcp.f32 %v1443_v15  ;;  %v1294_v4 = vsub.f32 %v3810_v47, %v1224_v54  ;;  %v1295_v62 = vsub.f32 %v3812_v24, %v1224_v54 }
 0x39b   : > { %v1406_v30 = vmul.f32 1.442695, %v1294_v4  ;;  %v1408_v27 = vmul.f32 1.442695, %v1295_v62 }
 0x39c   : > { %v1446_v38 = vpop.xlane.xlu0 %1445  ;;  %v1227_v2 = vpop.xlane.xlu1 %1226 }
 0x39d   : > { %2987 = vpow2.f32 %v1406_v30  ;;  %v1296_v7 = vsub.f32 %v3814_v52, %v1227_v2  ;;  %v1297_v36 = vsub.f32 %v3818_v3, %v1227_v2 }
 0x39e   : > { %2989 = vpow2.f32 %v1408_v27 }
 0x39f   : > { %v2984_v50 = vpop.eup %2983  ;;  %2991 = vrcp.f32 %v1446_v38  ;;  %v1410_v49 = vmul.f32 1.442695, %v1296_v7  ;;  %v1412_v51 = vmul.f32 1.442695, %v1297_v36 }
 0x3a0   : > { %v1566_v59 = vmul.f32 %v2984_v50, %v1440_v12  ;;  %v1449_v47 = vpop.xlane.xlu1 %1448  ;;  %v1230_v16 = vpop.xlane.xlu0 %1229 }
 0x3a1   : > { %2993 = vpow2.f32 %v1410_v49  ;;  %v1298_v24 = vsub.f32 %v3822_v43, %v1230_v16  ;;  %v1299_v54 = vsub.f32 %v3824_v32, %v1230_v16 }
 0x3a2   : > { %v1598_v30 = vsub.f32 2.0, %v1566_v59  ;;  %2995 = vpow2.f32 %v1412_v51 }
 0x3a3   : > { %v2986_v52 = vpop.eup %2985  ;;  %2997 = vrcp.f32 %v1449_v47  ;;  %v1414_v3 = vmul.f32 1.442695, %v1298_v24  ;;  %v1416_v27 = vmul.f32 1.442695, %v1299_v54 }
 0x3a4   : > { %v1630_v2 = vmul.f32 %v2984_v50, %v1598_v30  ;;  %v1567_v4 = vmul.f32 %v2986_v52, %v1443_v15  ;;  %v4083_v62 = vpop.xlane.xlu0 %1451  ;;  %v1233_v12 = vpop.xlane.xlu1 %1232 }
 0x3a5   : > { %2999 = vpow2.f32 %v1414_v3  ;;  %v1300_v49 = vsub.f32 %v3826_v41, %v1233_v12  ;;  %v1301_v43 = vsub.f32 %v3830_v21, %v1233_v12 }
 0x3a6   : > { %v1662_v32 = vmul.f32 %v3866_v44, %v1630_v2  ;;  %v1599_v16 = vsub.f32 2.0, %v1567_v4  ;;  %3001 = vpow2.f32 %v1416_v27  ;;  %v1663_v51 = vmul.f32 %v3868_v11, %v1630_v2 }
 0x3a7   : > { %v4089_v59 = vpop.eup %2987  ;;  %3003 = vrcp.f32 %v4083_v62  ;;  %v1418_v50 = vmul.f32 1.442695, %v1300_v49  ;;  %v1420_v15 = vmul.f32 1.442695, %v1301_v43 }
 0x3a8   : > { %v4092_v7 = vpop.eup %2989  ;;  %2111 = vst [vmem:[%s4094_s7] sm:$0xff] %v1662_v32  ;;  %v1631_v21 = vmul.f32 %v2986_v52, %v1599_v16  ;;  %v4097_v41 = vpop.xlane.xlu1 %1454  ;;  %2112 = vst [vmem:[%s4094_s7 + $0x8] sm:$0xff] %v1663_v51 }
 0x3a9   : > { %v1236_v44 = vpop.xlane.xlu0 %1235  ;;  %v2992_v36 = vpop.eup %2991  ;;  %3005 = vpow2.f32 %v1418_v50  ;;  %v1510_v54 = vadd.f32 %v4092_v7, %v4089_v59 }
 0x3aa   : > { %v1302_v11 = vsub.f32 %v3834_v23, %v1236_v44  ;;  %v1303_v24 = vsub.f32 %v3836_v0, %v1236_v44  ;;  %v1664_v30 = vmul.f32 %v3874_v55, %v1631_v21  ;;  %v1568_v3 = vmul.f32 %v2992_v36, %v1446_v38 }
 0x3ab   : > { %3007 = vpow2.f32 %v1420_v15  ;;  %v1665_v52 = vmul.f32 %v3878_v6, %v1631_v21  ;;  %v4106_v27 = vpop.eup %2993  ;;  %1511 = vadd.xlane.f32.xlu0 %v1510_v54 }
 0x3ac   : > { %3009 = vrcp.f32 %v4097_v41  ;;  %v1422_v2 = vmul.f32 1.442695, %v1302_v11  ;;  %v1424_v4 = vmul.f32 1.442695, %v1303_v24  ;;  %v4109_v23 = vpop.eup %2995  ;;  %v1726_v0 = vpack.c.bf16 %v1664_v30, %v1662_v32  ;;  %2113 = vst [vmem:[%s4094_s7 + $0x10] sm:$0xff] %v1664_v30  ;;  %v1239_v55 = vpop.xlane.xlu1 %1238 }
 0x3ad   : > { %v1600_v12 = vsub.f32 2.0, %v1568_v3  ;;  %v4112_v49 = vpop.xlane.xlu0 %1457  ;;  %v1727_v43 = vpack.c.bf16 %v1665_v52, %v1663_v51  ;;  %2114 = vst [vmem:[%s4094_s7 + $0x18] sm:$0xff] %v1665_v52  ;;  %v2998_v38 = vpop.eup %2997  ;;  %v1304_v6 = vsub.f32 %v3838_v60, %v1239_v55  ;;  %v1305_v16 = vsub.f32 %v3842_v29, %v1239_v55 }
 0x3ae   : > { %3011 = vpow2.f32 %v1422_v2  ;;  %v1513_v50 = vadd.f32 %v4109_v23, %v4106_v27  ;;  %v1569_v21 = vmul.f32 %v2998_v38, %v1449_v47 }
 0x3af   : > { %v1632_v15 = vmul.f32 %v2992_v36, %v1600_v12  ;;  %3013 = vpow2.f32 %v1424_v4  ;;  %1790 = vmatprep.mubr.bf16.mxu0 %v1727_v43  ;;  %v4119_v32 = vpop.eup %2999  ;;  %v1426_v44 = vmul.f32 1.442695, %v1304_v6  ;;  %v1428_v51 = vmul.f32 1.442695, %v1305_v16 }
 0x3b0   : > { %3015 = vrcp.f32 %v4112_v49  ;;  %1514 = vadd.xlane.f32.xlu1 %v1513_v50  ;;  %1791 = vmatmul.mubr.bf16.vlgmr.msra.gmra.mrb[48].mxu0 %v1726_v0  ;;  %v4122_v60 = vpop.eup %3001  ;;  %v1601_v29 = vsub.f32 2.0, %v1569_v21  ;;  %v4124_v11 = vpop.xlane.xlu1 %1460 }
 0x3b1   : > { %v1242_v24 = vpop.xlane.xlu0 %1241  ;;  %v1667_v47 = vmul.f32 %v3887_v53, %v1632_v15  ;;  %v1666_v36 = vmul.f32 %v3882_v48, %v1632_v15  ;;  %v3004_v54 = vpop.eup %3003  ;;  %3017 = vpow2.f32 %v1426_v44  ;;  %v1516_v52 = vadd.f32 %v4122_v60, %v4119_v32 }
 0x3b2   : > { %v1306_v30 = vsub.f32 %v3846_v34, %v1242_v24  ;;  %v1307_v3 = vsub.f32 %v3848_v35, %v1242_v24  ;;  %v1633_v2 = vmul.f32 %v2998_v38, %v1601_v29  ;;  %v1570_v4 = vmul.f32 %v3004_v54, %v4083_v62 }
 0x3b3   : > { %3019 = vpow2.f32 %v1428_v51  ;;  %2116 = vst [vmem:[%s4094_s7 + $0x28] sm:$0xff] %v1667_v47  ;;  %2115 = vst [vmem:[%s4094_s7 + $0x20] sm:$0xff] %v1666_v36  ;;  %v4135_v0 = vpop.eup %3005  ;;  %1517 = vadd.xlane.f32.xlu0 %v1516_v52 }
 0x3b4   : > { %3021 = vrcp.f32 %v4124_v11  ;;  %v1430_v48 = vmul.f32 1.442695, %v1306_v30  ;;  %v1432_v53 = vmul.f32 1.442695, %v1307_v3  ;;  %v1602_v35 = vsub.f32 2.0, %v1570_v4  ;;  %v1245_v55 = vpop.xlane.xlu1 %1244 }
 0x3b5   : > { %v4138_v34 = vpop.eup %3007  ;;  %v4140_v12 = vpop.xlane.xlu0 %1463  ;;  %v1669_v62 = vmul.f32 %v3900_v9, %v1633_v2  ;;  %v1668_v43 = vmul.f32 %v3893_v40, %v1633_v2  ;;  %v1308_v6 = vsub.f32 %v3850_v10, %v1245_v55  ;;  %v1309_v16 = vsub.f32 %v3854_v46, %v1245_v55 }
 0x3b6   : > { %v3010_v38 = vpop.eup %3009  ;;  %3023 = vpow2.f32 %v1430_v48  ;;  %v1519_v50 = vadd.f32 %v4138_v34, %v4135_v0  ;;  %v1634_v15 = vmul.f32 %v3004_v54, %v1602_v35 }
 0x3b7   : > { %v1571_v21 = vmul.f32 %v3010_v38, %v4097_v41  ;;  %3025 = vpow2.f32 %v1432_v53  ;;  %v1729_v44 = vpack.c.bf16 %v1669_v62, %v1667_v47  ;;  %2118 = vst [vmem:[%s4094_s7 + $0x38] sm:$0xff] %v1669_v62  ;;  %2117 = vst [vmem:[%s4094_s7 + $0x30] sm:$0xff] %v1668_v43  ;;  %v1434_v40 = vmul.f32 1.442695, %v1308_v6 }
 0x3b8   : > { %v4151_v51 = vpop.eup %3011  ;;  %3027 = vrcp.f32 %v4140_v12  ;;  %v1436_v9 = vmul.f32 1.442695, %v1309_v16  ;;  %1520 = vadd.xlane.f32.xlu1 %v1519_v50  ;;  %v1728_v46 = vpack.c.bf16 %v1668_v43, %v1666_v36  ;;  %v1467_v24 = vpop.xlane.xlu1 %1466  ;;  %v1671_v41 = vmul.f32 %v3909_v14, %v1634_v15 }
 0x3b9   : > { %v4154_v10 = vpop.eup %3013  ;;  %v1603_v29 = vsub.f32 2.0, %v1571_v21  ;;  %1798 = vmatprep.mubr.bf16.mxu0 %v1729_v44  ;;  %v1670_v47 = vmul.f32 %v3904_v31, %v1634_v15  ;;  %3029 = vpow2.f32 %v1434_v40 }
 0x3ba   : > { %v3016_v54 = vpop.eup %3015  ;;  %1799 = vmatmul.mubr.bf16.gmra.mrb[52].mxu0 %v1728_v46  ;;  %v1522_v30 = vadd.f32 %v4154_v10, %v4151_v51  ;;  %3031 = vpow2.f32 %v1436_v9  ;;  %2120 = vst [vmem:[%s4094_s7 + $0x48] sm:$0xff] %v1671_v41 }
 0x3bb   : > { %v1635_v3 = vmul.f32 %v3010_v38, %v1603_v29  ;;  %v1572_v52 = vmul.f32 %v3016_v54, %v4112_v49  ;;  %2119 = vst [vmem:[%s4094_s7 + $0x40] sm:$0xff] %v1670_v47  ;;  %v4163_v36 = vpop.eup %3017  ;;  %3033 = vrcp.f32 %v1467_v24 }
 0x3bc   : > { %1523 = vadd.xlane.f32.xlu0 %v1522_v30  ;;  %v1470_v2 = vpop.xlane.xlu0 %1469 }
 0x3bd   : > { %v4165_v14 = vpop.eup %3019  ;;  %v1604_v31 = vsub.f32 2.0, %v1572_v52  ;;  %v1673_v4 = vmul.f32 %v3917_v22, %v1635_v3  ;;  %v1672_v48 = vmul.f32 %v3911_v5, %v1635_v3  ;;  %3035 = vrcp.f32 %v1470_v2 }
 0x3be   : > { %v3022_v53 = vpop.eup %3021  ;;  %v1525_v49 = vadd.f32 %v4165_v14, %v4163_v36 }
 0x3bf   : > { %v1636_v35 = vmul.f32 %v3016_v54, %v1604_v31  ;;  %v1573_v55 = vmul.f32 %v3022_v53, %v4124_v11  ;;  %v1731_v62 = vpack.c.bf16 %v1673_v4, %v1671_v41  ;;  %2122 = vst [vmem:[%s4094_s7 + $0x58] sm:$0xff] %v1673_v4  ;;  %v1730_v43 = vpack.c.bf16 %v1672_v48, %v1670_v47  ;;  %v1473_v22 = vpop.xlane.xlu1 %1472 }
 0x3c0   : > { %2121 = vst [vmem:[%s4094_s7 + $0x50] sm:$0xff] %v1672_v48  ;;  %v4174_v38 = vpop.eup %3023  ;;  %1526 = vadd.xlane.f32.xlu1 %v1525_v49  ;;  %3037 = vrcp.f32 %v1473_v22 }
 0x3c1   : > { %v4176_v6 = vpop.eup %3025  ;;  %v1605_v5 = vsub.f32 2.0, %v1573_v55  ;;  %1806 = vmatprep.mubr.bf16.mxu0 %v1731_v62  ;;  %v1675_v16 = vmul.f32 %v3931_v63, %v1636_v35  ;;  %v1674_v50 = vmul.f32 %v3926_v25, %v1636_v35 }
 0x3c2   : > { %v3028_v11 = vpop.eup %3027  ;;  %1807 = vmatmul.mubr.bf16.gmra.mrb[56].mxu0 %v1730_v43  ;;  %v1528_v15 = vadd.f32 %v4176_v6, %v4174_v38 }
 0x3c3   : > { %v1637_v21 = vmul.f32 %v3022_v53, %v1605_v5  ;;  %v1574_v44 = vmul.f32 %v3028_v11, %v4140_v12  ;;  %2124 = vst [vmem:[%s4094_s7 + $0x68] sm:$0xff] %v1675_v16  ;;  %2123 = vst [vmem:[%s4094_s7 + $0x60] sm:$0xff] %v1674_v50  ;;  %v4185_v40 = vpop.eup %3029 }
 0x3c4   : > { %1529 = vadd.xlane.f32.xlu0 %v1528_v15  ;;  %v4187_v9 = vpop.eup %3031  ;;  %v1476_v46 = vpop.xlane.xlu0 %1475 }
 0x3c5   : > { %v1606_v63 = vsub.f32 2.0, %v1574_v44  ;;  %v1677_v25 = vmul.f32 %v3939_v56, %v1637_v21  ;;  %v1676_v29 = vmul.f32 %v3933_v61, %v1637_v21  ;;  %v3034_v41 = vpop.eup %3033  ;;  %3039 = vrcp.f32 %v1476_v46 }
 0x3c6   : > { %v1531_v12 = vadd.f32 %v4187_v9, %v4185_v40  ;;  %v1575_v54 = vmul.f32 %v3034_v41, %v1467_v24 }
 0x3c7   : > { %v1638_v47 = vmul.f32 %v3028_v11, %v1606_v63  ;;  %v1733_v30 = vpack.c.bf16 %v1677_v25, %v1675_v16  ;;  %2126 = vst [vmem:[%s4094_s7 + $0x78] sm:$0xff] %v1677_v25  ;;  %v1732_v3 = vpack.c.bf16 %v1676_v29, %v1674_v50  ;;  %2125 = vst [vmem:[%s4094_s7 + $0x70] sm:$0xff] %v1676_v29  ;;  %v3036_v52 = vpop.eup %3035  ;;  %v1479_v31 = vpop.xlane.xlu1 %1478 }
 0x3c8   : > { %1532 = vadd.xlane.f32.xlu1 %v1531_v12  ;;  %v1607_v4 = vsub.f32 2.0, %v1575_v54  ;;  %v1576_v56 = vmul.f32 %v3036_v52, %v1470_v2  ;;  %3041 = vrcp.f32 %v1479_v31 }
 0x3c9   : > { %1814 = vmatprep.mubr.bf16.mxu0 %v1733_v30  ;;  %v1679_v61 = vmul.f32 %v3953_v8, %v1638_v47  ;;  %v1678_v48 = vmul.f32 %v3948_v20, %v1638_v47 }
 0x3ca   : > { %1815 = vmatmul.mubr.bf16.gmra.mrb[60].mxu0 %v1732_v3  ;;  %v3038_v24 = vpop.eup %3037  ;;  %v1639_v53 = vmul.f32 %v3034_v41, %v1607_v4  ;;  %v1608_v49 = vsub.f32 2.0, %v1576_v56 }
 0x3cb   : > { %2128 = vst [vmem:[%s4094_s7 + $0x88] sm:$0xff] %v1679_v61  ;;  %v1577_v35 = vmul.f32 %v3038_v24, %v1473_v22  ;;  %2127 = vst [vmem:[%s4094_s7 + $0x80] sm:$0xff] %v1678_v48 }
 0x3cc   : > { %v1640_v55 = vmul.f32 %v3036_v52, %v1608_v49  ;;  %v1482_v62 = vpop.xlane.xlu0 %1481  ;;  %v1681_v43 = vmul.f32 %v3961_v13, %v1639_v53  ;;  %v1680_v2 = vmul.f32 %v3955_v33, %v1639_v53  ;;  %v4555_v53 = vld [vmem:[#allocation37_spill] sm:$0xff] }
 0x3cd   : > { %v1609_v8 = vsub.f32 2.0, %v1577_v35  ;;  %3043 = vrcp.f32 %v1482_v62 }
 0x3ce   : > { %v1735_v5 = vpack.c.bf16 %v1681_v43, %v1679_v61  ;;  %2130 = vst [vmem:[%s4094_s7 + $0x98] sm:$0xff] %v1681_v43  ;;  %v1734_v20 = vpack.c.bf16 %v1680_v2, %v1678_v48  ;;  %2129 = vst [vmem:[%s4094_s7 + $0x90] sm:$0xff] %v1680_v2  ;;  %v1683_v16 = vmul.f32 %v3972_v39, %v1640_v55  ;;  %v4556_v43 = vld [vmem:[#allocation38_spill] sm:$0xff] }
 0x3cf   : > { %v1682_v50 = vmul.f32 %v3970_v28, %v1640_v55  ;;  %v3040_v22 = vpop.eup %3039  ;;  %v1641_v11 = vmul.f32 %v3038_v24, %v1609_v8  ;;  %v1485_v15 = vpop.xlane.xlu1 %1484  ;;  %v4557_v8 = vld [vmem:[#allocation50_spill] sm:$0xff] }
 0x3d0   : > { %v1578_v13 = vmul.f32 %v3040_v22, %v1476_v46  ;;  %1822 = vmatprep.mubr.bf16.mxu0 %v1735_v5  ;;  %3045 = vrcp.f32 %v1485_v15  ;;  %2132 = vst [vmem:[%s4094_s7 + $0xa8] sm:$0xff] %v1683_v16 }
 0x3d1   : > { %2131 = vst [vmem:[%s4094_s7 + $0xa0] sm:$0xff] %v1682_v50  ;;  %v1685_v33 = vmul.f32 %v3980_v42, %v1641_v11  ;;  %v1684_v21 = vmul.f32 %v3974_v37, %v1641_v11 }
 0x3d2   : > { %1823 = vmatmul.mubr.bf16.gmra.mrb[64].mxu0 %v1734_v20  ;;  %v3042_v44 = vpop.eup %3041  ;;  %v1610_v63 = vsub.f32 2.0, %v1578_v13 }
 0x3d3   : > { %v1579_v39 = vmul.f32 %v3042_v44, %v1479_v31  ;;  %v1737_v25 = vpack.c.bf16 %v1685_v33, %v1683_v16  ;;  %2134 = vst [vmem:[%s4094_s7 + $0xb8] sm:$0xff] %v1685_v33  ;;  %2133 = vst [vmem:[%s4094_s7 + $0xb0] sm:$0xff] %v1684_v21  ;;  %v1736_v54 = vpack.c.bf16 %v1684_v21, %v1682_v50  ;;  %v4558_v33 = vld [vmem:[#allocation40_spill] sm:$0xff] }
 0x3d4   : > { %v1642_v28 = vmul.f32 %v3040_v22, %v1610_v63  ;;  %v1488_v29 = vpop.xlane.xlu0 %1487 }
 0x3d5   : > { %v1611_v46 = vsub.f32 2.0, %v1579_v39  ;;  %3047 = vrcp.f32 %v1488_v29  ;;  %1830 = vmatprep.mubr.bf16.mxu0 %v1737_v25 }
 0x3d6   : > { %v1687_v41 = vmul.f32 %v3988_v19, %v1642_v28  ;;  %v1686_v12 = vmul.f32 %v3986_v18, %v1642_v28 }
 0x3d7   : > { %v3044_v42 = vpop.eup %3043  ;;  %v1643_v37 = vmul.f32 %v3042_v44, %v1611_v46  ;;  %v1491_v47 = vpop.xlane.xlu1 %1490  ;;  %v4559_v44 = vld [vmem:[#allocation39_spill] sm:$0xff]  ;;  %v4560_v46 = vld [vmem:[#allocation42_spill] sm:$0xff] }
 0x3d8   : > { %v1580_v30 = vmul.f32 %v3044_v42, %v1482_v62  ;;  %3049 = vrcp.f32 %v1491_v47  ;;  %2136 = vst [vmem:[%s4094_s7 + $0xc8] sm:$0xff] %v1687_v41  ;;  %2135 = vst [vmem:[%s4094_s7 + $0xc0] sm:$0xff] %v1686_v12 }
 0x3d9   : > { %v1689_v3 = vmul.f32 %v3996_v57, %v1643_v37  ;;  %v1688_v52 = vmul.f32 %v3990_v1, %v1643_v37 }
 0x3da   : > { %1831 = vmatmul.mubr.bf16.gmra.mrb[68].mxu0 %v1736_v54  ;;  %v3046_v31 = vpop.eup %3045  ;;  %v1612_v4 = vsub.f32 2.0, %v1580_v30 }
 0x3db   : > { %v1581_v19 = vmul.f32 %v3046_v31, %v1485_v15  ;;  %v1739_v56 = vpack.c.bf16 %v1689_v3, %v1687_v41  ;;  %2138 = vst [vmem:[%s4094_s7 + $0xd8] sm:$0xff] %v1689_v3  ;;  %2137 = vst [vmem:[%s4094_s7 + $0xd0] sm:$0xff] %v1688_v52  ;;  %v1738_v55 = vpack.c.bf16 %v1688_v52, %v1686_v12  ;;  %v4561_v12 = vld [vmem:[#allocation41_spill] sm:$0xff] }
 0x3dc   : > { %v1644_v18 = vmul.f32 %v3044_v42, %v1612_v4  ;;  %v1494_v61 = vpop.xlane.xlu0 %1493 }
 0x3dd   : > { %v1613_v48 = vsub.f32 2.0, %v1581_v19  ;;  %3051 = vrcp.f32 %v1494_v61  ;;  %1838 = vmatprep.mubr.bf16.mxu0 %v1739_v56 }
 0x3de   : > { %v1691_v24 = vmul.f32 %v4004_v45, %v1644_v18  ;;  %v1690_v49 = vmul.f32 %v4555_v53, %v1644_v18 }
 0x3df   : > { %v3048_v57 = vpop.eup %3047  ;;  %v1645_v1 = vmul.f32 %v3046_v31, %v1613_v48  ;;  %v1497_v35 = vpop.xlane.xlu1 %1496 }
 0x3e0   : > { %v1582_v62 = vmul.f32 %v3048_v57, %v1488_v29  ;;  %3053 = vrcp.f32 %v1497_v35  ;;  %2140 = vst [vmem:[%s4094_s7 + $0xe8] sm:$0xff] %v1691_v24  ;;  %2139 = vst [vmem:[%s4094_s7 + $0xe0] sm:$0xff] %v1690_v49 }
 0x3e1   : > { %v1693_v2 = vmul.f32 %v4556_v43, %v1645_v1  ;;  %v1692_v5 = vmul.f32 %v4557_v8, %v1645_v1 }
 0x3e2   : > { %1839 = vmatmul.mubr.bf16.gmra.mrb[72].mxu0 %v1738_v55  ;;  %v3050_v20 = vpop.eup %3049  ;;  %v1614_v16 = vsub.f32 2.0, %v1582_v62 }
 0x3e3   : > { %v1583_v45 = vmul.f32 %v3050_v20, %v1491_v47  ;;  %v1741_v50 = vpack.c.bf16 %v1693_v2, %v1691_v24  ;;  %2142 = vst [vmem:[%s4094_s7 + $0xf8] sm:$0xff] %v1693_v2  ;;  %2141 = vst [vmem:[%s4094_s7 + $0xf0] sm:$0xff] %v1692_v5  ;;  %v1740_v28 = vpack.c.bf16 %v1692_v5, %v1690_v49  ;;  %v4563_v2 = vld [vmem:[#allocation45_spill] sm:$0xff]  ;;  %v4564_v5 = vld [vmem:[#allocation44_spill] sm:$0xff] }
 0x3e4   : > { %v1646_v22 = vmul.f32 %v3048_v57, %v1614_v16  ;;  %v1500_v11 = vpop.xlane.xlu0 %1499  ;;  %v4562_v57 = vld [vmem:[#allocation43_spill] sm:$0xff] }
 0x3e5   : > { %v1615_v15 = vsub.f32 2.0, %v1583_v45  ;;  %3055 = vrcp.f32 %v1500_v11  ;;  %1846 = vmatprep.mubr.bf16.mxu0 %v1741_v50  ;;  %v4565_v50 = vld [vmem:[#allocation47_spill] sm:$0xff] }
 0x3e6   : > { %v1503_v13 = vpop.xlane.xlu1 %1502  ;;  %v1695_v21 = vmul.f32 %v4558_v33, %v1646_v22  ;;  %v1694_v63 = vmul.f32 %v4559_v44, %v1646_v22 }
 0x3e7   : > { %v3052_v39 = vpop.eup %3051  ;;  %v1647_v25 = vmul.f32 %v3050_v20, %v1615_v15  ;;  %3057 = vrcp.f32 %v1503_v13 }
 0x3e8   : > { %v1584_v29 = vmul.f32 %v3052_v39, %v1494_v61  ;;  %2144 = vst [vmem:[%s4094_s7 + $0x108] sm:$0xff] %v1695_v21  ;;  %2143 = vst [vmem:[%s4094_s7 + $0x100] sm:$0xff] %v1694_v63 }
 0x3e9   : > { %v1697_v41 = vmul.f32 %v4560_v46, %v1647_v25  ;;  %v1696_v42 = vmul.f32 %v4561_v12, %v1647_v25  ;;  %v4568_v46 = vld [vmem:[#allocation48_spill] sm:$0xff] }
 0x3ea   : > { %1847 = vmatmul.mubr.bf16.gmra.mrb[76].mxu0 %v1740_v28  ;;  %v3054_v37 = vpop.eup %3053  ;;  %v1616_v47 = vsub.f32 2.0, %v1584_v29  ;;  %v4567_v28 = vld [vmem:[#allocation49_spill] sm:$0xff] }
 0x3eb   : > { %v1585_v54 = vmul.f32 %v3054_v37, %v1497_v35  ;;  %v1743_v30 = vpack.c.bf16 %v1697_v41, %v1695_v21  ;;  %2146 = vst [vmem:[%s4094_s7 + $0x118] sm:$0xff] %v1697_v41  ;;  %2145 = vst [vmem:[%s4094_s7 + $0x110] sm:$0xff] %v1696_v42  ;;  %v1742_v48 = vpack.c.bf16 %v1696_v42, %v1694_v63  ;;  %v4569_v42 = vld [vmem:[#allocation52_spill] sm:$0xff] }
 0x3ec   : > { %v1648_v3 = vmul.f32 %v3052_v39, %v1616_v47  ;;  %v1506_v52 = vpop.xlane.xlu0 %1505  ;;  %v4570_v47 = vld [vmem:[#allocation51_spill] sm:$0xff] }
 0x3ed   : > { %v1617_v31 = vsub.f32 2.0, %v1585_v54  ;;  %3059 = vrcp.f32 %v1506_v52  ;;  %1854 = vmatprep.mubr.bf16.mxu0 %v1743_v30 }
 0x3ee   : > { %v1509_v4 = vpop.xlane.xlu1 %1508  ;;  %v1699_v19 = vmul.f32 %v4036_v58, %v1648_v3  ;;  %v1698_v56 = vmul.f32 %v4034_v26, %v1648_v3 }
 0x3ef   : > { %v3056_v18 = vpop.eup %3055  ;;  %v1649_v61 = vmul.f32 %v3054_v37, %v1617_v31  ;;  %3061 = vrcp.f32 %v1509_v4 }
 0x3f0   : > { %v1586_v24 = vmul.f32 %v3056_v18, %v1500_v11  ;;  %2148 = vst [vmem:[%s4094_s7 + $0x128] sm:$0xff] %v1699_v19  ;;  %2147 = vst [vmem:[%s4094_s7 + $0x120] sm:$0xff] %v1698_v56  ;;  %v4566_v11 = vld [vmem:[#allocation46_spill] sm:$0xff] }
 0x3f1   : > { %v3058_v53 = vpop.eup %3057  ;;  %v1701_v49 = vmul.f32 %v4044_v17, %v1649_v61  ;;  %v1700_v1 = vmul.f32 %v4562_v57, %v1649_v61 }
 0x3f2   : > { %1855 = vmatmul.mubr.bf16.gmra.mrb[80].mxu0 %v1742_v48  ;;  %v1618_v35 = vsub.f32 2.0, %v1586_v24  ;;  %v1587_v58 = vmul.f32 %v3058_v53, %v1503_v13 }
 0x3f3   : > { %v1745_v55 = vpack.c.bf16 %v1701_v49, %v1699_v19  ;;  %2150 = vst [vmem:[%s4094_s7 + $0x138] sm:$0xff] %v1701_v49  ;;  %2149 = vst [vmem:[%s4094_s7 + $0x130] sm:$0xff] %v1700_v1  ;;  %v1744_v16 = vpack.c.bf16 %v1700_v1, %v1698_v56 }
 0x3f4   : > { %v1650_v26 = vmul.f32 %v3056_v18, %v1618_v35  ;;  %v1619_v62 = vsub.f32 2.0, %v1587_v58 }
 0x3f5   : > { %1862 = vmatprep.mubr.bf16.mxu0 %v1745_v55 }
 0x3f6   : > { %v1651_v43 = vmul.f32 %v3058_v53, %v1619_v62  ;;  %v1703_v8 = vmul.f32 %v4563_v2, %v1650_v26  ;;  %v1702_v20 = vmul.f32 %v4564_v5, %v1650_v26 }
 0x3f7   : > { %v3060_v17 = vpop.eup %3059 }
 0x3f8   : > { %v1588_v45 = vmul.f32 %v3060_v17, %v1506_v52  ;;  %v1705_v22 = vmul.f32 %v4565_v50, %v1651_v43  ;;  %2152 = vst [vmem:[%s4094_s7 + $0x148] sm:$0xff] %v1703_v8  ;;  %v1704_v15 = vmul.f32 %v4566_v11, %v1651_v43  ;;  %2151 = vst [vmem:[%s4094_s7 + $0x140] sm:$0xff] %v1702_v20 }
 0x3f9   : > { %v3062_v13 = vpop.eup %3061 }
 0x3fa   : > { %1863 = vmatmul.mubr.bf16.gmra.mrb[84].mxu0 %v1744_v16  ;;  %v1620_v33 = vsub.f32 2.0, %v1588_v45  ;;  %v1589_v21 = vmul.f32 %v3062_v13, %v1509_v4  ;;  %v1747_v44 = vpack.c.bf16 %v1705_v22, %v1703_v8  ;;  %2154 = vst [vmem:[%s4094_s7 + $0x158] sm:$0xff] %v1705_v22  ;;  %2153 = vst [vmem:[%s4094_s7 + $0x150] sm:$0xff] %v1704_v15 }
 0x3fb   : > { %v1746_v12 = vpack.c.bf16 %v1704_v15, %v1702_v20 }
 0x3fc   : > { %v1652_v63 = vmul.f32 %v3060_v17, %v1620_v33  ;;  %v1621_v39 = vsub.f32 2.0, %v1589_v21  ;;  %1870 = vmatprep.mubr.bf16.mxu0 %v1747_v44 }
 0x3fe   : > { %v1653_v25 = vmul.f32 %v3062_v13, %v1621_v39  ;;  %v1707_v29 = vmul.f32 %v4567_v28, %v1652_v63  ;;  %v1706_v41 = vmul.f32 %v4568_v46, %v1652_v63 }
 0x400   : > { %v1709_v37 = vmul.f32 %v4569_v42, %v1653_v25  ;;  %2156 = vst [vmem:[%s4094_s7 + $0x168] sm:$0xff] %v1707_v29  ;;  %v1708_v54 = vmul.f32 %v4570_v47, %v1653_v25  ;;  %2155 = vst [vmem:[%s4094_s7 + $0x160] sm:$0xff] %v1706_v41 }
 0x402   : > { %1871 = vmatmul.mubr.bf16.gmra.mrb[88].mxu0 %v1746_v12  ;;  %v1749_v30 = vpack.c.bf16 %v1709_v37, %v1707_v29  ;;  %2158 = vst [vmem:[%s4094_s7 + $0x178] sm:$0xff] %v1709_v37  ;;  %2157 = vst [vmem:[%s4094_s7 + $0x170] sm:$0xff] %v1708_v54  ;;  %v1748_v3 = vpack.c.bf16 %v1708_v54, %v1706_v41 }
 0x404   : > { %1878 = vmatprep.mubr.bf16.mxu0 %v1749_v30 }
 0x40a   : > { %1879 = vmatmul.mubr.bf16.gmra.mrb[92].mxu0 %v1748_v3 }
 0x438   : > { %v1512_v52 = vpop.xlane.xlu0 %1511 }
 0x439   : > { %3063 = vrcp.f32 %v1512_v52 }
 0x43d   : > { %v1515_v31 = vpop.xlane.xlu1 %1514 }
 0x43e   : > { %3065 = vrcp.f32 %v1515_v31 }
 0x440   : > { %v1518_v4 = vpop.xlane.xlu0 %1517 }
 0x441   : > { %3067 = vrcp.f32 %v1518_v4 }
 0x443   : > { %v3064_v19 = vpop.eup %3063 }
 0x444   : > { %v1590_v56 = vmul.f32 %v3064_v19, %v1512_v52 }
 0x445   : > { %v1521_v18 = vpop.xlane.xlu1 %1520 }
 0x446   : > { %3069 = vrcp.f32 %v1521_v18  ;;  %v1622_v61 = vsub.f32 2.0, %v1590_v56 }
 0x448   : > { %v3066_v48 = vpop.eup %3065  ;;  %v1654_v24 = vmul.f32 %v3064_v19, %v1622_v61 }
 0x449   : > { %v1591_v53 = vmul.f32 %v3066_v48, %v1515_v31  ;;  %v1524_v49 = vpop.xlane.xlu0 %1523 }
 0x44a   : > { %3071 = vrcp.f32 %v1524_v49  ;;  %v1711_v1 = vmul.f32 %v4092_v7, %v1654_v24  ;;  %v1710_v35 = vmul.f32 %v4089_v59, %v1654_v24  ;;  %v4571_v24 = vld [vmem:[#allocation5_spill] sm:$0xff] }
 0x44b   : > { %v1623_v57 = vsub.f32 2.0, %v1591_v53  ;;  %v3068_v58 = vpop.eup %3067 }
 0x44c   : > { %v1592_v26 = vmul.f32 %v3068_v58, %v1518_v4  ;;  %2160 = vst [vmem:[%s4094_s7 + $0x188] sm:$0xff] %v1711_v1  ;;  %2159 = vst [vmem:[%s4094_s7 + $0x180] sm:$0xff] %v1710_v35 }
 0x44d   : > { %v1655_v55 = vmul.f32 %v3066_v48, %v1623_v57  ;;  %v1527_v62 = vpop.xlane.xlu1 %1526 }
 0x44e   : > { %3073 = vrcp.f32 %v1527_v62  ;;  %v1624_v43 = vsub.f32 2.0, %v1592_v26 }
 0x44f   : > { %v1713_v2 = vmul.f32 %v4109_v23, %v1655_v55  ;;  %v1712_v8 = vmul.f32 %v4106_v27, %v1655_v55 }
 0x450   : > { %v3070_v5 = vpop.eup %3069  ;;  %v1656_v20 = vmul.f32 %v3068_v58, %v1624_v43 }
 0x451   : > { %v1593_v17 = vmul.f32 %v3070_v5, %v1521_v18  ;;  %v1530_v7 = vpop.xlane.xlu0 %1529  ;;  %v1751_v59 = vpack.c.bf16 %v1713_v2, %v1711_v1  ;;  %2162 = vst [vmem:[%s4094_s7 + $0x198] sm:$0xff] %v1713_v2  ;;  %v1750_v16 = vpack.c.bf16 %v1712_v8, %v1710_v35  ;;  %2161 = vst [vmem:[%s4094_s7 + $0x190] sm:$0xff] %v1712_v8  ;;  %v4574_v2 = vld [vmem:[#allocation14_spill] sm:$0xff] }
 0x452   : > { %3075 = vrcp.f32 %v1530_v7  ;;  %v1715_v50 = vmul.f32 %v4122_v60, %v1656_v20  ;;  %v1714_v22 = vmul.f32 %v4119_v32, %v1656_v20 }
 0x453   : > { %v1625_v45 = vsub.f32 2.0, %v1593_v17  ;;  %1886 = vmatprep.mubr.bf16.mxu0 %v1751_v59 }
 0x454   : > { %v3072_v23 = vpop.eup %3071  ;;  %1887 = vmatmul.mubr.bf16.gmra.mrb[96].mxu0 %v1750_v16  ;;  %2164 = vst [vmem:[%s4094_s7 + $0x1a8] sm:$0xff] %v1715_v50  ;;  %2163 = vst [vmem:[%s4094_s7 + $0x1a0] sm:$0xff] %v1714_v22 }
 0x455   : > { %v1657_v27 = vmul.f32 %v3070_v5, %v1625_v45  ;;  %v1594_v11 = vmul.f32 %v3072_v23, %v1524_v49  ;;  %v1533_v15 = vpop.xlane.xlu1 %1532  ;;  %v4572_v49 = vld [vmem:[#allocation6_spill] sm:$0xff] }
 0x456   : > { %3077 = vrcp.f32 %v1533_v15 }
 0x457   : > { %v1626_v13 = vsub.f32 2.0, %v1594_v11  ;;  %v1717_v33 = vmul.f32 %v4138_v34, %v1657_v27  ;;  %v1716_v21 = vmul.f32 %v4135_v0, %v1657_v27 }
 0x458   : > { %v3074_v44 = vpop.eup %3073 }
 0x459   : > { %v1658_v60 = vmul.f32 %v3072_v23, %v1626_v13  ;;  %v1595_v32 = vmul.f32 %v3074_v44, %v1527_v62  ;;  %v1753_v63 = vpack.c.bf16 %v1717_v33, %v1715_v50  ;;  %2166 = vst [vmem:[%s4094_s7 + $0x1b8] sm:$0xff] %v1717_v33  ;;  %v1752_v39 = vpack.c.bf16 %v1716_v21, %v1714_v22  ;;  %v4573_v62 = vld [vmem:[#allocation12_spill] sm:$0xff]  ;;  %v4575_v50 = vld [vmem:[#allocation19_spill] sm:$0xff] }
 0x45a   : > { %2165 = vst [vmem:[%s4094_s7 + $0x1b0] sm:$0xff] %v1716_v21  ;;  %v4576_v23 = vld [vmem:[#allocation20_spill] sm:$0xff] }
 0x45b   : > { %v1627_v25 = vsub.f32 2.0, %v1595_v32  ;;  %1894 = vmatprep.mubr.bf16.mxu0 %v1753_v63  ;;  %v1719_v28 = vmul.f32 %v4154_v10, %v1658_v60  ;;  %v1718_v29 = vmul.f32 %v4151_v51, %v1658_v60  ;;  %v4577_v32 = vld [vmem:[#allocation23_spill] sm:$0xff] }
 0x45c   : > { %v3076_v34 = vpop.eup %3075  ;;  %1895 = vmatmul.mubr.bf16.gmra.mrb[100].mxu0 %v1752_v39  ;;  %v4578_v39 = vld [vmem:[#allocation24_spill] sm:$0xff] }
 0x45d   : > { %v1659_v0 = vmul.f32 %v3074_v44, %v1627_v25  ;;  %v1596_v46 = vmul.f32 %v3076_v34, %v1530_v7  ;;  %2168 = vst [vmem:[%s4094_s7 + $0x1c8] sm:$0xff] %v1719_v28  ;;  %2167 = vst [vmem:[%s4094_s7 + $0x1c0] sm:$0xff] %v1718_v29 }
 0x45f   : > { %v1628_v41 = vsub.f32 2.0, %v1596_v46  ;;  %v1721_v12 = vmul.f32 %v4165_v14, %v1659_v0  ;;  %v1720_v42 = vmul.f32 %v4163_v36, %v1659_v0 }
 0x460   : > { %v3078_v37 = vpop.eup %3077 }
 0x461   : > { %v1660_v47 = vmul.f32 %v3076_v34, %v1628_v41  ;;  %v1597_v10 = vmul.f32 %v3078_v37, %v1533_v15  ;;  %v1755_v51 = vpack.c.bf16 %v1721_v12, %v1719_v28  ;;  %2170 = vst [vmem:[%s4094_s7 + $0x1d8] sm:$0xff] %v1721_v12  ;;  %v1754_v54 = vpack.c.bf16 %v1720_v42, %v1718_v29 }
 0x462   : > { %2169 = vst [vmem:[%s4094_s7 + $0x1d0] sm:$0xff] %v1720_v42  ;;  %v4579_v42 = vld [vmem:[#allocation27_spill] sm:$0xff] }
 0x463   : > { %v1722_v30 = vmul.f32 %v4174_v38, %v1660_v47  ;;  %v1723_v3 = vmul.f32 %v4176_v6, %v1660_v47  ;;  %v1629_v52 = vsub.f32 2.0, %v1597_v10  ;;  %1902 = vmatprep.mubr.bf16.mxu0 %v1755_v51  ;;  %v4580_v47 = vld [vmem:[#allocation28_spill] sm:$0xff] }
 0x464   : > { %1903 = vmatmul.mubr.bf16.gmra.mrb[104].mxu0 %v1754_v54 }
 0x465   : > { %2171 = vst [vmem:[%s4094_s7 + $0x1e0] sm:$0xff] %v1722_v30  ;;  %2172 = vst [vmem:[%s4094_s7 + $0x1e8] sm:$0xff] %v1723_v3  ;;  %v1661_v14 = vmul.f32 %v3078_v37, %v1629_v52 }
 0x467   : > { %v1724_v36 = vmul.f32 %v4185_v40, %v1661_v14  ;;  %v1725_v31 = vmul.f32 %v4187_v9, %v1661_v14 }
 0x469   : > { %2173 = vst [vmem:[%s4094_s7 + $0x1f0] sm:$0xff] %v1724_v36  ;;  %2174 = vst [vmem:[%s4094_s7 + $0x1f8] sm:$0xff] %v1725_v31  ;;  %v1757_v4 = vpack.c.bf16 %v1725_v31, %v1723_v3  ;;  %v1756_v19 = vpack.c.bf16 %v1724_v36, %v1722_v30  ;;  %v4581_v31 = vld [vmem:[#allocation29_spill] sm:$0xff] }
 0x46b   : > { %1910 = vmatprep.mubr.bf16.mxu0 %v1757_v4 }
 0x46c   : > { %1911 = vmatmul.mubr.bf16.gmra.mrb[108].mxu0 %v1756_v19  ;;  %v4582_v19 = vld [vmem:[#allocation30_spill] sm:$0xff] }
 0x483   : > { %v2653_v38 = vpop.f32.mrb[48].mxu0 }
 0x484   : > { %v2654_v56 = vpop.f32.mrb[49].mxu0 }
 0x485   : > { %v2655_v6 = vadd.f32 %v2654_v56, %v2653_v38  ;;  %v2656_v18 = vpop.f32.mrb[50].mxu0 }
 0x486   : > { %v2657_v61 = vpop.f32.mrb[51].mxu0 }
 0x487   : > { %v2658_v48 = vadd.f32 %v2657_v61, %v2656_v18  ;;  %v1919_v53 = vadd.f32 %v2655_v6, %v4571_v24 }
 0x489   : > { %v1920_v57 = vadd.f32 %v2658_v48, %v4572_v49  ;;  %v4583_v49 = vld [vmem:[#allocation31_spill] sm:$0xff] }
 0x48b   : > { %v2458_v40 = vpack.c.bf16 %v1920_v57, %v1919_v53 }
 0x48d   : > { %2459 = vst [vmem:[%s4298_s11] sm:$0xff] %v2458_v40   ;;  %v2659_v9 = vpop.f32.mrb[52].mxu0  ;;  %v4584_v40 = vld [vmem:[#allocation32_spill] sm:$0xff] }
 0x48e   : > { %v2660_v1 = vpop.f32.mrb[53].mxu0 }
 0x48f   : > { %v2661_v35 = vadd.f32 %v2660_v1, %v2659_v9  ;;  %v2662_v58 = vpop.f32.mrb[54].mxu0 }
 0x490   : > { %v2663_v55 = vpop.f32.mrb[55].mxu0 }
 0x491   : > { %v2664_v26 = vadd.f32 %v2663_v55, %v2662_v58  ;;  %v1921_v43 = vadd.f32 %v2661_v35, %v4573_v62 }
 0x493   : > { %v1922_v8 = vadd.f32 %v2664_v26, %v4574_v2  ;;  %v4585_v2 = vld [vmem:[#allocation33_spill] sm:$0xff] }
 0x495   : > { %v2463_v5 = vpack.c.bf16 %v1922_v8, %v1921_v43  ;;  %v2665_v20 = vpop.f32.mrb[56].mxu0 }
 0x496   : > { %v2666_v17 = vpop.f32.mrb[57].mxu0 }
 0x497   : > { %2550 = vst [vmem:[%s4298_s11 + $0x8] sm:$0xff] %v2463_v5   ;;  %v2667_v7 = vadd.f32 %v2666_v17, %v2665_v20  ;;  %v2668_v59 = vpop.f32.mrb[58].mxu0  ;;  %v4586_v5 = vld [vmem:[#allocation34_spill] sm:$0xff] }
 0x498   : > { %v2669_v16 = vpop.f32.mrb[59].mxu0 }
 0x499   : > { %v2670_v45 = vadd.f32 %v2669_v16, %v2668_v59  ;;  %v1923_v22 = vadd.f32 %v2667_v7, %v4575_v50 }
 0x49b   : > { %v1924_v27 = vadd.f32 %v2670_v45, %v4576_v23  ;;  %v4587_v23 = vld [vmem:[#allocation35_spill] sm:$0xff] }
 0x49d   : > { %v2468_v11 = vpack.c.bf16 %v1924_v27, %v1923_v22  ;;  %v2671_v15 = vpop.f32.mrb[60].mxu0 }
 0x49e   : > { %v2672_v13 = vpop.f32.mrb[61].mxu0 }
 0x49f   : > { %2551 = vst [vmem:[%s4298_s11 + $0x10] sm:$0xff] %v2468_v11   ;;  %v2673_v33 = vadd.f32 %v2672_v13, %v2671_v15  ;;  %v2674_v21 = vpop.f32.mrb[62].mxu0  ;;  %v4588_v11 = vld [vmem:[#allocation36_spill] sm:$0xff] }
 0x4a0   : > { %v2675_v44 = vpop.f32.mrb[63].mxu0 }
 0x4a1   : > { %v2676_v60 = vadd.f32 %v2675_v44, %v2674_v21  ;;  %v1925_v63 = vadd.f32 %v2673_v33, %v4577_v32 }
 0x4a3   : > { %v1926_v25 = vadd.f32 %v2676_v60, %v4578_v39 }
 0x4a5   : > { %v2473_v28 = vpack.c.bf16 %v1926_v25, %v1925_v63  ;;  %v2677_v29 = vpop.f32.mrb[64].mxu0 }
 0x4a6   : > { %v2678_v34 = vpop.f32.mrb[65].mxu0 }
 0x4a7   : > { %2552 = vst [vmem:[%s4298_s11 + $0x18] sm:$0xff] %v2473_v28   ;;  %v2679_v0 = vadd.f32 %v2678_v34, %v2677_v29  ;;  %v2680_v46 = vpop.f32.mrb[66].mxu0 }
 0x4a8   : > { %v2681_v41 = vpop.f32.mrb[67].mxu0 }
 0x4a9   : > { %v2682_v12 = vadd.f32 %v2681_v41, %v2680_v46  ;;  %v1927_v37 = vadd.f32 %v2679_v0, %v4579_v42 }
 0x4ab   : > { %v1928_v10 = vadd.f32 %v2682_v12, %v4580_v47 }
 0x4ad   : > { %v2478_v51 = vpack.c.bf16 %v1928_v10, %v1927_v37  ;;  %v2683_v54 = vpop.f32.mrb[68].mxu0 }
 0x4ae   : > { %v2684_v30 = vpop.f32.mrb[69].mxu0 }
 0x4af   : > { %2553 = vst [vmem:[%s4298_s11 + $0x20] sm:$0xff] %v2478_v51   ;;  %v2685_v3 = vadd.f32 %v2684_v30, %v2683_v54  ;;  %v2686_v52 = vpop.f32.mrb[70].mxu0 }
 0x4b0   : > { %v2687_v14 = vpop.f32.mrb[71].mxu0 }
 0x4b1   : > { %v2688_v36 = vadd.f32 %v2687_v14, %v2686_v52  ;;  %v1929_v4 = vadd.f32 %v2685_v3, %v4581_v31 }
 0x4b3   : > { %v1930_v38 = vadd.f32 %v2688_v36, %v4582_v19 }
 0x4b5   : > { %v2483_v56 = vpack.c.bf16 %v1930_v38, %v1929_v4  ;;  %v2689_v6 = vpop.f32.mrb[72].mxu0 }
 0x4b6   : > { %v2690_v18 = vpop.f32.mrb[73].mxu0 }
 0x4b7   : > { %2554 = vst [vmem:[%s4298_s11 + $0x28] sm:$0xff] %v2483_v56   ;;  %v2691_v61 = vadd.f32 %v2690_v18, %v2689_v6  ;;  %v2692_v48 = vpop.f32.mrb[74].mxu0 }
 0x4b8   : > { %v2693_v24 = vpop.f32.mrb[75].mxu0 }
 0x4b9   : > { %v2694_v53 = vadd.f32 %v2693_v24, %v2692_v48  ;;  %v1931_v57 = vadd.f32 %v2691_v61, %v4583_v49 }
 0x4bb   : > { %v1932_v9 = vadd.f32 %v2694_v53, %v4584_v40 }
 0x4bd   : > { %v2488_v1 = vpack.c.bf16 %v1932_v9, %v1931_v57  ;;  %v2695_v35 = vpop.f32.mrb[76].mxu0 }
 0x4be   : > { %v2696_v58 = vpop.f32.mrb[77].mxu0 }
 0x4bf   : > { %2555 = vst [vmem:[%s4298_s11 + $0x30] sm:$0xff] %v2488_v1   ;;  %v2697_v55 = vadd.f32 %v2696_v58, %v2695_v35  ;;  %v2698_v26 = vpop.f32.mrb[78].mxu0 }
 0x4c0   : > { %v2699_v62 = vpop.f32.mrb[79].mxu0 }
 0x4c1   : > { %v2700_v43 = vadd.f32 %v2699_v62, %v2698_v26  ;;  %v1933_v8 = vadd.f32 %v2697_v55, %v4585_v2 }
 0x4c3   : > { %v1934_v20 = vadd.f32 %v2700_v43, %v4586_v5 }
 0x4c5   : > { %v2493_v17 = vpack.c.bf16 %v1934_v20, %v1933_v8  ;;  %v2701_v7 = vpop.f32.mrb[80].mxu0 }
 0x4c6   : > { %v2702_v59 = vpop.f32.mrb[81].mxu0 }
 0x4c7   : > { %2556 = vst [vmem:[%s4298_s11 + $0x38] sm:$0xff] %v2493_v17   ;;  %v2703_v16 = vadd.f32 %v2702_v59, %v2701_v7  ;;  %v2704_v45 = vpop.f32.mrb[82].mxu0 }
 0x4c8   : > { %v2705_v50 = vpop.f32.mrb[83].mxu0 }
 0x4c9   : > { %v2706_v22 = vadd.f32 %v2705_v50, %v2704_v45  ;;  %v1935_v27 = vadd.f32 %v2703_v16, %v4587_v23 }
 0x4cb   : > { %v1936_v15 = vadd.f32 %v2706_v22, %v4588_v11 }
 0x4cd   : > { %v2498_v13 = vpack.c.bf16 %v1936_v15, %v1935_v27  ;;  %v2707_v33 = vpop.f32.mrb[84].mxu0 }
 0x4ce   : > { %3092 = shalt.err (!%p3089_p3)
}
 0x4cf   : > { %s3093_s30 = scalar_lea.hbm %s4326_s13, 8192  ;;  %s3097_s7 = scalar_lea.hbm %s4403_s5, 16384 }
 0x4d0   : > { %p3094_p4 = scmp.ne.s32.totalorder %s4326_s13, %s3093_s30  ;;  %p3098_p9 = scmp.lt.u32.totalorder %s4326_s13, %s4403_s5 }
 0x4d1   : > { %p3099_p10 = scmp.lt.u32.totalorder %s3097_s7, %s3093_s30  ;;  %p3101_p12 = scmp.lt.u32.totalorder %s3093_s30, %s4326_s13 }
 0x4d2   : > { %p3095_p7 = pnand %p3094_p4, %p3215_p5 }
 0x4d3   : > { %p3100_p11 = por %p3099_p10, %p3098_p9 }
 0x4d4   : > { %p3096_p8 = pneg %p3095_p7 }
 0x4d5   : > { %p3102_p13 = por %p3101_p12, %p3100_p11 }
 0x4d7   : > { %p3103_p0 = pnand %p3102_p13, %p3096_p8 }
 0x4d9   : > { %3106 = shalt.err (!%p3103_p0)
}
 0x4da   : > { %s3145_s15 = smov 256   ;;  %s3146_s26 = smov 16   ;;  %v2708_v21 = vpop.f32.mrb[85].mxu0  ;;  %2557 = vst [vmem:[%s4298_s11 + $0x40] sm:$0xff] %v2498_v13   ;;  %v4589_v39 = vld [vmem:[#allocation7_spill] sm:$0xff]  ;;  %v4590_v28 = vld [vmem:[#allocation8_spill] sm:$0xff] }
 0x4db   : > { %2813 = dma.vmem_to_hbm [thread:$0]  (%p3215_p5), %s4331_s14, 8192, %s4326_s13, %s4335_s16, %s3145_s15, %s3145_s15, %s3146_s26   ;;  %v2709_v44 = vadd.f32 %v2708_v21, %v2707_v33  ;;  %v2710_v60 = vpop.f32.mrb[86].mxu0  ;;  %v4591_v47 = vld [vmem:[#allocation9_spill] sm:$0xff]  ;;  %v4592_v51 = vld [vmem:[#allocation10_spill] sm:$0xff]  ;;  %v4593_v19 = vld [vmem:[#allocation11_spill] sm:$0xff] }
 0x4dc   : > { %v2711_v32 = vpop.f32.mrb[87].mxu0  ;;  %v4594_v56 = vld [vmem:[#allocation13_spill] sm:$0xff]  ;;  %v4595_v40 = vld [vmem:[#allocation15_spill] sm:$0xff]  ;;  %v4596_v1 = vld [vmem:[#allocation16_spill] sm:$0xff] }
 0x4dd   : > { %v2712_v63 = vadd.f32 %v2711_v32, %v2710_v60  ;;  %v1937_v25 = vadd.f32 %v2709_v44, %v4589_v39  ;;  %v2713_v0 = vpop.f32.mrb[88].mxu0  ;;  %v4597_v5 = vld [vmem:[#allocation17_spill] sm:$0xff]  ;;  %v4598_v17 = vld [vmem:[#allocation18_spill] sm:$0xff] }
 0x4de   : > { %v2714_v46 = vpop.f32.mrb[89].mxu0  ;;  %v4599_v11 = vld [vmem:[#allocation21_spill] sm:$0xff]  ;;  %v4600_v13 = vld [vmem:[#allocation22_spill] sm:$0xff] }
 0x4df   : > { %v1938_v29 = vadd.f32 %v2712_v63, %v4590_v28  ;;  %v2715_v41 = vadd.f32 %v2714_v46, %v2713_v0  ;;  %v2716_v12 = vpop.f32.mrb[90].mxu0  ;;  %v4601_v28 = vld [vmem:[#allocation25_spill] sm:$0xff] }
 0x4e0   : > { %v2717_v42 = vpop.f32.mrb[91].mxu0 }
 0x4e1   : > { %v2503_v34 = vpack.c.bf16 %v1938_v29, %v1937_v25  ;;  %v2718_v37 = vadd.f32 %v2717_v42, %v2716_v12  ;;  %v1939_v10 = vadd.f32 %v2715_v41, %v4591_v47  ;;  %v2719_v3 = vpop.f32.mrb[92].mxu0 }
 0x4e2   : > { %v2720_v52 = vpop.f32.mrb[93].mxu0 }
 0x4e3   : > { %2558 = vst [vmem:[%s4298_s11 + $0x48] sm:$0xff] %v2503_v34   ;;  %v1940_v54 = vadd.f32 %v2718_v37, %v4592_v51  ;;  %v2721_v14 = vadd.f32 %v2720_v52, %v2719_v3  ;;  %v2722_v36 = vpop.f32.mrb[94].mxu0  ;;  %v4602_v34 = vld [vmem:[#allocation26_spill] sm:$0xff] }
 0x4e4   : > { %v2723_v31 = vpop.f32.mrb[95].mxu0 }
 0x4e5   : > { %v2508_v30 = vpack.c.bf16 %v1940_v54, %v1939_v10  ;;  %v2724_v4 = vadd.f32 %v2723_v31, %v2722_v36  ;;  %v1941_v38 = vadd.f32 %v2721_v14, %v4593_v19 }
 0x4e7   : > { %2559 = vst [vmem:[%s4298_s11 + $0x50] sm:$0xff] %v2508_v30   ;;  %v1942_v6 = vadd.f32 %v2724_v4, %v4594_v56 }
 0x4e9   : > { %v2513_v18 = vpack.c.bf16 %v1942_v6, %v1941_v38 }
 0x4eb   : > { %2560 = vst [vmem:[%s4298_s11 + $0x58] sm:$0xff] %v2513_v18  }
 0x527   : > { %v2725_v61 = vpop.f32.mrb[96].mxu0 }
 0x528   : > { %v2726_v48 = vpop.f32.mrb[97].mxu0 }
 0x529   : > { %v2727_v24 = vadd.f32 %v2726_v48, %v2725_v61  ;;  %v2728_v53 = vpop.f32.mrb[98].mxu0 }
 0x52a   : > { %v2729_v49 = vpop.f32.mrb[99].mxu0 }
 0x52b   : > { %v2730_v57 = vadd.f32 %v2729_v49, %v2728_v53  ;;  %v1943_v9 = vadd.f32 %v2727_v24, %v4595_v40 }
 0x52d   : > { %v1944_v35 = vadd.f32 %v2730_v57, %v4596_v1 }
 0x52f   : > { %v2518_v58 = vpack.c.bf16 %v1944_v35, %v1943_v9  ;;  %v2731_v55 = vpop.f32.mrb[100].mxu0 }
 0x530   : > { %v2732_v26 = vpop.f32.mrb[101].mxu0 }
 0x531   : > { %2561 = vst [vmem:[%s4298_s11 + $0x60] sm:$0xff] %v2518_v58   ;;  %v2733_v62 = vadd.f32 %v2732_v26, %v2731_v55  ;;  %v2734_v43 = vpop.f32.mrb[102].mxu0 }
 0x532   : > { %v2735_v2 = vpop.f32.mrb[103].mxu0 }
 0x533   : > { %v2736_v8 = vadd.f32 %v2735_v2, %v2734_v43  ;;  %v1945_v20 = vadd.f32 %v2733_v62, %v4597_v5 }
 0x535   : > { %v1946_v7 = vadd.f32 %v2736_v8, %v4598_v17 }
 0x537   : > { %v2523_v59 = vpack.c.bf16 %v1946_v7, %v1945_v20  ;;  %v2737_v16 = vpop.f32.mrb[104].mxu0 }
 0x538   : > { %v2738_v45 = vpop.f32.mrb[105].mxu0 }
 0x539   : > { %2562 = vst [vmem:[%s4298_s11 + $0x68] sm:$0xff] %v2523_v59   ;;  %v2739_v50 = vadd.f32 %v2738_v45, %v2737_v16  ;;  %v2740_v22 = vpop.f32.mrb[106].mxu0 }
 0x53a   : > { %v2741_v23 = vpop.f32.mrb[107].mxu0 }
 0x53b   : > { %v2742_v27 = vadd.f32 %v2741_v23, %v2740_v22  ;;  %v1947_v15 = vadd.f32 %v2739_v50, %v4599_v11 }
 0x53d   : > { %v1948_v33 = vadd.f32 %v2742_v27, %v4600_v13 }
 0x53f   : > { %v2528_v21 = vpack.c.bf16 %v1948_v33, %v1947_v15  ;;  %v2743_v44 = vpop.f32.mrb[108].mxu0 }
 0x540   : > { %v2744_v60 = vpop.f32.mrb[109].mxu0 }
 0x541   : > { %2563 = vst [vmem:[%s4298_s11 + $0x70] sm:$0xff] %v2528_v21   ;;  %v2745_v32 = vadd.f32 %v2744_v60, %v2743_v44  ;;  %v2746_v63 = vpop.f32.mrb[110].mxu0 }
 0x542   : > { %v2747_v39 = vpop.f32.mrb[111].mxu0 }
 0x543   : > { %v2748_v25 = vadd.f32 %v2747_v39, %v2746_v63  ;;  %v1949_v29 = vadd.f32 %v2745_v32, %v4601_v28 }
 0x545   : > { %v1950_v0 = vadd.f32 %v2748_v25, %v4602_v34 }
 0x547   : > { %v2533_v46 = vpack.c.bf16 %v1950_v0, %v1949_v29 }
 0x549   : > { %2564 = vst [vmem:[%s4298_s11 + $0x78] sm:$0xff] %v2533_v46  }
 0x54a PF: > { %p2819_p5 = scmp.ge.s32.totalorder %s3141_s21, 2  ;;  %s2220_s28 = sand.u32 1, %s3129_s18  }
 0x54b   : > { %s2221_s12 = scalar_lea.sflag [#allocation3], %s2220_s28 }
 0x54c   : > { %p2816_p1 = pnand %p2819_p5, %p3219_p6 }
 0x54e   : > { %3124 = dma.done.wait (!%p2816_p1), %s2221_s12, 8192  }
 0x54f   : > { %3126 = vsyncadd (!%p2816_p1), %s2221_s12, 4294959104  ;;  %p16_p2 = scmp.ge.s32.totalorder %s3202_s24, 4   ;;  %s4603_s18 = smov %s3133_s19 }
 0x550   : > { %s4604_s19 = smov %s3137_s20  ;;  %s4605_s20 = smov %s3213_s27 }
 0x551   : > { %s4606_s21 = smov %s3202_s24  ;;  %18 = sbr.rel (!%p16_p2) target bundleno = 3 (0x3), region = 83 }
 0x558   :  { %2226 = vsyncpa [#allocation3], 1 }
 0x559   :  { %2228 = vsyncpa [#allocation3 + $0x1], 1 }

// kernel: da_module_forward.3
= control target key start
LH: loop header
LB: loop body
LE: loop exit
PB: predicated region body
PF: predicated region fallthrough
CT: control target
= control target key end

     0   :  { %s4254_s15 = smov 0   ;;  %s5534_s0 = inlined_call_operand.vmem [shape: bf16[2,16,16,128], index: 0, kind: input, shape index: {}]   ;;  %s5535_s1 = inlined_call_operand.vmem [shape: bf16[1152,128], index: 1, kind: input, shape index: {}]   ;;  %s5536_s2 = inlined_call_operand.vmem [shape: bf16[2,16,16,128], index: 2, kind: output, shape index: {0}]   ;;  %s5537_s3 = inlined_call_operand.vmem [shape: f32[2,1,128], index: 3, kind: output, shape index: {1}]   ;;  %s5538_s4 = inlined_call_operand.vmem [shape: f32[2,1,128], index: 4, kind: output, shape index: {2}]  }
   0x1 LB: > { %s3324_s16 = sadd.s32 4294967295, %s4226_s15   ;;  %p3328_p0 = scmp.ge.s32.totalorder %s4226_s15, 1  ;;  %s4226_s15 = sphi %s4254_s15, %s15_s15  }
   0x2   : > { %p167_p1 = scmp.lt.s32.totalorder %s4226_s15, 3 }
   0x4   : > { %p168_p2 = pnand %p3328_p0, %p167_p1 }
   0x5   : > { %v4129_v0 = vld [vmem:[%s5535_s1 + $0x40] sm:$0xff] (!%p168_p2)   ;;  %v4228_v2 = vmov (!%p168_p2), 0   ;;  %v4131_v3 = vld [vmem:[%s5535_s1 + $0x48] sm:$0xff] (!%p168_p2)   ;;  %v4133_v5 = vld [vmem:[%s5535_s1 + $0x50] sm:$0xff] (!%p168_p2)   ;;  %p199_p3 = scmp.lt.s32.totalorder (!%p168_p2), %s3324_s16, 1 }
   0x6   : > { %171 = sbr.rel (%p168_p2) target bundleno = 557 (0x22d), region = 28  ;;  %v4130_v1 = vld [vmem:[%s5535_s1] sm:$0xff] (!%p168_p2)   ;;  %217 = vst [vmem:[#allocation2 + $0x8] sm:$0xff] (!%p168_p2), %v4228_v2  ;;  %2178 = vmatprep.mubr.bf16.mxu0 (!%p168_p2), %v4228_v2  ;;  %216 = vst [vmem:[#allocation2] sm:$0xff] (!%p168_p2), %v4228_v2  ;;  %3584 = vmatprep.subr.bf16.mxu0 (!%p168_p2), %v4129_v0  ;;  %v4132_v4 = vld [vmem:[%s5535_s1 + $0x8] sm:$0xff] (!%p168_p2)   ;;  %v455_v20 = vrot.slane (!%p168_p2), %v4228_v2, 7 }
   0x7   : > { %218 = vst [vmem:[#allocation2 + $0x10] sm:$0xff] (!%p168_p2), %v4228_v2  ;;  %219 = vst [vmem:[#allocation2 + $0x18] sm:$0xff] (!%p168_p2), %v4228_v2  ;;  %4104 = vmatprep.subr.bf16.mxu1 (!%p168_p2), %v4129_v0  ;;  %3585 = vmatpush3.bf16.msra.mxu0 (!%p168_p2), %v4130_v1  ;;  %v4134_v6 = vld [vmem:[%s5535_s1 + $0x10] sm:$0xff] (!%p168_p2)   ;;  %v4135_v7 = vld [vmem:[%s5535_s1 + $0x58] sm:$0xff] (!%p168_p2)   ;;  %vm447_vm0 = vsmask.f32 (!%p168_p2), 256 }
   0x8   : > { %221 = vst [vmem:[#allocation2 + $0x28] sm:$0xff] (!%p168_p2), %v4228_v2  ;;  %222 = vst [vmem:[#allocation2 + $0x30] sm:$0xff] (!%p168_p2), %v4228_v2  ;;  %4112 = vmatpush3.bf16.msra.mxu1 (!%p168_p2), %v4130_v1  ;;  %3586 = vmatprep.subr.bf16.mxu0 (!%p168_p2), %v4131_v3  ;;  %v4136_v8 = vld [vmem:[%s5535_s1 + $0x18] sm:$0xff] (!%p168_p2)   ;;  %v4137_v9 = vld [vmem:[%s5535_s1 + $0x60] sm:$0xff] (!%p168_p2)   ;;  %vm672_vm1 = vsmask.f32 (!%p168_p2), 7424 }
   0x9   : > { %224 = vst [vmem:[#allocation2 + $0x40] sm:$0xff] (!%p168_p2), %v4228_v2  ;;  %225 = vst [vmem:[#allocation2 + $0x48] sm:$0xff] (!%p168_p2), %v4228_v2  ;;  %4105 = vmatprep.subr.bf16.mxu1 (!%p168_p2), %v4131_v3  ;;  %v4138_v10 = vld [vmem:[%s5535_s1 + $0x20] sm:$0xff] (!%p168_p2)   ;;  %v4139_v11 = vld [vmem:[%s5535_s1 + $0x68] sm:$0xff] (!%p168_p2)  }
   0xa   : > { %227 = vst [vmem:[#allocation2 + $0x58] sm:$0xff] (!%p168_p2), %v4228_v2  ;;  %228 = vst [vmem:[#allocation2 + $0x60] sm:$0xff] (!%p168_p2), %v4228_v2  ;;  %v4140_v15 = vld [vmem:[%s5535_s1 + $0x28] sm:$0xff] (!%p168_p2)   ;;  %v4141_v17 = vld [vmem:[%s5535_s1 + $0x70] sm:$0xff] (!%p168_p2)  }
   0xb   : > { %230 = vst [vmem:[#allocation2 + $0x70] sm:$0xff] (!%p168_p2), %v4228_v2  ;;  %231 = vst [vmem:[#allocation2 + $0x78] sm:$0xff] (!%p168_p2), %v4228_v2  ;;  %3587 = vmatpush3.bf16.msra.mxu0 (!%p168_p2), %v4132_v4  ;;  %v4142_v21 = vld [vmem:[%s5535_s1 + $0x30] sm:$0xff] (!%p168_p2)   ;;  %v4143_v26 = vld [vmem:[%s5535_s1 + $0x78] sm:$0xff] (!%p168_p2)  }
   0xc   : > { %233 = vst [vmem:[#allocation2 + $0x88] sm:$0xff] (!%p168_p2), %v4228_v2  ;;  %234 = vst [vmem:[#allocation2 + $0x90] sm:$0xff] (!%p168_p2), %v4228_v2  ;;  %4113 = vmatpush3.bf16.msra.mxu1 (!%p168_p2), %v4132_v4  ;;  %3588 = vmatprep.subr.bf16.mxu0 (!%p168_p2), %v4133_v5  ;;  %v4144_v27 = vld [vmem:[%s5535_s1 + $0x38] sm:$0xff] (!%p168_p2)   ;;  %v4146_v35 = vld [vmem:[%s5535_s1 + $0xc0] sm:$0xff] (!%p168_p2)  }
   0xd   : > { %236 = vst [vmem:[#allocation2 + $0xa0] sm:$0xff] %v4228_v2  ;;  %237 = vst [vmem:[#allocation2 + $0xa8] sm:$0xff] %v4228_v2  ;;  %s5540_s16 = smov (!%p199_p3, %s3324_s16), 1  ;;  %4106 = vmatprep.subr.bf16.mxu1 %v4133_v5  ;;  %v415_v14 = vld [vmem:[#allocation2] sm:$0x80]  ;;  %v4150_v50 = vld [vmem:[%s5535_s1 + $0xc8] sm:$0xff]  }
   0xe   : > { %239 = vst [vmem:[#allocation2 + $0xb8] sm:$0xff] %v4228_v2  ;;  %240 = vst [vmem:[#allocation2 + $0xc0] sm:$0xff] %v4228_v2  ;;  %s3455_s5 = sshll.u32 %s5540_s16, 7  ;;  %v449_v23 = vshrl.u32 %v415_v14, 16  ;;  %v417_v33 = vld [vmem:[#allocation2 + $0x18] sm:$0x80]  ;;  %s211_s9 = scalar_lea.vmem %s5537_s3, %s5540_s16 }
   0xf   : > { %242 = vst [vmem:[#allocation2 + $0xd0] sm:$0xff] %v4228_v2  ;;  %243 = vst [vmem:[#allocation2 + $0xd8] sm:$0xff] %v4228_v2  ;;  %3589 = vmatpush3.bf16.msra.mxu0 %v4134_v6  ;;  %s4339_s12 = scalar_lea.vmem %s5534_s0, %s3455_s5  ;;  %v4147_v36 = vld [vmem:[%s5535_s1 + $0x140] sm:$0xff]   ;;  %v461_v44 = vshrl.u32 %v417_v33, 16  ;;  %v4151_v51 = vld [vmem:[%s5535_s1 + $0x88] sm:$0xff]   ;;  %s5458_s7 = scalar_lea.vmem %s5536_s2, %s3455_s5 }
  0x10   : > { %245 = vst [vmem:[#allocation2 + $0xe8] sm:$0xff] %v4228_v2  ;;  %246 = vst [vmem:[#allocation2 + $0xf0] sm:$0xff] %v4228_v2  ;;  %4114 = vmatpush3.bf16.msra.mxu1 %v4134_v6  ;;  %3590 = vmatprep.subr.bf16.mxu0 %v4135_v7  ;;  %v4145_v12 = vld [vmem:[%s4339_s12 + $0x58] sm:$0xff]   ;;  %v451_v28 = vrot.slane %v449_v23, 7  ;;  %v4367_v29 = vld [vmem:[%s4339_s12] sm:$0xff]   ;;  %s214_s13 = scalar_lea.vmem %s5538_s4, %s5540_s16 }
  0x11   : > { %248 = vst [vmem:[#allocation2 + $0x100] sm:$0xff] %v4228_v2  ;;  %249 = vst [vmem:[#allocation2 + $0x108] sm:$0xff] %v4228_v2  ;;  %4107 = vmatprep.subr.bf16.mxu1 %v4135_v7  ;;  %v600_v13 = vshll.u32 %v4145_v12, 16  ;;  %2274 = vmatprep.mubr.bf16.mxu1 %v4145_v12  ;;  %v597_v16 = vshrl.u32 %v4145_v12, 16  ;;  %v4153_v32 = vld [vmem:[%s4339_s12 + $0x60] sm:$0xff]   ;;  %v465_v37 = vshrl.u32 %v4367_v29, 16 }
  0x12   : > { %251 = vst [vmem:[#allocation2 + $0x118] sm:$0xff] %v4228_v2  ;;  %252 = vst [vmem:[#allocation2 + $0x120] sm:$0xff] %v4228_v2  ;;  %v4148_v38 = vld [vmem:[%s5535_s1 + $0x80] sm:$0xff]   ;;  %v609_v40 = vshrl.u32 %v4153_v32, 16  ;;  %v612_v41 = vshll.u32 %v4153_v32, 16  ;;  %v468_v43 = vshll.u32 %v4367_v29, 16  ;;  %v459_v46 = vsel %vm447_vm0, %v451_v28, %v455_v20 }
  0x13   : > { %254 = vst [vmem:[#allocation2 + $0x130] sm:$0xff] %v4228_v2  ;;  %255 = vst [vmem:[#allocation2 + $0x138] sm:$0xff] %v4228_v2  ;;  %3591 = vmatpush3.bf16.msra.mxu0 %v4136_v8  ;;  %v757_v18 = vrot.slane %v600_v13, 1  ;;  %v599_v24 = vrot.slane %v597_v16, 7  ;;  %v4149_v39 = vld [vmem:[%s5535_s1 + $0x100] sm:$0xff]   ;;  %v467_v42 = vrot.slane %v465_v37, 7 }
  0x14   : > { %257 = vst [vmem:[#allocation2 + $0x148] sm:$0xff] %v4228_v2  ;;  %258 = vst [vmem:[#allocation2 + $0x150] sm:$0xff] %v4228_v2  ;;  %4115 = vmatpush3.bf16.msra.mxu1 %v4136_v8  ;;  %3592 = vmatprep.subr.bf16.mxu0 %v4137_v9  ;;  %v611_v48 = vrot.slane %v609_v40, 7  ;;  %v764_v49 = vrot.slane %v612_v41, 1  ;;  %v4157_v53 = vld [vmem:[%s5535_s1 + $0x148] sm:$0xff]   ;;  %v463_v55 = vrot.slane %v461_v44, 7 }
  0x15   : > { %260 = vst [vmem:[#allocation2 + $0x160] sm:$0xff] %v4228_v2  ;;  %261 = vst [vmem:[#allocation2 + $0x168] sm:$0xff] %v4228_v2  ;;  %4108 = vmatprep.subr.bf16.mxu1 %v4137_v9  ;;  %v4358_v22 = vor.u32 %v757_v18, %v597_v16  ;;  %v602_v30 = vor.u32 %v600_v13, %v599_v24  ;;  %v4402_v54 = vor.u32 %v468_v43, %v467_v42  ;;  %v4154_v56 = vld [vmem:[%s5535_s1 + $0xd0] sm:$0xff]   ;;  %v4159_v59 = vld [vmem:[%s5535_s1 + $0x108] sm:$0xff]  }
  0x16   : > { %263 = vst [vmem:[#allocation2 + $0x178] sm:$0xff] %v4228_v2  ;;  %264 = vst [vmem:[#allocation2 + $0x180] sm:$0xff] %v4228_v2  ;;  %v4395_v52 = vor.u32 %v764_v49, %v609_v40  ;;  %v614_v57 = vor.u32 %v612_v41, %v611_v48  ;;  %v4412_v60 = vld [vmem:[%s4339_s12 + $0x8] sm:$0xff]   ;;  %v419_v62 = vld [vmem:[#allocation2 + $0x30] sm:$0x80] }
  0x17   : > { %266 = vst [vmem:[#allocation2 + $0x190] sm:$0xff] %v4228_v2  ;;  %267 = vst [vmem:[#allocation2 + $0x198] sm:$0xff] %v4228_v2  ;;  %3593 = vmatpush3.bf16.msra.mxu0 %v4138_v10  ;;  %v4161_v61 = vld [vmem:[%s4339_s12 + $0x68] sm:$0xff]   ;;  %v471_v63 = vsel %vm447_vm0, %v463_v55, %v4402_v54  ;;  %v477_v0 = vshrl.u32 %v4412_v60, 16  ;;  %v480_v1 = vshll.u32 %v4412_v60, 16  ;;  %v473_v3 = vshrl.u32 %v419_v62, 16 }
  0x18   : > { %269 = vst [vmem:[#allocation2 + $0x1a8] sm:$0xff] %v4228_v2  ;;  %410 = vst [vmem:[#allocation2 + $0x128] sm:$0xff] %v4145_v12  ;;  %4116 = vmatpush3.bf16.msra.mxu1 %v4138_v10  ;;  %3594 = vmatprep.subr.bf16.mxu0 %v4139_v11  ;;  %v4155_v6 = vld [vmem:[%s5535_s1 + $0x90] sm:$0xff]   ;;  %v621_v7 = vshrl.u32 %v4161_v61, 16  ;;  %v624_v8 = vshll.u32 %v4161_v61, 16  ;;  %v4156_v10 = vld [vmem:[%s5535_s1 + $0xd8] sm:$0xff]  }
  0x19   : > { %4109 = vmatprep.subr.bf16.mxu1 %v4139_v11  ;;  %v439_v19 = vld [vmem:[#allocation2 + $0x120] sm:$0x80]  ;;  %399 = vst [vmem:[#allocation2 + $0x20] sm:$0xff] %v4367_v29  ;;  %411 = vst [vmem:[#allocation2 + $0x140] sm:$0xff] %v4153_v32  ;;  %v479_v11 = vrot.slane %v477_v0, 7  ;;  %v4158_v12 = vld [vmem:[%s5535_s1 + $0x98] sm:$0xff]  }
  0x1a   : > { %v593_v25 = vshrl.u32 %v439_v19, 16  ;;  %v441_v34 = vld [vmem:[#allocation2 + $0x138] sm:$0x80]  ;;  %400 = vst [vmem:[#allocation2 + $0x38] sm:$0xff] %v4412_v60  ;;  %412 = vst [vmem:[#allocation2 + $0x158] sm:$0xff] %v4161_v61  ;;  %v623_v13 = vrot.slane %v621_v7, 7 }
  0x1b   : > { %3595 = vmatpush3.bf16.msra.mxu0 %v4140_v15  ;;  %v605_v45 = vshrl.u32 %v441_v34, 16  ;;  %v443_v4 = vld [vmem:[#allocation2 + $0x150] sm:$0x80]  ;;  %v771_v14 = vrot.slane %v624_v8, 1  ;;  %v4162_v18 = vld [vmem:[%s5535_s1 + $0xe0] sm:$0xff]   ;;  %v4165_v41 = vld [vmem:[%s5535_s1 + $0xa8] sm:$0xff]  }
  0x1c   : > { %4117 = vmatpush3.bf16.msra.mxu1 %v4140_v15  ;;  %3596 = vmatprep.subr.bf16.mxu0 %v4141_v17  ;;  %v595_v31 = vrot.slane %v593_v25, 7  ;;  %v617_v9 = vshrl.u32 %v443_v4, 16  ;;  %v475_v15 = vrot.slane %v473_v3, 7  ;;  %v626_v19 = vor.u32 %v624_v8, %v623_v13  ;;  %v4167_v23 = vld [vmem:[%s4339_s12 + $0x70] sm:$0xff]   ;;  %v421_v24 = vld [vmem:[#allocation2 + $0x48] sm:$0x80] }
  0x1d   : > { %4110 = vmatprep.subr.bf16.mxu1 %v4141_v17  ;;  %v607_v58 = vrot.slane %v605_v45, 7  ;;  %v4434_v17 = vor.u32 %v480_v1, %v479_v11  ;;  %v4440_v20 = vor.u32 %v771_v14, %v621_v7  ;;  %413 = vst [vmem:[#allocation2 + $0x170] sm:$0xff] %v4167_v23  ;;  %v633_v33 = vshrl.u32 %v4167_v23, 16  ;;  %v801_v55 = vld [vmem:[#allocation2 + $0x18] sm:$0x80] }
  0x1e   : > { %v603_v47 = vsel %vm447_vm0, %v595_v31, %v602_v30  ;;  %v619_v16 = vrot.slane %v617_v9, 7  ;;  %v485_v30 = vshrl.u32 %v421_v24, 16  ;;  %v445_v31 = vld [vmem:[#allocation2 + $0x168] sm:$0x80]  ;;  %v636_v34 = vshll.u32 %v4167_v23, 16  ;;  %v4177_v11 = vld [vmem:[%s5535_s1 + $0x158] sm:$0xff]  }
  0x1f   : > { %3597 = vmatpush3.bf16.msra.mxu0 %v4142_v21  ;;  %v615_v5 = vsel %vm447_vm0, %v607_v58, %v614_v57  ;;  %v483_v25 = vsel %vm447_vm0, %v475_v15, %v4434_v17  ;;  %v635_v42 = vrot.slane %v633_v33, 7  ;;  %v4170_v58 = vld [vmem:[%s5535_s1 + $0xb0] sm:$0xff]   ;;  %v4178_v14 = vld [vmem:[%s5535_s1 + $0x118] sm:$0xff]  }
  0x20   : > { %4118 = vmatpush3.bf16.msra.mxu1 %v4142_v21  ;;  %3598 = vmatprep.subr.bf16.mxu0 %v4143_v26  ;;  %v4443_v21 = vld [vmem:[%s4339_s12 + $0x10] sm:$0xff]   ;;  %v487_v40 = vrot.slane %v485_v30, 7  ;;  %v778_v44 = vrot.slane %v636_v34, 1 }
  0x21   : > { %4111 = vmatprep.subr.bf16.mxu1 %v4143_v26  ;;  %v4163_v26 = vld [vmem:[%s5535_s1 + $0xa0] sm:$0xff]   ;;  %401 = vst [vmem:[#allocation2 + $0x50] sm:$0xff] %v4443_v21  ;;  %v492_v28 = vshll.u32 %v4443_v21, 16  ;;  %v638_v48 = vor.u32 %v636_v34, %v635_v42  ;;  %v656_v62 = vld [vmem:[#allocation2 + $0x10] sm:$0x1]  ;;  %v4531_v34 = vld [vmem:[%s4339_s12 + $0x28] sm:$0xff]  }
  0x22   : > { %v4474_v49 = vor.u32 %v778_v44, %v633_v33  ;;  %v676_v7 = vshll.u32 %v656_v62, 16  ;;  %v803_v24 = vld [vmem:[#allocation2 + $0x30] sm:$0x80]  ;;  %404 = vst [vmem:[#allocation2 + $0x98] sm:$0xff] %v4531_v34  ;;  %v658_v44 = vld [vmem:[#allocation2 + $0x40] sm:$0x1] }
  0x23   : > { %3599 = vmatpush3.bf16.msra.mxu0 %v4144_v27  ;;  %v427_v42 = vld [vmem:[#allocation2 + $0x90] sm:$0x80]  ;;  %v4184_v62 = vld [vmem:[%s5535_s1 + $0x188] sm:$0xff]  }
  0x24   : > { %4119 = vmatpush3.bf16.msra.mxu1 %v4144_v27  ;;  %3808 = vmatprep.subr.bf16.mxu0 %v4147_v36  ;;  %v489_v27 = vshrl.u32 %v4443_v21, 16  ;;  %v4169_v36 = vld [vmem:[%s5535_s1 + $0x150] sm:$0xff]   ;;  %v678_v13 = vrot.slane %v676_v7, 1 }
  0x25   : > { %3696 = vmatprep.subr.bf16.mxu1 %v4146_v35  ;;  %v629_v35 = vshrl.u32 %v445_v31, 16  ;;  %v846_v31 = vshrl.u32 %v803_v24, 16  ;;  %v809_v24 = vld [vmem:[#allocation2 + $0x78] sm:$0x80] }
  0x26   : > { %2179 = vmatmul.mubr.bf16.vlgmr.msra.gmra.mrb[0].mxu0 %v459_v46  ;;  %v4171_v46 = vld [vmem:[%s5535_s1 + $0x110] sm:$0xff]  }
  0x27   : > { %2275 = vmatmul.mubr.bf16.vlgmr.msra.gmra.mrb[0].mxu1 %v603_v47  ;;  %3809 = vmatpush3.bf16.msra.mxu0 %v4149_v39  ;;  %v491_v39 = vrot.slane %v489_v27, 7  ;;  %v631_v45 = vrot.slane %v629_v35, 7  ;;  %v805_v35 = vld [vmem:[#allocation2 + $0x48] sm:$0x80] }
  0x28   : > { %3697 = vmatpush3.bf16.msra.mxu1 %v4148_v38  ;;  %2186 = vmatprep.mubr.bf16.mxu0 %v4367_v29  ;;  %v4164_v38 = vld [vmem:[%s5535_s1 + $0xe8] sm:$0xff]   ;;  %v687_v29 = vrot.slane %v480_v1, 1 }
  0x29   : > { %3698 = vmatprep.subr.bf16.mxu1 %v4150_v50  ;;  %2282 = vmatprep.mubr.bf16.mxu1 %v4153_v32  ;;  %v627_v32 = vsel %vm447_vm0, %v619_v16, %v626_v19  ;;  %v4471_v47 = vor.u32 %v492_v28, %v491_v39  ;;  %v4168_v50 = vld [vmem:[%s5535_s1 + $0xf0] sm:$0xff]   ;;  %v639_v57 = vsel %vm447_vm0, %v631_v45, %v638_v48  ;;  %v680_v16 = vrot.slane %v468_v43, 1 }
  0x2a   : > { %3810 = vmatprep.subr.bf16.mxu0 %v4157_v53  ;;  %v4481_v53 = vld [vmem:[%s4339_s12 + $0x18] sm:$0xff]  }
  0x2b   : > { %3811 = vmatpush3.bf16.msra.mxu0 %v4159_v59  ;;  %v834_v59 = vshrl.u32 %v801_v55, 16  ;;  %402 = vst [vmem:[#allocation2 + $0x68] sm:$0xff] %v4481_v53  ;;  %v504_v3 = vshll.u32 %v4481_v53, 16  ;;  %v4538_v45 = vor.u32 %v680_v16, %v465_v37  ;;  %v4182_v55 = vld [vmem:[%s5535_s1 + $0x1c8] sm:$0xff]  }
  0x2c   : > { %3699 = vmatpush3.bf16.msra.mxu1 %v4151_v51  ;;  %3812 = vmatprep.subr.bf16.mxu0 %v4169_v36  ;;  %v673_v51 = vrot.slane %v4228_v2, 1  ;;  %v4172_v2 = vld [vmem:[%s5535_s1 + $0xf8] sm:$0xff]  }
  0x2d   : > { %3700 = vmatprep.subr.bf16.mxu1 %v4154_v56  ;;  %v495_v56 = vsel %vm447_vm0, %v487_v40, %v4471_v47 }
  0x2e   : > { %2187 = vmatmul.mubr.bf16.gmra.mrb[4].mxu0 %v471_v63  ;;  %v501_v63 = vshrl.u32 %v4481_v53, 16 }
  0x2f   : > { %2283 = vmatmul.mubr.bf16.gmra.mrb[4].mxu1 %v615_v5  ;;  %2194 = vmatprep.mubr.bf16.mxu0 %v4412_v60  ;;  %v4173_v5 = vld [vmem:[%s5535_s1 + $0xb8] sm:$0xff]  }
  0x30   : > { %3701 = vmatpush3.bf16.msra.mxu1 %v4155_v6  ;;  %2290 = vmatprep.mubr.bf16.mxu1 %v4161_v61  ;;  %v423_v61 = vld [vmem:[#allocation2 + $0x60] sm:$0x80]  ;;  %v836_v6 = vrot.slane %v834_v59, 7  ;;  %v503_v8 = vrot.slane %v501_v63, 7 }
  0x31   : > { %3702 = vmatprep.subr.bf16.mxu1 %v4156_v10  ;;  %3813 = vmatpush3.bf16.msra.mxu0 %v4171_v46  ;;  %v497_v4 = vshrl.u32 %v423_v61, 16  ;;  %v4175_v10 = vld [vmem:[%s5535_s1 + $0x1c0] sm:$0xff]  }
  0x32   : > { %v4514_v15 = vor.u32 %v504_v3, %v503_v8  ;;  %3814 = vmatprep.subr.bf16.mxu0 %v4177_v11  ;;  %v659_v11 = vld [vmem:[#allocation2 + $0x58] sm:$0x1] }
  0x33   : > { %v499_v9 = vrot.slane %v497_v4, 7  ;;  %v4572_v4 = vld [vmem:[%s4339_s12 + $0x30] sm:$0xff]  }
  0x34   : > { %3703 = vmatpush3.bf16.msra.mxu1 %v4158_v12  ;;  %v844_v12 = vsel %vm447_vm0, %v836_v6, %v4402_v54  ;;  %v4522_v54 = vld [vmem:[%s4339_s12 + $0x20] sm:$0xff]   ;;  %405 = vst [vmem:[#allocation2 + $0xb0] sm:$0xff] %v4572_v4 }
  0x35   : > { %3704 = vmatprep.subr.bf16.mxu1 %v4162_v18  ;;  %v4176_v18 = vld [vmem:[%s5535_s1 + $0x180] sm:$0xff]   ;;  %v507_v19 = vsel %vm447_vm0, %v499_v9, %v4514_v15  ;;  %3815 = vmatpush3.bf16.msra.mxu0 %v4178_v14  ;;  %403 = vst [vmem:[#allocation2 + $0x80] sm:$0xff] %v4522_v54  ;;  %v513_v43 = vshrl.u32 %v4522_v54, 16  ;;  %v516_v30 = vshll.u32 %v4522_v54, 16  ;;  %v4186_v9 = vld [vmem:[%s5535_s1 + $0x168] sm:$0xff]  }
  0x36   : > { %2195 = vmatmul.mubr.bf16.gmra.mrb[8].mxu0 %v483_v25  ;;  %v425_v25 = vld [vmem:[#allocation2 + $0x78] sm:$0x80]  ;;  %v4187_v14 = vld [vmem:[%s5535_s1 + $0x128] sm:$0xff]  }
  0x37   : > { %2291 = vmatmul.mubr.bf16.gmra.mrb[8].mxu1 %v627_v32  ;;  %2202 = vmatprep.mubr.bf16.mxu0 %v4443_v21  ;;  %v509_v32 = vshrl.u32 %v425_v25, 16  ;;  %v515_v36 = vrot.slane %v513_v43, 7 }
  0x38   : > { %3705 = vmatpush3.bf16.msra.mxu1 %v4163_v26  ;;  %2298 = vmatprep.mubr.bf16.mxu1 %v4167_v23  ;;  %v679_v23 = vsel %vm672_vm1, %v673_v51, %v678_v13  ;;  %v657_v26 = vld [vmem:[#allocation2 + $0x28] sm:$0x1]  ;;  %v4181_v51 = vld [vmem:[%s5535_s1 + $0x160] sm:$0xff]   ;;  %v537_v13 = vshrl.u32 %v4572_v4, 16 }
  0x39   : > { %3706 = vmatprep.subr.bf16.mxu1 %v4164_v38  ;;  %v683_v33 = vshll.u32 %v657_v26, 16  ;;  %v848_v38 = vrot.slane %v846_v31, 7  ;;  %v511_v39 = vrot.slane %v509_v32, 7  ;;  %v4542_v46 = vor.u32 %v516_v30, %v515_v36  ;;  %3816 = vmatprep.subr.bf16.mxu0 %v4181_v51 }
  0x3a   : > { %v539_v31 = vrot.slane %v537_v13, 7  ;;  %v540_v32 = vshll.u32 %v4572_v4, 16 }
  0x3b   : > { %v685_v40 = vrot.slane %v683_v33, 1  ;;  %v856_v48 = vsel %vm447_vm0, %v848_v38, %v4434_v17  ;;  %v528_v17 = vshll.u32 %v4531_v34, 16  ;;  %v519_v1 = vsel %vm447_vm0, %v511_v39, %v4542_v46  ;;  %v4190_v39 = vld [vmem:[%s5535_s1 + $0x190] sm:$0xff]  }
  0x3c   : > { %3707 = vmatpush3.bf16.msra.mxu1 %v4165_v41  ;;  %v858_v41 = vshrl.u32 %v805_v35, 16  ;;  %v4189_v35 = vld [vmem:[%s5535_s1 + $0x1d0] sm:$0xff]  }
  0x3d   : > { %3708 = vmatprep.subr.bf16.mxu1 %v4168_v50  ;;  %v525_v50 = vshrl.u32 %v4531_v34, 16  ;;  %v686_v59 = vsel %vm672_vm1, %v4538_v45, %v685_v40 }
  0x3e   : > { %2203 = vmatmul.mubr.bf16.gmra.mrb[12].mxu0 %v495_v56  ;;  %v860_v37 = vrot.slane %v858_v41, 7  ;;  %v521_v56 = vshrl.u32 %v427_v42, 16  ;;  %v431_v42 = vld [vmem:[#allocation2 + $0xc0] sm:$0x80] }
  0x3f   : > { %2299 = vmatmul.mubr.bf16.gmra.mrb[12].mxu1 %v639_v57  ;;  %2210 = vmatprep.mubr.bf16.mxu0 %v4481_v53  ;;  %v690_v57 = vshll.u32 %v658_v44, 16  ;;  %v527_v61 = vrot.slane %v525_v50, 7  ;;  %v660_v44 = vld [vmem:[#allocation2 + $0x70] sm:$0x1] }
  0x40   : > { %3709 = vmatpush3.bf16.msra.mxu1 %v4170_v58  ;;  %2339 = vmatprep.mubr.bf16.mxu1 %v844_v12  ;;  %v4183_v58 = vld [vmem:[%s5535_s1 + $0x120] sm:$0xff]   ;;  %v523_v6 = vrot.slane %v521_v56, 7  ;;  %v704_v56 = vshll.u32 %v660_v44, 16 }
  0x41   : > { %3710 = vmatprep.subr.bf16.mxu1 %v4172_v2  ;;  %v868_v2 = vsel %vm447_vm0, %v860_v37, %v4471_v47  ;;  %3817 = vmatpush3.bf16.msra.mxu0 %v4183_v58  ;;  %v692_v7 = vrot.slane %v690_v57, 1  ;;  %v4580_v47 = vor.u32 %v687_v29, %v477_v0  ;;  %v4584_v12 = vor.u32 %v528_v17, %v527_v61  ;;  %v811_v29 = vld [vmem:[#allocation2 + $0x90] sm:$0x80]  ;;  %v662_v44 = vld [vmem:[#allocation2 + $0xa0] sm:$0x1] }
  0x42   : > { %3818 = vmatprep.subr.bf16.mxu0 %v4186_v9  ;;  %v694_v0 = vrot.slane %v492_v28, 1  ;;  %v882_v28 = vshrl.u32 %v809_v24, 16  ;;  %v4192_v37 = vld [vmem:[%s5535_s1 + $0x170] sm:$0xff]   ;;  %v706_v9 = vrot.slane %v704_v56, 1  ;;  %v718_v56 = vshll.u32 %v662_v44, 16 }
  0x43   : > { %v531_v25 = vsel %vm447_vm0, %v523_v6, %v4584_v12  ;;  %v693_v26 = vsel %vm672_vm1, %v4580_v47, %v692_v7  ;;  %v433_v6 = vld [vmem:[#allocation2 + $0xd8] sm:$0x80] }
  0x44   : > { %3711 = vmatpush3.bf16.msra.mxu1 %v4173_v5  ;;  %v807_v5 = vld [vmem:[#allocation2 + $0x60] sm:$0x80]  ;;  %v4614_v40 = vor.u32 %v694_v0, %v489_v27  ;;  %v884_v51 = vrot.slane %v882_v28, 7  ;;  %v701_v27 = vrot.slane %v504_v3, 1  ;;  %v4195_v7 = vld [vmem:[%s5535_s1 + $0x1d8] sm:$0xff]   ;;  %v4679_v28 = vld [vmem:[%s4339_s12 + $0x50] sm:$0xff]  }
  0x45   : > { %3920 = vmatprep.subr.bf16.mxu1 %v4175_v10  ;;  %v870_v8 = vshrl.u32 %v807_v5, 16  ;;  %v429_v10 = vld [vmem:[#allocation2 + $0xa8] sm:$0x80]  ;;  %3819 = vmatpush3.bf16.msra.mxu0 %v4187_v14  ;;  %v708_v5 = vrot.slane %v516_v30, 1  ;;  %v4196_v14 = vld [vmem:[%s5535_s1 + $0x198] sm:$0xff]   ;;  %409 = vst [vmem:[#allocation2 + $0x110] sm:$0xff] %v4679_v28 }
  0x46   : > { %2211 = vmatmul.mubr.bf16.gmra.mrb[16].mxu0 %v507_v19  ;;  %v4592_v19 = vld [vmem:[%s4339_s12 + $0x38] sm:$0xff]   ;;  %3820 = vmatprep.subr.bf16.mxu0 %v4192_v37  ;;  %v892_v61 = vsel %vm447_vm0, %v884_v51, %v4542_v46  ;;  %v4654_v46 = vor.u32 %v701_v27, %v501_v63  ;;  %v813_v0 = vld [vmem:[#allocation2 + $0xa8] sm:$0x80]  ;;  %v715_v51 = vrot.slane %v528_v17, 1 }
  0x47   : > { %2340 = vmatmul.mubr.bf16.vlgmr.msra.gmra.mrb[16].mxu1 %v679_v23  ;;  %2218 = vmatprep.mubr.bf16.mxu0 %v4522_v54  ;;  %v872_v16 = vrot.slane %v870_v8, 7  ;;  %v697_v23 = vshll.u32 %v659_v11, 16  ;;  %406 = vst [vmem:[#allocation2 + $0xc8] sm:$0xff] %v4592_v19  ;;  %v549_v41 = vshrl.u32 %v4592_v19, 16  ;;  %v552_v3 = vshll.u32 %v4592_v19, 16 }
  0x48   : > { %3921 = vmatpush3.bf16.msra.mxu1 %v4176_v18  ;;  %2347 = vmatprep.mubr.bf16.mxu1 %v856_v48  ;;  %v533_v18 = vshrl.u32 %v429_v10, 16  ;;  %v4623_v48 = vld [vmem:[%s4339_s12 + $0x40] sm:$0xff]   ;;  %v661_v10 = vld [vmem:[#allocation2 + $0x88] sm:$0x1] }
  0x49   : > { %3922 = vmatprep.subr.bf16.mxu1 %v4182_v55  ;;  %v880_v33 = vsel %vm447_vm0, %v872_v16, %v4514_v15  ;;  %v699_v38 = vrot.slane %v697_v23, 1  ;;  %v4618_v15 = vor.u32 %v540_v32, %v539_v31  ;;  %407 = vst [vmem:[#allocation2 + $0xe0] sm:$0xff] %v4623_v48  ;;  %v545_v55 = vshrl.u32 %v431_v42, 16  ;;  %v4197_v23 = vld [vmem:[%s5535_s1 + $0x178] sm:$0xff]  }
  0x4a   : > { %v535_v36 = vrot.slane %v533_v18, 7  ;;  %v561_v11 = vshrl.u32 %v4623_v48, 16  ;;  %v557_v18 = vshrl.u32 %v433_v6, 16  ;;  %v564_v63 = vshll.u32 %v4623_v48, 16 }
  0x4b   : > { %v700_v58 = vsel %vm672_vm1, %v4614_v40, %v699_v38  ;;  %v547_v8 = vrot.slane %v545_v55, 7  ;;  %v711_v24 = vshll.u32 %v661_v10, 16  ;;  %v707_v31 = vsel %vm672_vm1, %v4654_v46, %v706_v9  ;;  %v435_v38 = vld [vmem:[#allocation2 + $0xf0] sm:$0x80]  ;;  %v815_v55 = vld [vmem:[#allocation2 + $0xc0] sm:$0x80] }
  0x4c   : > { %3923 = vmatpush3.bf16.msra.mxu1 %v4184_v62  ;;  %v543_v57 = vsel %vm447_vm0, %v535_v36, %v4618_v15  ;;  %v894_v62 = vshrl.u32 %v811_v29, 16  ;;  %v906_v36 = vshrl.u32 %v813_v0, 16  ;;  %v559_v27 = vrot.slane %v557_v18, 7  ;;  %v437_v9 = vld [vmem:[#allocation2 + $0x108] sm:$0x80] }
  0x4d   : > { %3924 = vmatprep.subr.bf16.mxu1 %v4189_v35  ;;  %v713_v29 = vrot.slane %v711_v24, 1  ;;  %v918_v6 = vshrl.u32 %v815_v55, 16  ;;  %v4719_v10 = vor.u32 %v715_v51, %v525_v50  ;;  %v817_v18 = vld [vmem:[#allocation2 + $0xd8] sm:$0x80]  ;;  %v1041_v0 = vld [vmem:[#allocation2 + $0x28] sm:$0x1] }
  0x4e   : > { %2219 = vmatmul.mubr.bf16.gmra.mrb[20].mxu0 %v519_v1  ;;  %v551_v1 = vrot.slane %v549_v41, 7  ;;  %v896_v16 = vrot.slane %v894_v62, 7  ;;  %v908_v37 = vrot.slane %v906_v36, 7  ;;  %v722_v24 = vrot.slane %v540_v32, 1 }
  0x4f   : > { %2348 = vmatmul.mubr.bf16.gmra.mrb[20].mxu1 %v686_v59  ;;  %2226 = vmatprep.mubr.bf16.mxu0 %v4531_v34  ;;  %v4193_v59 = vld [vmem:[%s5535_s1 + $0x130] sm:$0xff]   ;;  %v920_v50 = vrot.slane %v918_v6, 7  ;;  %v930_v44 = vshrl.u32 %v817_v18, 16  ;;  %v1060_v32 = vshll.u32 %v1041_v0, 16  ;;  %v665_v0 = vld [vmem:[#allocation2 + $0xe8] sm:$0x1] }
  0x50   : > { %2355 = vmatprep.mubr.bf16.mxu1 %v868_v2  ;;  %3925 = vmatpush3.bf16.msra.mxu1 %v4190_v39  ;;  %v4644_v2 = vld [vmem:[%s4339_s12 + $0x48] sm:$0xff]   ;;  %v4658_v30 = vor.u32 %v552_v3, %v551_v1  ;;  %v904_v35 = vsel %vm447_vm0, %v896_v16, %v4584_v12  ;;  %v4686_v39 = vor.u32 %v708_v5, %v513_v43  ;;  %v569_v43 = vshrl.u32 %v435_v38, 16  ;;  %v4705_v1 = vld [vmem:[%s5535_s1 + $0x200] sm:$0xff]   ;;  %v663_v16 = vld [vmem:[#allocation2 + $0xb8] sm:$0x1] }
  0x51   : > { %3821 = vmatpush3.bf16.msra.mxu0 %v4193_v59  ;;  %408 = vst [vmem:[#allocation2 + $0xf8] sm:$0xff] %v4644_v2  ;;  %3926 = vmatprep.subr.bf16.mxu1 %v4195_v7  ;;  %v573_v42 = vshrl.u32 %v4644_v2, 16  ;;  %v4202_v59 = vld [vmem:[%s5535_s1 + $0x1a0] sm:$0xff]   ;;  %v916_v5 = vsel %vm447_vm0, %v908_v37, %v4618_v15  ;;  %v585_v15 = vshrl.u32 %v4679_v28, 16  ;;  %v725_v38 = vshll.u32 %v663_v16, 16  ;;  %v4209_v16 = vld [vmem:[%s5535_s1 + $0x1f8] sm:$0xff]  }
  0x52   : > { %3822 = vmatprep.subr.bf16.mxu0 %v4197_v23  ;;  %v714_v62 = vsel %vm672_vm1, %v4686_v39, %v713_v29  ;;  %v571_v7 = vrot.slane %v569_v43, 7  ;;  %v4203_v23 = vld [vmem:[%s5535_s1 + $0x1e8] sm:$0xff]   ;;  %v928_v51 = vsel %vm447_vm0, %v920_v50, %v4658_v30  ;;  %v664_v37 = vld [vmem:[#allocation2 + $0xd0] sm:$0x1] }
  0x53   : > { %v575_v17 = vrot.slane %v573_v42, 7  ;;  %v587_v36 = vrot.slane %v585_v15, 7  ;;  %v727_v55 = vrot.slane %v725_v38, 1 }
  0x54   : > { %3927 = vmatpush3.bf16.msra.mxu1 %v4196_v14 }
  0x56   : > { %2227 = vmatmul.mubr.bf16.gmra.mrb[24].mxu0 %v531_v25  ;;  %v4198_v25 = vld [vmem:[%s5535_s1 + $0x138] sm:$0xff]  }
  0x57   : > { %2356 = vmatmul.mubr.bf16.gmra.mrb[24].mxu1 %v693_v26  ;;  %2234 = vmatprep.mubr.bf16.mxu0 %v4572_v4  ;;  %v555_v26 = vsel %vm447_vm0, %v547_v8, %v4658_v30  ;;  %v720_v8 = vrot.slane %v718_v56, 1  ;;  %v932_v56 = vrot.slane %v930_v44, 7  ;;  %v4206_v30 = vld [vmem:[%s5535_s1 + $0x1f0] sm:$0xff]  }
  0x58   : > { %2363 = vmatprep.mubr.bf16.mxu1 %v880_v33  ;;  %v563_v33 = vrot.slane %v561_v11, 7  ;;  %3823 = vmatpush3.bf16.msra.mxu0 %v4198_v25  ;;  %v4205_v25 = vld [vmem:[%s5535_s1 + $0x1a8] sm:$0xff]  }
  0x59   : > { %4056 = vmatprep.subr.bf16.mxu0 %v4705_v1 }
  0x5a   : > { %v4693_v12 = vor.u32 %v564_v63, %v563_v33  ;;  %v588_v33 = vshll.u32 %v4679_v28, 16 }
  0x5c   : > { %v4750_v43 = vor.u32 %v588_v33, %v587_v36 }
  0x5e   : > { %2235 = vmatmul.mubr.bf16.gmra.mrb[28].mxu0 %v543_v57  ;;  %v4200_v57 = vld [vmem:[%s5535_s1 + $0x1e0] sm:$0xff]  }
  0x5f   : > { %2364 = vmatmul.mubr.bf16.gmra.mrb[28].mxu1 %v700_v58  ;;  %2242 = vmatprep.mubr.bf16.mxu0 %v4592_v19  ;;  %v576_v58 = vshll.u32 %v4644_v2, 16 }
  0x60   : > { %2371 = vmatprep.mubr.bf16.mxu1 %v892_v61  ;;  %v567_v61 = vsel %vm447_vm0, %v559_v27, %v4693_v12  ;;  %3928 = vmatprep.subr.bf16.mxu1 %v4200_v57  ;;  %v4746_v27 = vor.u32 %v722_v24, %v537_v13  ;;  %v1062_v57 = vrot.slane %v1060_v32, 1  ;;  %v819_v13 = vld [vmem:[#allocation2 + $0xf0] sm:$0x80]  ;;  %v4204_v32 = vld [vmem:[%s5535_s1 + $0x208] sm:$0xff]  }
  0x61   : > { %3929 = vmatpush3.bf16.msra.mxu1 %v4202_v59  ;;  %v4723_v14 = vor.u32 %v576_v58, %v575_v17  ;;  %v4208_v17 = vld [vmem:[%s5535_s1 + $0x1b0] sm:$0xff]   ;;  %v732_v59 = vshll.u32 %v664_v37, 16  ;;  %v666_v37 = vld [vmem:[#allocation2 + $0x100] sm:$0x1] }
  0x62   : > { %3930 = vmatprep.subr.bf16.mxu1 %v4203_v23  ;;  %v728_v6 = vsel %vm672_vm1, %v4746_v27, %v727_v55  ;;  %v821_v23 = vld [vmem:[#allocation2 + $0x108] sm:$0x80] }
  0x63   : > { %v734_v18 = vrot.slane %v732_v59, 1  ;;  %v954_v36 = vshrl.u32 %v821_v23, 16  ;;  %v746_v59 = vshll.u32 %v666_v37, 16  ;;  %v668_v37 = vld [vmem:[#allocation2 + $0x130] sm:$0x1] }
  0x65   : > { %3931 = vmatpush3.bf16.msra.mxu1 %v4205_v25  ;;  %v4211_v25 = vld [vmem:[%s5535_s1 + $0x1b8] sm:$0xff]  }
  0x66   : > { %2243 = vmatmul.mubr.bf16.gmra.mrb[32].mxu0 %v555_v26  ;;  %v579_v26 = vsel %vm447_vm0, %v571_v7, %v4723_v14  ;;  %3932 = vmatprep.subr.bf16.mxu1 %v4206_v30  ;;  %v940_v7 = vsel %vm447_vm0, %v932_v56, %v4693_v12  ;;  %v1043_v12 = vld [vmem:[#allocation2 + $0x58] sm:$0x1]  ;;  %v956_v56 = vrot.slane %v954_v36, 7  ;;  %v4207_v30 = vld [vmem:[%s5535_s1 + $0x210] sm:$0xff]  }
  0x67   : > { %2372 = vmatmul.mubr.bf16.gmra.mrb[32].mxu1 %v707_v31  ;;  %2250 = vmatprep.mubr.bf16.mxu0 %v4623_v48  ;;  %v721_v31 = vsel %vm672_vm1, %v4719_v10, %v720_v8  ;;  %v1063_v8 = vsel %vm672_vm1, %v4538_v45, %v1062_v57  ;;  %v1074_v38 = vshll.u32 %v1043_v12, 16 }
  0x68   : > { %2379 = vmatprep.mubr.bf16.mxu1 %v904_v35  ;;  %v581_v35 = vshrl.u32 %v437_v9, 16  ;;  %v942_v9 = vshrl.u32 %v819_v13, 16  ;;  %v823_v13 = vld [vmem:[#allocation2 + $0x120] sm:$0x80] }
  0x69   : > { %3933 = vmatpush3.bf16.msra.mxu1 %v4208_v17  ;;  %v1076_v57 = vrot.slane %v1074_v38, 1  ;;  %v1044_v17 = vld [vmem:[#allocation2 + $0x70] sm:$0x1] }
  0x6a   : > { %v583_v29 = vrot.slane %v581_v35, 7  ;;  %v944_v45 = vrot.slane %v942_v9, 7  ;;  %3934 = vmatprep.subr.bf16.mxu1 %v4209_v16  ;;  %v4816_v9 = vld [vmem:[#allocation2 + $0x140] sm:$0xff] }
  0x6b   : > { %v982_v12 = vshrl.u32 %v4816_v9, 16 }
  0x6c   : > { %v952_v44 = vsel %vm447_vm0, %v944_v45, %v4723_v14  ;;  %v1045_v45 = vld [vmem:[#allocation2 + $0x88] sm:$0x1] }
  0x6d   : > { %3935 = vmatpush3.bf16.msra.mxu1 %v4211_v25  ;;  %v984_v38 = vrot.slane %v982_v12, 7 }
  0x6e   : > { %2251 = vmatmul.mubr.bf16.gmra.mrb[36].mxu0 %v567_v61  ;;  %v1042_v61 = vld [vmem:[#allocation2 + $0x40] sm:$0x1] }
  0x6f   : > { %2380 = vmatmul.mubr.bf16.gmra.mrb[36].mxu1 %v714_v62  ;;  %2258 = vmatprep.mubr.bf16.mxu0 %v4644_v2  ;;  %v729_v62 = vrot.slane %v552_v3, 1  ;;  %v1067_v3 = vshll.u32 %v1042_v61, 16  ;;  %v964_v61 = vsel %vm447_vm0, %v956_v56, %v4750_v43 }
  0x70   : > { %2387 = vmatprep.mubr.bf16.mxu1 %v916_v5  ;;  %v591_v5 = vsel %vm447_vm0, %v583_v29, %v4750_v43  ;;  %v4217_v29 = vld [vmem:[#allocation2 + $0x20] sm:$0xff]  ;;  %v748_v43 = vrot.slane %v746_v59, 1 }
  0x71   : > { %v4774_v50 = vor.u32 %v729_v62, %v549_v41  ;;  %v1069_v24 = vrot.slane %v1067_v3, 1  ;;  %v739_v41 = vshll.u32 %v665_v0, 16  ;;  %v1077_v62 = vsel %vm672_vm1, %v4614_v40, %v1076_v57  ;;  %v667_v40 = vld [vmem:[#allocation2 + $0x118] sm:$0x1]  ;;  %v825_v3 = vld [vmem:[#allocation2 + $0x138] sm:$0x80] }
  0x72   : > { %v753_v25 = vshll.u32 %v667_v40, 16  ;;  %v827_v57 = vld [vmem:[#allocation2 + $0x150] sm:$0x80] }
  0x73   : > { %v735_v35 = vsel %vm672_vm1, %v4774_v50, %v734_v18  ;;  %v741_v14 = vrot.slane %v739_v41, 1 }
  0x76   : > { %2259 = vmatmul.mubr.bf16.gmra.mrb[40].mxu0 %v579_v26  ;;  %v736_v26 = vrot.slane %v564_v63, 1  ;;  %v1070_v63 = vsel %vm672_vm1, %v4580_v47, %v1069_v24 }
  0x77   : > { %2388 = vmatmul.mubr.bf16.gmra.mrb[40].mxu1 %v721_v31  ;;  %2266 = vmatprep.mubr.bf16.mxu0 %v4679_v28  ;;  %v4782_v31 = vld [vmem:[%s4339_s12 + $0x78] sm:$0xff]  }
  0x78   : > { %2395 = vmatprep.mubr.bf16.mxu1 %v928_v51  ;;  %414 = vst [vmem:[#allocation2 + $0x188] sm:$0xff] %v4782_v31  ;;  %v4794_v51 = vld [vmem:[#allocation2 + $0x128] sm:$0xff]  ;;  %v4798_v55 = vor.u32 %v736_v26, %v561_v11  ;;  %v743_v11 = vrot.slane %v576_v58, 1  ;;  %v4210_v58 = vld [vmem:[%s5535_s1 + $0x218] sm:$0xff]   ;;  %v978_v26 = vshrl.u32 %v825_v3, 16 }
  0x79   : > { %v970_v47 = vshrl.u32 %v4794_v51, 16 }
  0x7a   : > { %v4824_v16 = vor.u32 %v743_v11, %v573_v42  ;;  %v750_v42 = vrot.slane %v588_v33, 1  ;;  %v4214_v33 = vld [vmem:[%s5535_s1 + $0x228] sm:$0xff]   ;;  %v990_v11 = vshrl.u32 %v827_v57, 16 }
  0x7c   : > { %v749_v24 = vsel %vm672_vm1, %v4824_v16, %v748_v43  ;;  %v992_v40 = vrot.slane %v990_v11, 7 }
  0x7e   : > { %2267 = vmatmul.mubr.bf16.gmra.mrb[44].mxu0 %v591_v5  ;;  %v966_v5 = vshrl.u32 %v823_v13, 16  ;;  %v1046_v13 = vld [vmem:[#allocation2 + $0xa0] sm:$0x1] }
  0x7f   : > { %2396 = vmatmul.mubr.bf16.gmra.mrb[44].mxu1 %v728_v6  ;;  %2500 = vmatprep.mubr.bf16.mxu0 %v1063_v8  ;;  %v972_v6 = vrot.slane %v970_v47, 7  ;;  %v1081_v8 = vshll.u32 %v1044_v17, 16 }
  0x80   : > { %2403 = vmatprep.mubr.bf16.mxu1 %v940_v7  ;;  %v973_v7 = vshll.u32 %v4794_v51, 16  ;;  %v968_v18 = vrot.slane %v966_v5, 7  ;;  %v1095_v5 = vshll.u32 %v1046_v13, 16 }
  0x81   : > { %v1083_v23 = vrot.slane %v1081_v8, 1  ;;  %v4216_v8 = vld [vmem:[%s5535_s1 + $0x238] sm:$0xff]  }
  0x82   : > { %v4828_v0 = vor.u32 %v973_v7, %v972_v6  ;;  %v4872_v6 = vld [vmem:[#allocation2 + $0x170] sm:$0xff] }
  0x83   : > { %v1084_v36 = vsel %vm672_vm1, %v4654_v46, %v1083_v23  ;;  %v755_v46 = vrot.slane %v753_v25, 1  ;;  %v1006_v43 = vshrl.u32 %v4872_v6, 16  ;;  %v829_v23 = vld [vmem:[#allocation2 + $0x168] sm:$0x80]  ;;  %v1009_v25 = vshll.u32 %v4872_v6, 16 }
  0x84   : > { %v976_v41 = vsel %vm447_vm0, %v968_v18, %v4828_v0  ;;  %v1097_v18 = vrot.slane %v1095_v5, 1  ;;  %v1049_v5 = vld [vmem:[#allocation2 + $0xe8] sm:$0x1] }
  0x86   : > { %2501 = vmatmul.mubr.bf16.vlgmr.msra.gmra.mrb[48].mxu0 %v4217_v29 }
  0x87   : > { %2404 = vmatmul.mubr.bf16.gmra.mrb[48].mxu1 %v735_v35  ;;  %4057 = vmatpush3.bf16.msra.mxu0 %v4705_v1  ;;  %v742_v1 = vsel %vm672_vm1, %v4798_v55, %v741_v14  ;;  %v1088_v35 = vshll.u32 %v1045_v45, 16  ;;  %v980_v14 = vrot.slane %v978_v26, 7  ;;  %v1047_v45 = vld [vmem:[#allocation2 + $0xb8] sm:$0x1] }
  0x88   : > { %2411 = vmatprep.mubr.bf16.mxu1 %v952_v44  ;;  %2508 = vmatprep.mubr.bf16.mxu0 %v1070_v63  ;;  %v985_v44 = vshll.u32 %v4816_v9, 16  ;;  %v4853_v63 = vor.u32 %v750_v42, %v585_v15  ;;  %v760_v15 = vshll.u32 %v668_v37, 16  ;;  %v1002_v42 = vshrl.u32 %v829_v23, 16  ;;  %v831_v37 = vld [vmem:[#allocation2 + $0x180] sm:$0x80] }
  0x89   : > { %4058 = vmatprep.subr.bf16.mxu0 %v4204_v32  ;;  %v1090_v29 = vrot.slane %v1088_v35, 1  ;;  %v1102_v26 = vshll.u32 %v1047_v45, 16 }
  0x8a   : > { %v4857_v56 = vor.u32 %v985_v44, %v984_v38  ;;  %v756_v17 = vsel %vm672_vm1, %v4853_v63, %v755_v46  ;;  %v670_v46 = vld [vmem:[#allocation2 + $0x160] sm:$0x1] }
  0x8b   : > { %4059 = vmatpush3.bf16.msra.mxu0 %v4204_v32  ;;  %v4845_v32 = vld [vmem:[#allocation2 + $0x158] sm:$0xff]  ;;  %v1091_v59 = vsel %vm672_vm1, %v4686_v39, %v1090_v29  ;;  %v762_v39 = vrot.slane %v760_v15, 1  ;;  %v1018_v29 = vshrl.u32 %v4782_v31, 16  ;;  %v774_v13 = vshll.u32 %v670_v46, 16  ;;  %v1188_v46 = vld [vmem:[#allocation2 + $0x48] sm:$0x80] }
  0x8c   : > { %4060 = vmatprep.subr.bf16.mxu0 %v4207_v30 }
  0x8d   : > { %v1020_v15 = vrot.slane %v1018_v29, 7 }
  0x8e   : > { %2509 = vmatmul.mubr.bf16.gmra.mrb[52].mxu0 %v4412_v60  ;;  %v4213_v60 = vld [vmem:[%s5535_s1 + $0x220] sm:$0xff]  }
  0x8f   : > { %2412 = vmatmul.mubr.bf16.gmra.mrb[52].mxu1 %v742_v1  ;;  %2516 = vmatprep.mubr.bf16.mxu0 %v1077_v62  ;;  %v988_v1 = vsel %vm447_vm0, %v980_v14, %v4857_v56  ;;  %v997_v62 = vshll.u32 %v4845_v32, 16  ;;  %v1048_v14 = vld [vmem:[#allocation2 + $0xd0] sm:$0x1] }
  0x90   : > { %2419 = vmatprep.mubr.bf16.mxu1 %v964_v61  ;;  %4061 = vmatpush3.bf16.msra.mxu0 %v4207_v30  ;;  %v994_v30 = vshrl.u32 %v4845_v32, 16 }
  0x91   : > { %4062 = vmatprep.subr.bf16.mxu0 %v4210_v58 }
  0x92   : > { %v996_v61 = vrot.slane %v994_v30, 7 }
  0x94   : > { %4063 = vmatpush3.bf16.msra.mxu0 %v4210_v58  ;;  %v669_v58 = vld [vmem:[#allocation2 + $0x148] sm:$0x1]  ;;  %v4881_v3 = vor.u32 %v997_v62, %v996_v61  ;;  %v671_v61 = vld [vmem:[#allocation2 + $0x178] sm:$0x1] }
  0x95   : > { %4064 = vmatprep.subr.bf16.mxu0 %v4213_v60 }
  0x96   : > { %2517 = vmatmul.mubr.bf16.gmra.mrb[56].mxu0 %v4443_v21  ;;  %v4215_v21 = vld [vmem:[%s5535_s1 + $0x230] sm:$0xff]   ;;  %v1000_v35 = vsel %vm447_vm0, %v992_v40, %v4881_v3  ;;  %v1116_v40 = vshll.u32 %v1049_v5, 16 }
  0x97   : > { %2420 = vmatmul.mubr.bf16.gmra.mrb[56].mxu1 %v749_v24  ;;  %2524 = vmatprep.mubr.bf16.mxu0 %v1084_v36  ;;  %v1008_v24 = vrot.slane %v1006_v43, 7  ;;  %v1004_v36 = vrot.slane %v1002_v42, 7 }
  0x98   : > { %2427 = vmatprep.mubr.bf16.mxu1 %v976_v41  ;;  %4065 = vmatpush3.bf16.msra.mxu0 %v4213_v60  ;;  %v763_v60 = vsel %vm672_vm1, %v4358_v22, %v762_v39  ;;  %v1098_v41 = vsel %vm672_vm1, %v4719_v10, %v1097_v18  ;;  %v781_v39 = vshll.u32 %v671_v61, 16  ;;  %v4918_v18 = vld [vmem:[#allocation2 + $0x38] sm:$0xff] }
  0x99   : > { %4066 = vmatprep.subr.bf16.mxu0 %v4214_v33  ;;  %v4895_v38 = vor.u32 %v1009_v25, %v1008_v24  ;;  %v1223_v45 = vshrl.u32 %v4918_v18, 16  ;;  %v1226_v24 = vshll.u32 %v4918_v18, 16 }
  0x9a   : > { %v783_v23 = vrot.slane %v781_v39, 1  ;;  %v1134_v39 = vrot.slane %v973_v7, 1 }
  0x9c   : > { %4067 = vmatpush3.bf16.msra.mxu0 %v4214_v33  ;;  %v1104_v33 = vrot.slane %v1102_v26, 1  ;;  %v784_v42 = vsel %vm672_vm1, %v4474_v49, %v783_v23 }
  0x9d   : > { %4068 = vmatprep.subr.bf16.mxu0 %v4215_v21 }
  0x9e   : > { %2525 = vmatmul.mubr.bf16.gmra.mrb[60].mxu0 %v4481_v53  ;;  %v767_v53 = vshll.u32 %v669_v58, 16  ;;  %v1105_v57 = vsel %vm672_vm1, %v4746_v27, %v1104_v33 }
  0x9f   : > { %2428 = vmatmul.mubr.bf16.gmra.mrb[60].mxu1 %v756_v17  ;;  %2532 = vmatprep.mubr.bf16.mxu0 %v1091_v59  ;;  %v1021_v17 = vshll.u32 %v4782_v31, 16  ;;  %v1109_v59 = vshll.u32 %v1048_v14, 16 }
  0xa0   : > { %2435 = vmatprep.mubr.bf16.mxu1 %v988_v1  ;;  %4069 = vmatpush3.bf16.msra.mxu0 %v4215_v21  ;;  %v769_v22 = vrot.slane %v767_v53, 1  ;;  %v1014_v21 = vshrl.u32 %v831_v37, 16  ;;  %v1050_v53 = vld [vmem:[#allocation2 + $0x100] sm:$0x1]  ;;  %v1051_v37 = vld [vmem:[#allocation2 + $0x118] sm:$0x1] }
  0xa1   : > { %4070 = vmatprep.subr.bf16.mxu0 %v4216_v8  ;;  %v4910_v1 = vor.u32 %v1021_v17, %v1020_v15  ;;  %v1111_v27 = vrot.slane %v1109_v59, 1 }
  0xa2   : > { %v770_v10 = vsel %vm672_vm1, %v4395_v52, %v769_v22  ;;  %v776_v52 = vrot.slane %v774_v13, 1  ;;  %v1016_v11 = vrot.slane %v1014_v21, 7  ;;  %v4942_v13 = vld [vmem:[#allocation2 + $0x68] sm:$0xff] }
  0xa3   : > { %v1247_v59 = vshrl.u32 %v4942_v13, 16 }
  0xa4   : > { %4071 = vmatpush3.bf16.msra.mxu0 %v4216_v8  ;;  %v777_v8 = vsel %vm672_vm1, %v4440_v20, %v776_v52  ;;  %v1024_v58 = vsel %vm447_vm0, %v1016_v11, %v4910_v1  ;;  %v1186_v20 = vld [vmem:[#allocation2 + $0x30] sm:$0x80]  ;;  %v1190_v11 = vld [vmem:[#allocation2 + $0x60] sm:$0x80] }
  0xa5   : > { %v1219_v26 = vshrl.u32 %v1186_v20, 16  ;;  %v1249_v61 = vrot.slane %v1247_v59, 7  ;;  %v1243_v5 = vshrl.u32 %v1190_v11, 16  ;;  %v1192_v20 = vld [vmem:[#allocation2 + $0x78] sm:$0x80] }
  0xa6   : > { %2533 = vmatmul.mubr.bf16.gmra.mrb[64].mxu0 %v4522_v54  ;;  %v1012_v54 = vsel %vm447_vm0, %v1004_v36, %v4895_v38 }
  0xa7   : > { %2436 = vmatmul.mubr.bf16.gmra.mrb[64].mxu1 %v763_v60  ;;  %2540 = vmatprep.mubr.bf16.mxu0 %v1098_v41  ;;  %v1118_v60 = vrot.slane %v1116_v40, 1  ;;  %v4929_v41 = vld [vmem:[#allocation2 + $0x50] sm:$0xff]  ;;  %v1221_v49 = vrot.slane %v1219_v26, 7  ;;  %v1245_v23 = vrot.slane %v1243_v5, 7  ;;  %v1255_v26 = vshrl.u32 %v1192_v20, 16 }
  0xa8   : > { %2443 = vmatprep.mubr.bf16.mxu1 %v1000_v35  ;;  %v1123_v35 = vshll.u32 %v1050_v53, 16  ;;  %v1235_v36 = vshrl.u32 %v4929_v41, 16  ;;  %v1053_v53 = vld [vmem:[#allocation2 + $0x148] sm:$0x1]  ;;  %v1196_v5 = vld [vmem:[#allocation2 + $0xa8] sm:$0x80] }
  0xa9   : > { %v1155_v20 = vrot.slane %v1009_v25, 1 }
  0xaa   : > { %v1125_v33 = vrot.slane %v1123_v35, 1  ;;  %v1237_v14 = vrot.slane %v1235_v36, 7  ;;  %v1141_v35 = vrot.slane %v985_v44, 1 }
  0xae   : > { %2541 = vmatmul.mubr.bf16.gmra.mrb[68].mxu0 %v4531_v34  ;;  %v1112_v34 = vsel %vm672_vm1, %v4774_v50, %v1111_v27  ;;  %v1225_v50 = vrot.slane %v1223_v45, 7  ;;  %v1052_v27 = vld [vmem:[#allocation2 + $0x130] sm:$0x1] }
  0xaf   : > { %2444 = vmatmul.mubr.bf16.gmra.mrb[68].mxu1 %v770_v10  ;;  %2548 = vmatprep.mubr.bf16.mxu0 %v1105_v57  ;;  %v1238_v10 = vshll.u32 %v4929_v41, 16  ;;  %v1130_v57 = vshll.u32 %v1051_v37, 16  ;;  %v4985_v37 = vor.u32 %v1141_v35, %v982_v12  ;;  %v4995_v12 = vld [vmem:[#allocation2 + $0xb0] sm:$0xff]  ;;  %v1198_v35 = vld [vmem:[#allocation2 + $0xc0] sm:$0x80] }
  0xb0   : > { %2451 = vmatprep.mubr.bf16.mxu1 %v1012_v54  ;;  %v1228_v22 = vor.u32 %v1226_v24, %v1225_v50  ;;  %v1126_v54 = vsel %vm672_vm1, %v4824_v16, %v1125_v33  ;;  %v1257_v33 = vrot.slane %v1255_v26, 7 }
  0xb1   : > { %v1240_v21 = vor.u32 %v1238_v10, %v1237_v14  ;;  %v1132_v52 = vrot.slane %v1130_v57, 1  ;;  %v1054_v14 = vld [vmem:[#allocation2 + $0x160] sm:$0x1] }
  0xb6   : > { %2549 = vmatmul.mubr.bf16.gmra.mrb[72].mxu0 %v4572_v4  ;;  %v1119_v4 = vsel %vm672_vm1, %v4798_v55, %v1118_v60  ;;  %v1229_v55 = vsel %vm447_vm0, %v1221_v49, %v1228_v22  ;;  %v1144_v22 = vshll.u32 %v1053_v53, 16 }
  0xb7   : > { %2452 = vmatmul.mubr.bf16.gmra.mrb[72].mxu1 %v777_v8  ;;  %2556 = vmatprep.mubr.bf16.mxu0 %v1112_v34  ;;  %v1133_v8 = vsel %vm672_vm1, %v4853_v63, %v1132_v52  ;;  %v4957_v34 = vld [vmem:[#allocation2 + $0x80] sm:$0xff]  ;;  %v4966_v63 = vor.u32 %v1134_v39, %v970_v47  ;;  %v4976_v47 = vld [vmem:[#allocation2 + $0x98] sm:$0xff]  ;;  %v1151_v52 = vshll.u32 %v1054_v14, 16 }
  0xb8   : > { %2459 = vmatprep.mubr.bf16.mxu1 %v1024_v58  ;;  %v1137_v58 = vshll.u32 %v1052_v27, 16  ;;  %v1259_v60 = vshrl.u32 %v4957_v34, 16  ;;  %v1262_v50 = vshll.u32 %v4957_v34, 16  ;;  %v1146_v44 = vrot.slane %v1144_v22, 1  ;;  %v1056_v22 = vld [vmem:[#allocation2 + $0x190] sm:$0x1] }
  0xba   : > { %v1139_v7 = vrot.slane %v1137_v58, 1 }
  0xbe   : > { %2557 = vmatmul.mubr.bf16.gmra.mrb[76].mxu0 %v4592_v19  ;;  %v1231_v19 = vshrl.u32 %v1188_v46, 16  ;;  %v1271_v46 = vshrl.u32 %v4976_v47, 16 }
  0xbf   : > { %2460 = vmatmul.mubr.bf16.gmra.mrb[76].mxu1 %v784_v42  ;;  %2564 = vmatprep.mubr.bf16.mxu0 %v1119_v4  ;;  %v1140_v4 = vsel %vm672_vm1, %v4966_v63, %v1139_v7 }
  0xc0   : > { %2661 = vmatprep.mubr.bf16.mxu1 %v4918_v18  ;;  %v1233_v15 = vrot.slane %v1231_v19, 7 }
  0xc2   : > { %v1241_v16 = vsel %vm447_vm0, %v1233_v15, %v1240_v21  ;;  %v1147_v21 = vsel %vm672_vm1, %v4985_v37, %v1146_v44  ;;  %v1148_v15 = vrot.slane %v997_v62, 1  ;;  %v1153_v62 = vrot.slane %v1151_v52, 1 }
  0xc6   : > { %2565 = vmatmul.mubr.bf16.gmra.mrb[80].mxu0 %v4623_v48  ;;  %v1250_v48 = vshll.u32 %v4942_v13, 16 }
  0xc7   : > { %2662 = vmatmul.mubr.bf16.vlgmr.msra.gmra.mrb[80].mxu1 %v1229_v55  ;;  %2572 = vmatprep.mubr.bf16.mxu0 %v1126_v54  ;;  %v1194_v55 = vld [vmem:[#allocation2 + $0x90] sm:$0x80]  ;;  %v1274_v54 = vshll.u32 %v4976_v47, 16 }
  0xc8   : > { %2669 = vmatprep.mubr.bf16.mxu1 %v4929_v41  ;;  %v1252_v40 = vor.u32 %v1250_v48, %v1249_v61  ;;  %v1267_v57 = vshrl.u32 %v1194_v55, 16  ;;  %v5004_v61 = vor.u32 %v1148_v15, %v994_v30  ;;  %v5014_v30 = vld [vmem:[#allocation2 + $0xc8] sm:$0xff]  ;;  %v1291_v55 = vshrl.u32 %v1198_v35, 16 }
  0xc9   : > { %v1295_v26 = vshrl.u32 %v5014_v30, 16  ;;  %v1298_v44 = vshll.u32 %v5014_v30, 16 }
  0xca   : > { %v1253_v42 = vsel %vm447_vm0, %v1245_v23, %v1252_v40  ;;  %v1269_v27 = vrot.slane %v1267_v57, 7  ;;  %v1286_v40 = vshll.u32 %v4995_v12, 16  ;;  %v1279_v23 = vshrl.u32 %v1196_v5, 16 }
  0xcb   : > { %v1154_v7 = vsel %vm672_vm1, %v5004_v61, %v1153_v62 }
  0xce   : > { %2573 = vmatmul.mubr.bf16.gmra.mrb[84].mxu0 %v4644_v2  ;;  %v1261_v2 = vrot.slane %v1259_v60, 7 }
  0xcf   : > { %2670 = vmatmul.mubr.bf16.gmra.mrb[84].mxu1 %v1241_v16  ;;  %2580 = vmatprep.mubr.bf16.mxu0 %v1133_v8  ;;  %v1283_v16 = vshrl.u32 %v4995_v12, 16  ;;  %v1055_v8 = vld [vmem:[#allocation2 + $0x178] sm:$0x1] }
  0xd0   : > { %2677 = vmatprep.mubr.bf16.mxu1 %v4942_v13  ;;  %v1264_v49 = vor.u32 %v1262_v50, %v1261_v2  ;;  %v1158_v53 = vshll.u32 %v1055_v8, 16  ;;  %v1281_v2 = vrot.slane %v1279_v23, 7  ;;  %v1442_v23 = vrot.slane %v1226_v24, 1 }
  0xd1   : > { %v1285_v58 = vrot.slane %v1283_v16, 7 }
  0xd2   : > { %v1265_v19 = vsel %vm447_vm0, %v1257_v33, %v1264_v49  ;;  %v1160_v25 = vrot.slane %v1158_v53, 1  ;;  %v1297_v33 = vrot.slane %v1295_v26, 7  ;;  %v1443_v24 = vor.u32 %v1442_v23, %v1223_v45 }
  0xd4   : > { %v1300_v57 = vor.u32 %v1298_v44, %v1297_v33 }
  0xd6   : > { %2581 = vmatmul.mubr.bf16.gmra.mrb[88].mxu0 %v4679_v28  ;;  %v1273_v28 = vrot.slane %v1271_v46, 7 }
  0xd7   : > { %2678 = vmatmul.mubr.bf16.gmra.mrb[88].mxu1 %v1253_v42  ;;  %2588 = vmatprep.mubr.bf16.mxu0 %v1140_v4  ;;  %v1288_v42 = vor.u32 %v1286_v40, %v1285_v58  ;;  %v5023_v4 = vor.u32 %v1155_v20, %v1006_v43  ;;  %v5033_v43 = vld [vmem:[#allocation2 + $0xe0] sm:$0xff]  ;;  %v5048_v58 = vld [vmem:[#allocation2 + $0xf8] sm:$0xff] }
  0xd8   : > { %2685 = vmatprep.mubr.bf16.mxu1 %v4957_v34  ;;  %v1276_v11 = vor.u32 %v1274_v54, %v1273_v28  ;;  %v1165_v28 = vshll.u32 %v1056_v22, 16  ;;  %v1307_v15 = vshrl.u32 %v5033_v43, 16  ;;  %v1310_v8 = vshll.u32 %v5033_v43, 16 }
  0xd9   : > { %v1289_v49 = vsel %vm447_vm0, %v1281_v2, %v1288_v42  ;;  %v1161_v14 = vsel %vm672_vm1, %v5023_v4, %v1160_v25  ;;  %v1319_v20 = vshrl.u32 %v5048_v58, 16  ;;  %v1202_v2 = vld [vmem:[#allocation2 + $0xf0] sm:$0x80]  ;;  %v1427_v25 = vld [vmem:[#allocation2 + $0x58] sm:$0x1]  ;;  %v1449_v22 = vrot.slane %v1238_v10, 1 }
  0xda   : > { %v1277_v39 = vsel %vm447_vm0, %v1269_v27, %v1276_v11  ;;  %v1200_v11 = vld [vmem:[#allocation2 + $0xd8] sm:$0x80]  ;;  %v1426_v27 = vld [vmem:[#allocation2 + $0x40] sm:$0x1]  ;;  %v1309_v5 = vrot.slane %v1307_v15, 7  ;;  %v1477_v34 = vrot.slane %v1286_v40, 1 }
  0xdc   : > { %v1312_v53 = vor.u32 %v1310_v8, %v1309_v5  ;;  %v1456_v5 = vrot.slane %v1250_v48, 1 }
  0xde   : > { %2589 = vmatmul.mubr.bf16.gmra.mrb[92].mxu0 %v4794_v51  ;;  %v1457_v41 = vor.u32 %v1456_v5, %v1247_v59 }
  0xdf   : > { %2686 = vmatmul.mubr.bf16.gmra.mrb[92].mxu1 %v1265_v19  ;;  %2596 = vmatprep.mubr.bf16.mxu0 %v1147_v21  ;;  %v1162_v19 = vrot.slane %v1021_v17, 1  ;;  %v1293_v21 = vrot.slane %v1291_v55, 7  ;;  %v1167_v17 = vrot.slane %v1165_v28, 1  ;;  %v1428_v55 = vld [vmem:[#allocation2 + $0x70] sm:$0x1]  ;;  %v1321_v28 = vrot.slane %v1319_v20, 7 }
  0xe0   : > { %2693 = vmatprep.mubr.bf16.mxu1 %v4976_v47 }
  0xe1   : > { %v5042_v52 = vor.u32 %v1162_v19, %v1018_v29  ;;  %v1301_v62 = vsel %vm447_vm0, %v1293_v21, %v1300_v57  ;;  %v1322_v57 = vshll.u32 %v5048_v58, 16  ;;  %v1315_v21 = vshrl.u32 %v1202_v2, 16 }
  0xe2   : > { %v1450_v2 = vor.u32 %v1449_v22, %v1235_v36 }
  0xe3   : > { %v1168_v29 = vsel %vm672_vm1, %v5042_v52, %v1167_v17  ;;  %v1452_v17 = vshll.u32 %v1427_v25, 16 }
  0xe5   : > { %v1454_v48 = vrot.slane %v1452_v17, 1 }
  0xe6   : > { %2597 = vmatmul.mubr.bf16.gmra.mrb[96].mxu0 %v4816_v9 }
  0xe7   : > { %2694 = vmatmul.mubr.bf16.gmra.mrb[96].mxu1 %v1277_v39  ;;  %2604 = vmatprep.mubr.bf16.mxu0 %v1154_v7  ;;  %v1303_v39 = vshrl.u32 %v1200_v11, 16  ;;  %v1445_v7 = vshll.u32 %v1426_v27, 16  ;;  %v1455_v17 = vsel %vm672_vm1, %v1450_v2, %v1454_v48 }
  0xe8   : > { %2701 = vmatprep.mubr.bf16.mxu1 %v4995_v12 }
  0xe9   : > { %v1305_v42 = vrot.slane %v1303_v39, 7  ;;  %v1447_v35 = vrot.slane %v1445_v7, 1  ;;  %v1459_v7 = vshll.u32 %v1428_v55, 16 }
  0xeb   : > { %v1313_v10 = vsel %vm447_vm0, %v1305_v42, %v1312_v53  ;;  %v1324_v53 = vor.u32 %v1322_v57, %v1321_v28  ;;  %v1317_v42 = vrot.slane %v1315_v21, 7  ;;  %v1461_v36 = vrot.slane %v1459_v7, 1 }
  0xed   : > { %v1325_v21 = vsel %vm447_vm0, %v1317_v42, %v1324_v53  ;;  %v1462_v2 = vsel %vm672_vm1, %v1457_v41, %v1461_v36  ;;  %v1431_v41 = vld [vmem:[#allocation2 + $0xb8] sm:$0x1] }
  0xee   : > { %2605 = vmatmul.mubr.bf16.gmra.mrb[100].mxu0 %v4845_v32 }
  0xef   : > { %2702 = vmatmul.mubr.bf16.gmra.mrb[100].mxu1 %v1289_v49  ;;  %2612 = vmatprep.mubr.bf16.mxu0 %v1161_v14 }
  0xf0   : > { %2709 = vmatprep.mubr.bf16.mxu1 %v5014_v30 }
  0xf6   : > { %2613 = vmatmul.mubr.bf16.gmra.mrb[104].mxu0 %v4872_v6 }
  0xf7   : > { %2710 = vmatmul.mubr.bf16.gmra.mrb[104].mxu1 %v1301_v62  ;;  %2620 = vmatprep.mubr.bf16.mxu0 %v1168_v29  ;;  %v5071_v62 = vld [vmem:[#allocation2 + $0x110] sm:$0xff]  ;;  %v1448_v29 = vsel %vm672_vm1, %v1443_v24, %v1447_v35  ;;  %v1204_v24 = vld [vmem:[#allocation2 + $0x108] sm:$0x80]  ;;  %v1429_v35 = vld [vmem:[#allocation2 + $0x88] sm:$0x1] }
  0xf8   : > { %2717 = vmatprep.mubr.bf16.mxu1 %v5033_v43  ;;  %v1334_v13 = vshll.u32 %v5071_v62, 16  ;;  %v1327_v5 = vshrl.u32 %v1204_v24, 16 }
  0xf9   : > { %v3600_v49 = vpop.f32.mrb[0].mxu0 }
  0xfa   : > { %v3672_v33 = vpop.f32.mrb[0].mxu1  ;;  %v3601_v14 = vpop.f32.mrb[1].mxu0 }
  0xfb   : > { %v3673_v19 = vpop.f32.mrb[1].mxu1  ;;  %v5066_v11 = vadd.f32 %v3601_v14, %v3600_v49  ;;  %v3603_v45 = vpop.f32.mrb[2].mxu0  ;;  %v1430_v14 = vld [vmem:[#allocation2 + $0xa0] sm:$0x1] }
  0xfc   : > { %v5068_v18 = vadd.f32 %v3673_v19, %v3672_v33  ;;  %v3675_v27 = vpop.f32.mrb[2].mxu1  ;;  %v3604_v39 = vpop.f32.mrb[3].mxu0  ;;  %v1331_v33 = vshrl.u32 %v5071_v62, 16  ;;  %v1473_v53 = vshll.u32 %v1430_v14, 16 }
  0xfd   : > { %v3676_v23 = vpop.f32.mrb[3].mxu1  ;;  %v5078_v25 = vadd.f32 %v3604_v39, %v3603_v45  ;;  %v1466_v39 = vshll.u32 %v1429_v35, 16 }
  0xfe   : > { %v5080_v49 = vadd.f32 %v3676_v23, %v3675_v27  ;;  %2621 = vmatmul.mubr.bf16.gmra.mrb[108].mxu0 %v4782_v31  ;;  %v1463_v31 = vrot.slane %v1262_v50, 1  ;;  %v1333_v45 = vrot.slane %v1331_v33, 7  ;;  %v1470_v23 = vrot.slane %v1274_v54, 1 }
  0xff   : > { %2718 = vmatmul.mubr.bf16.gmra.mrb[108].mxu1 %v1313_v10  ;;  %4072 = vmatprep.mubr.bf16.mxu0 %v1448_v29  ;;  %v1329_v54 = vrot.slane %v1327_v5, 7  ;;  %v1468_v35 = vrot.slane %v1466_v39, 1  ;;  %v1475_v14 = vrot.slane %v1473_v53, 1 }
 0x100   : > { %2725 = vmatprep.mubr.bf16.mxu1 %v5048_v58  ;;  %v1336_v24 = vor.u32 %v1334_v13, %v1333_v45  ;;  %v1471_v36 = vor.u32 %v1470_v23, %v1271_v46  ;;  %v1480_v45 = vshll.u32 %v1431_v41, 16  ;;  %v1484_v23 = vrot.slane %v1298_v44, 1  ;;  %v1208_v44 = vld [vmem:[#allocation2 + $0x138] sm:$0x80] }
 0x101   : > { %v3606_v22 = vpop.f32.mrb[4].mxu0 }
 0x102   : > { %v3678_v55 = vpop.f32.mrb[4].mxu1  ;;  %v3607_v19 = vpop.f32.mrb[5].mxu0  ;;  %v1337_v47 = vsel %vm447_vm0, %v1329_v54, %v1336_v24  ;;  %v1476_v40 = vsel %vm672_vm1, %v1471_v36, %v1475_v14  ;;  %v1478_v24 = vor.u32 %v1477_v34, %v1283_v16  ;;  %v1485_v54 = vor.u32 %v1484_v23, %v1295_v26  ;;  %v1433_v36 = vld [vmem:[#allocation2 + $0xe8] sm:$0x1] }
 0x103   : > { %v3679_v28 = vpop.f32.mrb[5].mxu1  ;;  %v5096_v59 = vadd.f32 %v3607_v19, %v3606_v22  ;;  %v3609_v10 = vpop.f32.mrb[6].mxu0  ;;  %v1464_v22 = vor.u32 %v1463_v31, %v1259_v60 }
 0x104   : > { %v5098_v27 = vadd.f32 %v3679_v28, %v3678_v55  ;;  %v3681_v50 = vpop.f32.mrb[6].mxu1  ;;  %v3610_v29 = vpop.f32.mrb[7].mxu0  ;;  %v1206_v55 = vld [vmem:[#allocation2 + $0x120] sm:$0x80] }
 0x105   : > { %v3682_v7 = vpop.f32.mrb[7].mxu1  ;;  %v5103_v42 = vadd.f32 %v3610_v29, %v3609_v10  ;;  %v1469_v46 = vsel %vm672_vm1, %v1464_v22, %v1468_v35  ;;  %v1482_v22 = vrot.slane %v1480_v45, 1  ;;  %v1494_v45 = vshll.u32 %v1433_v36, 16 }
 0x106   : > { %v5105_v48 = vadd.f32 %v3682_v7, %v3681_v50  ;;  %4073 = vmatmul.mubr.bf16.vlgmr.msra.gmra.mrb[112].mxu0 %v1455_v17  ;;  %v1339_v17 = vshrl.u32 %v1206_v55, 16 }
 0x107   : > { %2726 = vmatmul.mubr.bf16.gmra.mrb[112].mxu1 %v1325_v21  ;;  %4076 = vmatprep.mubr.bf16.mxu0 %v1462_v2  ;;  %v1432_v21 = vld [vmem:[#allocation2 + $0xd0] sm:$0x1] }
 0x108   : > { %2733 = vmatprep.mubr.bf16.mxu1 %v5071_v62  ;;  %v1487_v2 = vshll.u32 %v1432_v21, 16  ;;  %v1341_v41 = vrot.slane %v1339_v17, 7  ;;  %v1491_v21 = vrot.slane %v1310_v8, 1  ;;  %v1483_v17 = vsel %vm672_vm1, %v1478_v24, %v1482_v22 }
 0x109   : > { %v3612_v19 = vpop.f32.mrb[8].mxu0 }
 0x10a   : > { %v3684_v28 = vpop.f32.mrb[8].mxu1  ;;  %v3613_v60 = vpop.f32.mrb[9].mxu0  ;;  %v1489_v35 = vrot.slane %v1487_v2, 1  ;;  %v1349_v12 = vsel %vm447_vm0, %v1341_v41, %v4828_v0  ;;  %v1435_v2 = vld [vmem:[#allocation2 + $0x118] sm:$0x1] }
 0x10b   : > { %v3685_v31 = vpop.f32.mrb[9].mxu1  ;;  %v5116_v10 = vadd.f32 %v3613_v60, %v3612_v19  ;;  %v3615_v5 = vpop.f32.mrb[10].mxu0 }
 0x10c   : > { %v5118_v50 = vadd.f32 %v3685_v31, %v3684_v28  ;;  %v3687_v39 = vpop.f32.mrb[10].mxu1  ;;  %v3616_v29 = vpop.f32.mrb[11].mxu0  ;;  %v1434_v28 = vld [vmem:[#allocation2 + $0x100] sm:$0x1] }
 0x10d   : > { %v3688_v7 = vpop.f32.mrb[11].mxu1  ;;  %v5125_v53 = vadd.f32 %v3616_v29, %v3615_v5  ;;  %v1498_v5 = vrot.slane %v1322_v57, 1  ;;  %v1492_v29 = vor.u32 %v1491_v21, %v1307_v15  ;;  %v1210_v57 = vld [vmem:[#allocation2 + $0x150] sm:$0x80] }
 0x10e   : > { %v5127_v55 = vadd.f32 %v3688_v7, %v3687_v39  ;;  %4077 = vmatmul.mubr.bf16.gmra.mrb[116].mxu0 %v1469_v46  ;;  %v1501_v46 = vshll.u32 %v1434_v28, 16  ;;  %v1363_v15 = vshrl.u32 %v1210_v57, 16 }
 0x10f   : > { %2734 = vmatmul.mubr.bf16.gmra.mrb[116].mxu1 %v1337_v47  ;;  %4080 = vmatprep.mubr.bf16.mxu0 %v1476_v40  ;;  %v1490_v47 = vsel %vm672_vm1, %v1485_v54, %v1489_v35  ;;  %v1496_v40 = vrot.slane %v1494_v45, 1  ;;  %v1499_v41 = vor.u32 %v1498_v5, %v1319_v20  ;;  %v1436_v54 = vld [vmem:[#allocation2 + $0x130] sm:$0x1]  ;;  %v1505_v35 = vrot.slane %v1334_v13, 1 }
 0x110   : > { %2741 = vmatprep.mubr.bf16.mxu1 %v4794_v51  ;;  %v1351_v51 = vshrl.u32 %v1208_v44, 16  ;;  %v1503_v24 = vrot.slane %v1501_v46, 1  ;;  %v1365_v45 = vrot.slane %v1363_v15, 7 }
 0x111   : > { %v3618_v14 = vpop.f32.mrb[12].mxu0  ;;  %v1497_v20 = vsel %vm672_vm1, %v1492_v29, %v1496_v40  ;;  %v1438_v29 = vld [vmem:[#allocation2 + $0x160] sm:$0x1] }
 0x112   : > { %v3690_v19 = vpop.f32.mrb[12].mxu1  ;;  %v3619_v60 = vpop.f32.mrb[13].mxu0  ;;  %v1353_v7 = vrot.slane %v1351_v51, 7  ;;  %v1515_v51 = vshll.u32 %v1436_v54, 16 }
 0x113   : > { %v3691_v31 = vpop.f32.mrb[13].mxu1  ;;  %v5138_v16 = vadd.f32 %v3619_v60, %v3618_v14  ;;  %v3621_v30 = vpop.f32.mrb[14].mxu0  ;;  %v1508_v14 = vshll.u32 %v1435_v2, 16 }
 0x114   : > { %v5140_v34 = vadd.f32 %v3691_v31, %v3690_v19  ;;  %v3693_v26 = vpop.f32.mrb[14].mxu1  ;;  %v3622_v39 = vpop.f32.mrb[15].mxu0  ;;  %v1361_v58 = vsel %vm447_vm0, %v1353_v7, %v4857_v56 }
 0x115   : > { %v3694_v8 = vpop.f32.mrb[15].mxu1  ;;  %v5146_v23 = vadd.f32 %v3622_v39, %v3621_v30  ;;  %v1510_v5 = vrot.slane %v1508_v14, 1  ;;  %v1212_v39 = vld [vmem:[#allocation2 + $0x168] sm:$0x80] }
 0x116   : > { %v5148_v0 = vadd.f32 %v3694_v8, %v3693_v26  ;;  %4081 = vmatmul.mubr.bf16.gmra.mrb[120].mxu0 %v1483_v17  ;;  %v1506_v17 = vor.u32 %v1505_v35, %v1331_v33  ;;  %v1437_v8 = vld [vmem:[#allocation2 + $0x148] sm:$0x1]  ;;  %v1375_v57 = vshrl.u32 %v1212_v39, 16  ;;  %v1529_v35 = vshll.u32 %v1438_v29, 16 }
 0x117   : > { %2742 = vmatmul.mubr.bf16.gmra.mrb[120].mxu1 %v1349_v12  ;;  %4084 = vmatprep.mubr.bf16.mxu0 %v1490_v47  ;;  %v1504_v12 = vsel %vm672_vm1, %v1499_v41, %v1503_v24  ;;  %v1522_v2 = vshll.u32 %v1437_v8, 16 }
 0x118   : > { %2749 = vmatprep.mubr.bf16.mxu1 %v4816_v9  ;;  %v1511_v24 = vsel %vm672_vm1, %v1506_v17, %v1510_v5 }
 0x119   : > { %v3624_v22 = vpop.f32.mrb[16].mxu0 }
 0x11a   : > { %v3712_v44 = vpop.f32.mrb[16].mxu1  ;;  %v3625_v36 = vpop.f32.mrb[17].mxu0 }
 0x11b   : > { %v3713_v43 = vpop.f32.mrb[17].mxu1  ;;  %v5157_v9 = vadd.f32 %v3625_v36, %v3624_v22  ;;  %v3627_v28 = vpop.f32.mrb[18].mxu0 }
 0x11c   : > { %v3714_v19 = vadd.f32 %v3713_v43, %v3712_v44  ;;  %v3715_v21 = vpop.f32.mrb[18].mxu1  ;;  %v3628_v60 = vpop.f32.mrb[19].mxu0 }
 0x11d   : > { %v3716_v31 = vpop.f32.mrb[19].mxu1  ;;  %v5166_v30 = vadd.f32 %v3628_v60, %v3627_v28  ;;  %v1214_v28 = vld [vmem:[#allocation2 + $0x180] sm:$0x80] }
 0x11e   : > { %v5164_v13 = vadd.f32 %v3714_v19, %v5066_v11  ;;  %v3717_v26 = vadd.f32 %v3716_v31, %v3715_v21  ;;  %4085 = vmatmul.mubr.bf16.gmra.mrb[124].mxu0 %v1497_v20  ;;  %v1517_v11 = vrot.slane %v1515_v51, 1  ;;  %v1524_v19 = vrot.slane %v1522_v2, 1  ;;  %v1439_v21 = vld [vmem:[#allocation2 + $0x178] sm:$0x1] }
 0x11f   : > { %2750 = vmatmul.mubr.bf16.gmra.mrb[124].mxu1 %v1361_v58  ;;  %4088 = vmatprep.mubr.bf16.mxu0 %v1504_v12  ;;  %v1387_v12 = vshrl.u32 %v1214_v28, 16  ;;  %v1536_v51 = vshll.u32 %v1439_v21, 16 }
 0x120   : > { %v5171_v56 = vadd.f32 %v3717_v26, %v5078_v25  ;;  %2757 = vmatprep.mubr.bf16.mxu1 %v4845_v32  ;;  %v1373_v32 = vsel %vm447_vm0, %v1365_v45, %v4881_v3  ;;  %v1518_v54 = vsel %vm672_vm1, %v4966_v63, %v1517_v11  ;;  %v1377_v3 = vrot.slane %v1375_v57, 7 }
 0x121   : > { %v3630_v47 = vpop.f32.mrb[20].mxu0  ;;  %v1531_v63 = vrot.slane %v1529_v35, 1  ;;  %v1525_v5 = vsel %vm672_vm1, %v4985_v37, %v1524_v19  ;;  %v1538_v57 = vrot.slane %v1536_v51, 1 }
 0x122   : > { %v3718_v46 = vpop.f32.mrb[20].mxu1  ;;  %v3631_v7 = vpop.f32.mrb[21].mxu0 }
 0x123   : > { %v3719_v40 = vpop.f32.mrb[21].mxu1  ;;  %v5174_v62 = vadd.f32 %v3631_v7, %v3630_v47  ;;  %v3633_v25 = vpop.f32.mrb[22].mxu0  ;;  %v1532_v11 = vsel %vm672_vm1, %v5004_v61, %v1531_v63  ;;  %v1539_v35 = vsel %vm672_vm1, %v5023_v4, %v1538_v57 }
 0x124   : > { %v3720_v33 = vadd.f32 %v3719_v40, %v3718_v46  ;;  %v3721_v41 = vpop.f32.mrb[22].mxu1  ;;  %v3634_v22 = vpop.f32.mrb[23].mxu0  ;;  %v1389_v40 = vrot.slane %v1387_v12, 7 }
 0x125   : > { %v3722_v44 = vpop.f32.mrb[23].mxu1  ;;  %v5184_v43 = vadd.f32 %v3634_v22, %v3633_v25  ;;  %v4219_v25 = vld [vmem:[#allocation2 + $0x188] sm:$0xff] }
 0x126   : > { %v5182_v36 = vadd.f32 %v3720_v33, %v5096_v59  ;;  %v3723_v15 = vadd.f32 %v3722_v44, %v3721_v41  ;;  %4089 = vmatmul.mubr.bf16.gmra.mrb[128].mxu0 %v1511_v24  ;;  %v1440_v59 = vld [vmem:[#allocation2 + $0x190] sm:$0x1]  ;;  %v1216_v41 = vld [vmem:[#allocation2 + $0x198] sm:$0x80] }
 0x127   : > { %2758 = vmatmul.mubr.bf16.gmra.mrb[128].mxu1 %v1373_v32  ;;  %4092 = vmatprep.mubr.bf16.mxu0 %v1518_v54  ;;  %v1543_v47 = vshll.u32 %v1440_v59, 16  ;;  %v1397_v54 = vsel %vm447_vm0, %v1389_v40, %v4910_v1  ;;  %v1399_v63 = vshrl.u32 %v1216_v41, 16 }
 0x128   : > { %v5187_v14 = vadd.f32 %v3723_v15, %v5103_v42  ;;  %2765 = vmatprep.mubr.bf16.mxu1 %v4872_v6  ;;  %v1385_v6 = vsel %vm447_vm0, %v1377_v3, %v4895_v38  ;;  %v4218_v38 = vld [vmem:[#allocation2 + $0x8] sm:$0xff] }
 0x129   : > { %v3636_v58 = vpop.f32.mrb[24].mxu0  ;;  %v1403_v2 = vshrl.u32 %v4218_v38, 16  ;;  %v1406_v33 = vshll.u32 %v4218_v38, 16  ;;  %v1545_v61 = vrot.slane %v1543_v47, 1 }
 0x12a   : > { %v3724_v20 = vpop.f32.mrb[24].mxu1  ;;  %v3637_v60 = vpop.f32.mrb[25].mxu0 }
 0x12b   : > { %v3725_v31 = vpop.f32.mrb[25].mxu1  ;;  %v5190_v26 = vadd.f32 %v3637_v60, %v3636_v58  ;;  %v3639_v42 = vpop.f32.mrb[26].mxu0  ;;  %v1405_v15 = vrot.slane %v1403_v2, 7  ;;  %v1547_v3 = vrot.slane %v1406_v33, 1  ;;  %v1546_v60 = vsel %vm672_vm1, %v5042_v52, %v1545_v61 }
 0x12c   : > { %v3726_v17 = vadd.f32 %v3725_v31, %v3724_v20  ;;  %v3727_v45 = vpop.f32.mrb[26].mxu1  ;;  %v3640_v39 = vpop.f32.mrb[27].mxu0 }
 0x12d   : > { %v3728_v8 = vpop.f32.mrb[27].mxu1  ;;  %v5201_v29 = vadd.f32 %v3640_v39, %v3639_v42  ;;  %v1408_v12 = vor.u32 %v1406_v33, %v1405_v15  ;;  %v1401_v42 = vrot.slane %v1399_v63, 7 }
 0x12e   : > { %v5199_v46 = vadd.f32 %v3726_v17, %v5116_v10  ;;  %v3729_v7 = vadd.f32 %v3728_v8, %v3727_v45  ;;  %4093 = vmatmul.mubr.bf16.gmra.mrb[132].mxu0 %v1525_v5  ;;  %v1441_v10 = vld [vmem:[#allocation2 + $0x1a8] sm:$0x1]  ;;  %v1548_v17 = vor.u32 %v1547_v3, %v1403_v2 }
 0x12f   : > { %2766 = vmatmul.mubr.bf16.gmra.mrb[132].mxu1 %v1385_v6  ;;  %4096 = vmatprep.mubr.bf16.mxu0 %v1532_v11  ;;  %v1550_v58 = vshll.u32 %v1441_v10, 16 }
 0x130   : > { %v5204_v37 = vadd.f32 %v3729_v7, %v5125_v53  ;;  %2773 = vmatprep.mubr.bf16.mxu1 %v4219_v25  ;;  %v1409_v7 = vsel %vm447_vm0, %v1401_v42, %v1408_v12 }
 0x131   : > { %v3642_v32 = vpop.f32.mrb[28].mxu0  ;;  %v1552_v45 = vrot.slane %v1550_v58, 1 }
 0x132   : > { %v3730_v24 = vpop.f32.mrb[28].mxu1  ;;  %v3643_v22 = vpop.f32.mrb[29].mxu0 }
 0x133   : > { %v3731_v44 = vpop.f32.mrb[29].mxu1  ;;  %v5210_v53 = vadd.f32 %v3643_v22, %v3642_v32  ;;  %v3645_v28 = vpop.f32.mrb[30].mxu0  ;;  %v1553_v40 = vsel %vm672_vm1, %v1548_v17, %v1552_v45 }
 0x134   : > { %v3732_v19 = vadd.f32 %v3731_v44, %v3730_v24  ;;  %v3733_v21 = vpop.f32.mrb[30].mxu1  ;;  %v3646_v20 = vpop.f32.mrb[31].mxu0 }
 0x135   : > { %v3734_v59 = vpop.f32.mrb[31].mxu1  ;;  %v5217_v1 = vadd.f32 %v3646_v20, %v3645_v28 }
 0x136   : > { %v5215_v31 = vadd.f32 %v3732_v19, %v5138_v16  ;;  %v3735_v4 = vadd.f32 %v3734_v59, %v3733_v21  ;;  %4097 = vmatmul.mubr.bf16.gmra.mrb[136].mxu0 %v1539_v35 }
 0x137   : > { %2774 = vmatmul.mubr.bf16.gmra.mrb[136].mxu1 %v1397_v54  ;;  %4100 = vmatprep.mubr.bf16.mxu0 %v1546_v60 }
 0x138   : > { %v5220_v51 = vadd.f32 %v3735_v4, %v5146_v23  ;;  %2781 = vmatprep.mubr.bf16.mxu1 %v4218_v38 }
 0x139   : > { %v3648_v6 = vpop.f32.mrb[32].mxu0 }
 0x13a   : > { %v3736_v5 = vpop.f32.mrb[32].mxu1  ;;  %v3649_v52 = vpop.f32.mrb[33].mxu0 }
 0x13b   : > { %v3737_v39 = vpop.f32.mrb[33].mxu1  ;;  %v5222_v16 = vadd.f32 %v3649_v52, %v3648_v6  ;;  %v3651_v11 = vpop.f32.mrb[34].mxu0 }
 0x13c   : > { %v3738_v8 = vadd.f32 %v3737_v39, %v3736_v5  ;;  %v3739_v47 = vpop.f32.mrb[34].mxu1  ;;  %v3652_v23 = vpop.f32.mrb[35].mxu0 }
 0x13d   : > { %v3740_v57 = vpop.f32.mrb[35].mxu1  ;;  %v3653_v2 = vadd.f32 %v3652_v23, %v3651_v11 }
 0x13e   : > { %v5227_v38 = vadd.f32 %v3738_v8, %v5157_v9  ;;  %v3741_v33 = vadd.f32 %v3740_v57, %v3739_v47  ;;  %4101 = vmatmul.mubr.bf16.gmra.mrb[140].mxu0 %v1553_v40 }
 0x13f   : > { %2782 = vmatmul.mubr.bf16.gmra.mrb[140].mxu1 %v1409_v7 }
 0x140   : > { %v5230_v25 = vadd.f32 %v3741_v33, %v5166_v30 }
 0x141   : > { %v3654_v61 = vpop.f32.mrb[36].mxu0 }
 0x142   : > { %v3742_v41 = vpop.f32.mrb[36].mxu1  ;;  %v3655_v10 = vpop.f32.mrb[37].mxu0 }
 0x143   : > { %v3743_v32 = vpop.f32.mrb[37].mxu1  ;;  %v5232_v24 = vadd.f32 %v3655_v10, %v3654_v61  ;;  %v3657_v44 = vpop.f32.mrb[38].mxu0 }
 0x144   : > { %v3744_v22 = vadd.f32 %v3743_v32, %v3742_v41  ;;  %v3745_v54 = vpop.f32.mrb[38].mxu1  ;;  %v3658_v35 = vpop.f32.mrb[39].mxu0 }
 0x145   : > { %v3746_v15 = vpop.f32.mrb[39].mxu1  ;;  %v3659_v3 = vadd.f32 %v3658_v35, %v3657_v44 }
 0x146   : > { %v5235_v9 = vadd.f32 %v3744_v22, %v5174_v62  ;;  %v3747_v19 = vadd.f32 %v3746_v15, %v3745_v54 }
 0x148   : > { %v5238_v28 = vadd.f32 %v3747_v19, %v5184_v43 }
 0x149   : > { %v3660_v30 = vpop.f32.mrb[40].mxu0 }
 0x14a   : > { %v3748_v21 = vpop.f32.mrb[40].mxu1  ;;  %v3661_v63 = vpop.f32.mrb[41].mxu0 }
 0x14b   : > { %v3749_v58 = vpop.f32.mrb[41].mxu1  ;;  %v5240_v20 = vadd.f32 %v3661_v63, %v3660_v30  ;;  %v3663_v60 = vpop.f32.mrb[42].mxu0 }
 0x14c   : > { %v3750_v59 = vadd.f32 %v3749_v58, %v3748_v21  ;;  %v3751_v4 = vpop.f32.mrb[42].mxu1  ;;  %v3664_v12 = vpop.f32.mrb[43].mxu0 }
 0x14d   : > { %v3752_v17 = vpop.f32.mrb[43].mxu1  ;;  %v5245_v62 = vadd.f32 %v3664_v12, %v3663_v60 }
 0x14e   : > { %v5243_v42 = vadd.f32 %v3750_v59, %v5190_v26  ;;  %v3753_v45 = vadd.f32 %v3752_v17, %v3751_v4 }
 0x150   : > { %v5248_v43 = vadd.f32 %v3753_v45, %v5201_v29 }
 0x151   : > { %v3666_v6 = vpop.f32.mrb[44].mxu0 }
 0x152   : > { %v3754_v5 = vpop.f32.mrb[44].mxu1  ;;  %v3667_v52 = vpop.f32.mrb[45].mxu0 }
 0x153   : > { %v3755_v39 = vpop.f32.mrb[45].mxu1  ;;  %v5250_v8 = vadd.f32 %v3667_v52, %v3666_v6  ;;  %v3669_v47 = vpop.f32.mrb[46].mxu0 }
 0x154   : > { %v3756_v11 = vadd.f32 %v3755_v39, %v3754_v5  ;;  %v3757_v7 = vpop.f32.mrb[46].mxu1  ;;  %v3670_v40 = vpop.f32.mrb[47].mxu0 }
 0x155   : > { %v3758_v23 = vpop.f32.mrb[47].mxu1  ;;  %v5255_v57 = vadd.f32 %v3670_v40, %v3669_v47 }
 0x156   : > { %v5253_v26 = vadd.f32 %v3756_v11, %v5210_v53  ;;  %v3759_v33 = vadd.f32 %v3758_v23, %v3757_v7 }
 0x158   : > { %v5258_v29 = vadd.f32 %v3759_v33, %v5217_v1 }
 0x159   : > { %v3824_v41 = vpop.f32.mrb[48].mxu0 }
 0x15a   : > { %v3760_v61 = vpop.f32.mrb[48].mxu1  ;;  %v3825_v32 = vpop.f32.mrb[49].mxu0 }
 0x15b   : > { %v3761_v10 = vpop.f32.mrb[49].mxu1  ;;  %v3826_v44 = vadd.f32 %v3825_v32, %v3824_v41  ;;  %v3827_v35 = vpop.f32.mrb[50].mxu0 }
 0x15c   : > { %v3762_v22 = vadd.f32 %v3761_v10, %v3760_v61  ;;  %v3763_v54 = vpop.f32.mrb[50].mxu1  ;;  %v3828_v19 = vpop.f32.mrb[51].mxu0 }
 0x15d   : > { %v3764_v15 = vpop.f32.mrb[51].mxu1  ;;  %v5264_v53 = vadd.f32 %v3826_v44, %v5164_v13  ;;  %v3829_v63 = vadd.f32 %v3828_v19, %v3827_v35 }
 0x15e   : > { %v5261_v30 = vadd.f32 %v3762_v22, %v5222_v16  ;;  %v3765_v21 = vadd.f32 %v3764_v15, %v3763_v54 }
 0x15f   : > { %v5269_v58 = vadd.f32 %v3829_v63, %v5171_v56 }
 0x160   : > { %v5266_v1 = vadd.f32 %v3765_v21, %v3653_v2 }
 0x161   : > { %v3830_v60 = vpop.f32.mrb[52].mxu0 }
 0x162   : > { %v3766_v59 = vpop.f32.mrb[52].mxu1  ;;  %v3831_v12 = vpop.f32.mrb[53].mxu0 }
 0x163   : > { %v3767_v4 = vpop.f32.mrb[53].mxu1  ;;  %v3832_v45 = vadd.f32 %v3831_v12, %v3830_v60  ;;  %v3833_v5 = vpop.f32.mrb[54].mxu0 }
 0x164   : > { %v3768_v17 = vadd.f32 %v3767_v4, %v3766_v59  ;;  %v3769_v6 = vpop.f32.mrb[54].mxu1  ;;  %v3834_v52 = vpop.f32.mrb[55].mxu0 }
 0x165   : > { %v3770_v16 = vpop.f32.mrb[55].mxu1  ;;  %v5275_v39 = vadd.f32 %v3832_v45, %v5182_v36  ;;  %v3835_v11 = vadd.f32 %v3834_v52, %v3833_v5 }
 0x166   : > { %v5272_v13 = vadd.f32 %v3768_v17, %v5232_v24  ;;  %v3771_v2 = vadd.f32 %v3770_v16, %v3769_v6 }
 0x167   : > { %v5280_v47 = vadd.f32 %v3835_v11, %v5187_v14 }
 0x168   : > { %v5277_v56 = vadd.f32 %v3771_v2, %v3659_v3 }
 0x169   : > { %v3836_v40 = vpop.f32.mrb[56].mxu0 }
 0x16a   : > { %v3772_v7 = vpop.f32.mrb[56].mxu1  ;;  %v3837_v33 = vpop.f32.mrb[57].mxu0 }
 0x16b   : > { %v3773_v23 = vpop.f32.mrb[57].mxu1  ;;  %v3838_v41 = vadd.f32 %v3837_v33, %v3836_v40  ;;  %v3839_v32 = vpop.f32.mrb[58].mxu0 }
 0x16c   : > { %v3774_v61 = vadd.f32 %v3773_v23, %v3772_v7  ;;  %v3775_v10 = vpop.f32.mrb[58].mxu1  ;;  %v3840_v22 = vpop.f32.mrb[59].mxu0 }
 0x16d   : > { %v3776_v24 = vpop.f32.mrb[59].mxu1  ;;  %v5286_v44 = vadd.f32 %v3838_v41, %v5199_v46  ;;  %v3841_v54 = vadd.f32 %v3840_v22, %v3839_v32 }
 0x16e   : > { %v5283_v36 = vadd.f32 %v3774_v61, %v5240_v20  ;;  %v3777_v3 = vadd.f32 %v3776_v24, %v3775_v10 }
 0x16f   : > { %v5292_v35 = vadd.f32 %v3841_v54, %v5204_v37 }
 0x170   : > { %v5289_v14 = vadd.f32 %v3777_v3, %v5245_v62 }
 0x171   : > { %v3842_v19 = vpop.f32.mrb[60].mxu0 }
 0x172   : > { %v3778_v15 = vpop.f32.mrb[60].mxu1  ;;  %v3843_v63 = vpop.f32.mrb[61].mxu0 }
 0x173   : > { %v3779_v21 = vpop.f32.mrb[61].mxu1  ;;  %v3844_v60 = vadd.f32 %v3843_v63, %v3842_v19  ;;  %v3845_v20 = vpop.f32.mrb[62].mxu0 }
 0x174   : > { %v3780_v59 = vadd.f32 %v3779_v21, %v3778_v15  ;;  %v3781_v4 = vpop.f32.mrb[62].mxu1  ;;  %v3846_v17 = vpop.f32.mrb[63].mxu0 }
 0x175   : > { %v3782_v12 = vpop.f32.mrb[63].mxu1  ;;  %v5298_v45 = vadd.f32 %v3844_v60, %v5215_v31  ;;  %v3847_v6 = vadd.f32 %v3846_v17, %v3845_v20 }
 0x176   : > { %v5295_v46 = vadd.f32 %v3780_v59, %v5250_v8  ;;  %v3783_v62 = vadd.f32 %v3782_v12, %v3781_v4 }
 0x177   : > { %v5304_v5 = vadd.f32 %v3847_v6, %v5220_v51 }
 0x178   : > { %v5301_v37 = vadd.f32 %v3783_v62, %v5255_v57 }
 0x179   : > { %v3848_v52 = vpop.f32.mrb[64].mxu0 }
 0x17a   : > { %v3784_v16 = vpop.f32.mrb[64].mxu1  ;;  %v3849_v11 = vpop.f32.mrb[65].mxu0 }
 0x17b   : > { %v3785_v2 = vpop.f32.mrb[65].mxu1  ;;  %v3850_v40 = vadd.f32 %v3849_v11, %v3848_v52  ;;  %v3851_v8 = vpop.f32.mrb[66].mxu0 }
 0x17c   : > { %v3786_v7 = vadd.f32 %v3785_v2, %v3784_v16  ;;  %v3787_v23 = vpop.f32.mrb[66].mxu1  ;;  %v3852_v61 = vpop.f32.mrb[67].mxu0 }
 0x17d   : > { %v3788_v33 = vpop.f32.mrb[67].mxu1  ;;  %v5310_v41 = vadd.f32 %v3850_v40, %v5227_v38  ;;  %v3853_v10 = vadd.f32 %v3852_v61, %v3851_v8 }
 0x17e   : > { %v5307_v31 = vadd.f32 %v3786_v7, %v5068_v18  ;;  %v3789_v57 = vadd.f32 %v3788_v33, %v3787_v23 }
 0x17f   : > { %v5316_v32 = vadd.f32 %v3853_v10, %v5230_v25 }
 0x180   : > { %v5313_v51 = vadd.f32 %v3789_v57, %v5080_v49 }
 0x181   : > { %v3854_v22 = vpop.f32.mrb[68].mxu0 }
 0x182   : > { %v3790_v24 = vpop.f32.mrb[68].mxu1  ;;  %v3855_v54 = vpop.f32.mrb[69].mxu0 }
 0x183   : > { %v3791_v3 = vpop.f32.mrb[69].mxu1  ;;  %v3856_v19 = vadd.f32 %v3855_v54, %v3854_v22  ;;  %v3857_v18 = vpop.f32.mrb[70].mxu0 }
 0x184   : > { %v3792_v15 = vadd.f32 %v3791_v3, %v3790_v24  ;;  %v3793_v21 = vpop.f32.mrb[70].mxu1  ;;  %v3858_v59 = vpop.f32.mrb[71].mxu0 }
 0x185   : > { %v3794_v63 = vpop.f32.mrb[71].mxu1  ;;  %v5322_v60 = vadd.f32 %v3856_v19, %v5235_v9  ;;  %v3859_v4 = vadd.f32 %v3858_v59, %v3857_v18 }
 0x186   : > { %v5319_v38 = vadd.f32 %v3792_v15, %v5098_v27  ;;  %v3795_v49 = vadd.f32 %v3794_v63, %v3793_v21 }
 0x187   : > { %v5328_v20 = vadd.f32 %v3859_v4, %v5238_v28 }
 0x188   : > { %v5325_v25 = vadd.f32 %v3795_v49, %v5105_v48 }
 0x189   : > { %v3860_v17 = vpop.f32.mrb[72].mxu0 }
 0x18a   : > { %v3796_v12 = vpop.f32.mrb[72].mxu1  ;;  %v3861_v6 = vpop.f32.mrb[73].mxu0 }
 0x18b   : > { %v3797_v62 = vpop.f32.mrb[73].mxu1  ;;  %v3862_v52 = vadd.f32 %v3861_v6, %v3860_v17  ;;  %v3863_v27 = vpop.f32.mrb[74].mxu0 }
 0x18c   : > { %v3798_v16 = vadd.f32 %v3797_v62, %v3796_v12  ;;  %v3799_v2 = vpop.f32.mrb[74].mxu1  ;;  %v3864_v7 = vpop.f32.mrb[75].mxu0 }
 0x18d   : > { %v3800_v11 = vpop.f32.mrb[75].mxu1  ;;  %v5334_v40 = vadd.f32 %v3862_v52, %v5243_v42  ;;  %v3865_v23 = vadd.f32 %v3864_v7, %v3863_v27 }
 0x18e   : > { %v5331_v9 = vadd.f32 %v3798_v16, %v5118_v50  ;;  %v3801_v48 = vadd.f32 %v3800_v11, %v3799_v2 }
 0x18f   : > { %v5340_v8 = vadd.f32 %v3865_v23, %v5248_v43 }
 0x190   : > { %v5337_v28 = vadd.f32 %v3801_v48, %v5127_v55 }
 0x191   : > { %v3866_v61 = vpop.f32.mrb[76].mxu0 }
 0x192   : > { %v3802_v33 = vpop.f32.mrb[76].mxu1  ;;  %v3867_v10 = vpop.f32.mrb[77].mxu0 }
 0x193   : > { %v3803_v57 = vpop.f32.mrb[77].mxu1  ;;  %v3868_v22 = vadd.f32 %v3867_v10, %v3866_v61  ;;  %v3869_v50 = vpop.f32.mrb[78].mxu0 }
 0x194   : > { %v3804_v24 = vadd.f32 %v3803_v57, %v3802_v33  ;;  %v3805_v3 = vpop.f32.mrb[78].mxu1  ;;  %v3870_v15 = vpop.f32.mrb[79].mxu0 }
 0x195   : > { %v3806_v54 = vpop.f32.mrb[79].mxu1  ;;  %v5346_v19 = vadd.f32 %v3868_v22, %v5253_v26  ;;  %v3871_v21 = vadd.f32 %v3870_v15, %v3869_v50 }
 0x196   : > { %v5343_v42 = vadd.f32 %v3804_v24, %v5140_v34  ;;  %v3807_v55 = vadd.f32 %v3806_v54, %v3805_v3 }
 0x197   : > { %v5352_v18 = vadd.f32 %v3871_v21, %v5258_v29 }
 0x198   : > { %v5349_v43 = vadd.f32 %v3807_v55, %v5148_v0 }
 0x199   : > { %v3872_v63 = vpop.f32.mrb[80].mxu0 }
 0x19a   : > { %v3936_v59 = vpop.f32.mrb[80].mxu1  ;;  %v3873_v49 = vpop.f32.mrb[81].mxu0 }
 0x19b   : > { %v3937_v4 = vpop.f32.mrb[81].mxu1  ;;  %v3874_v12 = vadd.f32 %v3873_v49, %v3872_v63  ;;  %v3875_v62 = vpop.f32.mrb[82].mxu0 }
 0x19c   : > { %v3938_v17 = vadd.f32 %v3937_v4, %v3936_v59  ;;  %v3939_v34 = vpop.f32.mrb[82].mxu1  ;;  %v3876_v6 = vpop.f32.mrb[83].mxu0 }
 0x19d   : > { %v3940_v16 = vpop.f32.mrb[83].mxu1  ;;  %v5355_v26 = vadd.f32 %v3874_v12, %v5261_v30  ;;  %v3877_v52 = vadd.f32 %v3876_v6, %v3875_v62 }
 0x19e   : > { %v3941_v2 = vadd.f32 %v3940_v16, %v3939_v34  ;;  %v5358_v0 = vadd.f32 %v3938_v17, %v5264_v53 }
 0x19f   : > { %v5361_v29 = vadd.f32 %v3877_v52, %v5266_v1 }
 0x1a0   : > { %v5364_v27 = vadd.f32 %v3941_v2, %v5269_v58 }
 0x1a1   : > { %v3878_v11 = vpop.f32.mrb[84].mxu0 }
 0x1a2   : > { %v3942_v7 = vpop.f32.mrb[84].mxu1  ;;  %v3879_v48 = vpop.f32.mrb[85].mxu0 }
 0x1a3   : > { %v3943_v23 = vpop.f32.mrb[85].mxu1  ;;  %v3880_v33 = vadd.f32 %v3879_v48, %v3878_v11  ;;  %v3881_v57 = vpop.f32.mrb[86].mxu0 }
 0x1a4   : > { %v3944_v61 = vadd.f32 %v3943_v23, %v3942_v7  ;;  %v3945_v30 = vpop.f32.mrb[86].mxu1  ;;  %v3882_v10 = vpop.f32.mrb[87].mxu0 }
 0x1a5   : > { %v3946_v24 = vpop.f32.mrb[87].mxu1  ;;  %v5367_v22 = vadd.f32 %v3880_v33, %v5272_v13  ;;  %v3883_v53 = vadd.f32 %v3882_v10, %v3881_v57 }
 0x1a6   : > { %v3947_v3 = vadd.f32 %v3946_v24, %v3945_v30  ;;  %v5370_v1 = vadd.f32 %v3944_v61, %v5275_v39 }
 0x1a7   : > { %v5373_v58 = vadd.f32 %v3883_v53, %v5277_v56 }
 0x1a8   : > { %v5376_v50 = vadd.f32 %v3947_v3, %v5280_v47 }
 0x1a9   : > { %v3884_v54 = vpop.f32.mrb[88].mxu0 }
 0x1aa   : > { %v3948_v15 = vpop.f32.mrb[88].mxu1  ;;  %v3885_v55 = vpop.f32.mrb[89].mxu0 }
 0x1ab   : > { %v3949_v21 = vpop.f32.mrb[89].mxu1  ;;  %v3886_v63 = vadd.f32 %v3885_v55, %v3884_v54  ;;  %v3887_v49 = vpop.f32.mrb[90].mxu0 }
 0x1ac   : > { %v3950_v59 = vadd.f32 %v3949_v21, %v3948_v15  ;;  %v3951_v13 = vpop.f32.mrb[90].mxu1  ;;  %v3888_v4 = vpop.f32.mrb[91].mxu0 }
 0x1ad   : > { %v3952_v12 = vpop.f32.mrb[91].mxu1  ;;  %v5379_v17 = vadd.f32 %v3886_v63, %v5283_v36  ;;  %v3889_v39 = vadd.f32 %v3888_v4, %v3887_v49 }
 0x1ae   : > { %v3953_v62 = vadd.f32 %v3952_v12, %v3951_v13  ;;  %v5382_v56 = vadd.f32 %v3950_v59, %v5286_v44 }
 0x1af   : > { %v5385_v47 = vadd.f32 %v3889_v39, %v5289_v14 }
 0x1b0   : > { %v5388_v34 = vadd.f32 %v3953_v62, %v5292_v35 }
 0x1b1   : > { %v3890_v6 = vpop.f32.mrb[92].mxu0 }
 0x1b2   : > { %v3954_v16 = vpop.f32.mrb[92].mxu1  ;;  %v3891_v52 = vpop.f32.mrb[93].mxu0 }
 0x1b3   : > { %v3955_v2 = vpop.f32.mrb[93].mxu1  ;;  %v3892_v11 = vadd.f32 %v3891_v52, %v3890_v6  ;;  %v3893_v48 = vpop.f32.mrb[94].mxu0 }
 0x1b4   : > { %v3956_v7 = vadd.f32 %v3955_v2, %v3954_v16  ;;  %v3957_v36 = vpop.f32.mrb[94].mxu1  ;;  %v3894_v23 = vpop.f32.mrb[95].mxu0 }
 0x1b5   : > { %v3958_v33 = vpop.f32.mrb[95].mxu1  ;;  %v5391_v61 = vadd.f32 %v3892_v11, %v5295_v46  ;;  %v3895_v44 = vadd.f32 %v3894_v23, %v3893_v48 }
 0x1b6   : > { %v3959_v57 = vadd.f32 %v3958_v33, %v3957_v36  ;;  %v5394_v14 = vadd.f32 %v3956_v7, %v5298_v45 }
 0x1b7   : > { %v5397_v35 = vadd.f32 %v3895_v44, %v5301_v37 }
 0x1b8   : > { %v5400_v30 = vadd.f32 %v3959_v57, %v5304_v5 }
 0x1b9   : > { %v3896_v10 = vpop.f32.mrb[96].mxu0 }
 0x1ba   : > { %v3960_v24 = vpop.f32.mrb[96].mxu1  ;;  %v3897_v53 = vpop.f32.mrb[97].mxu0 }
 0x1bb   : > { %v3961_v3 = vpop.f32.mrb[97].mxu1  ;;  %v3898_v54 = vadd.f32 %v3897_v53, %v3896_v10  ;;  %v3899_v55 = vpop.f32.mrb[98].mxu0 }
 0x1bc   : > { %v3962_v15 = vadd.f32 %v3961_v3, %v3960_v24  ;;  %v3963_v46 = vpop.f32.mrb[98].mxu1  ;;  %v3900_v21 = vpop.f32.mrb[99].mxu0 }
 0x1bd   : > { %v3964_v63 = vpop.f32.mrb[99].mxu1  ;;  %v5403_v59 = vadd.f32 %v3898_v54, %v5307_v31  ;;  %v3901_v45 = vadd.f32 %v3900_v21, %v3899_v55 }
 0x1be   : > { %v3965_v49 = vadd.f32 %v3964_v63, %v3963_v46  ;;  %v5406_v37 = vadd.f32 %v3962_v15, %v5310_v41 }
 0x1bf   : > { %v5409_v5 = vadd.f32 %v3901_v45, %v5313_v51 }
 0x1c0   : > { %v5412_v13 = vadd.f32 %v3965_v49, %v5316_v32 }
 0x1c1   : > { %v3902_v4 = vpop.f32.mrb[100].mxu0 }
 0x1c2   : > { %v3966_v12 = vpop.f32.mrb[100].mxu1  ;;  %v3903_v39 = vpop.f32.mrb[101].mxu0 }
 0x1c3   : > { %v3967_v62 = vpop.f32.mrb[101].mxu1  ;;  %v3904_v6 = vadd.f32 %v3903_v39, %v3902_v4  ;;  %v3905_v52 = vpop.f32.mrb[102].mxu0 }
 0x1c4   : > { %v3968_v16 = vadd.f32 %v3967_v62, %v3966_v12  ;;  %v3969_v31 = vpop.f32.mrb[102].mxu1  ;;  %v3906_v2 = vpop.f32.mrb[103].mxu0 }
 0x1c5   : > { %v3970_v11 = vpop.f32.mrb[103].mxu1  ;;  %v5415_v7 = vadd.f32 %v3904_v6, %v5319_v38  ;;  %v3907_v41 = vadd.f32 %v3906_v2, %v3905_v52 }
 0x1c6   : > { %v3971_v48 = vadd.f32 %v3970_v11, %v3969_v31  ;;  %v5418_v51 = vadd.f32 %v3968_v16, %v5322_v60 }
 0x1c7   : > { %v5421_v32 = vadd.f32 %v3907_v41, %v5325_v25 }
 0x1c8   : > { %v5424_v36 = vadd.f32 %v3971_v48, %v5328_v20 }
 0x1c9   : > { %v3908_v23 = vpop.f32.mrb[104].mxu0 }
 0x1ca   : > { %v3972_v33 = vpop.f32.mrb[104].mxu1  ;;  %v3909_v44 = vpop.f32.mrb[105].mxu0 }
 0x1cb   : > { %v3973_v57 = vpop.f32.mrb[105].mxu1  ;;  %v3910_v10 = vadd.f32 %v3909_v44, %v3908_v23  ;;  %v3911_v53 = vpop.f32.mrb[106].mxu0 }
 0x1cc   : > { %v3974_v24 = vadd.f32 %v3973_v57, %v3972_v33  ;;  %v3975_v38 = vpop.f32.mrb[106].mxu1  ;;  %v3912_v3 = vpop.f32.mrb[107].mxu0 }
 0x1cd   : > { %v3976_v54 = vpop.f32.mrb[107].mxu1  ;;  %v5427_v15 = vadd.f32 %v3910_v10, %v5331_v9  ;;  %v3913_v60 = vadd.f32 %v3912_v3, %v3911_v53 }
 0x1ce   : > { %v3977_v55 = vadd.f32 %v3976_v54, %v3975_v38  ;;  %v5430_v25 = vadd.f32 %v3974_v24, %v5334_v40 }
 0x1cf   : > { %v5433_v20 = vadd.f32 %v3913_v60, %v5337_v28 }
 0x1d0   : > { %v5436_v46 = vadd.f32 %v3977_v55, %v5340_v8 }
 0x1d1   : > { %v3914_v21 = vpop.f32.mrb[108].mxu0 }
 0x1d2   : > { %v3978_v63 = vpop.f32.mrb[108].mxu1  ;;  %v3915_v45 = vpop.f32.mrb[109].mxu0 }
 0x1d3   : > { %v3979_v49 = vpop.f32.mrb[109].mxu1  ;;  %v3916_v4 = vadd.f32 %v3915_v45, %v3914_v21  ;;  %v3917_v39 = vpop.f32.mrb[110].mxu0 }
 0x1d4   : > { %v3980_v12 = vadd.f32 %v3979_v49, %v3978_v63  ;;  %v3981_v9 = vpop.f32.mrb[110].mxu1  ;;  %v3918_v62 = vpop.f32.mrb[111].mxu0 }
 0x1d5   : > { %v3982_v6 = vpop.f32.mrb[111].mxu1  ;;  %v5439_v16 = vadd.f32 %v3916_v4, %v5343_v42  ;;  %v3919_v40 = vadd.f32 %v3918_v62, %v3917_v39 }
 0x1d6   : > { %v3983_v52 = vadd.f32 %v3982_v6, %v3981_v9  ;;  %v5442_v28 = vadd.f32 %v3980_v12, %v5346_v19 }
 0x1d7   : > { %v5445_v8 = vadd.f32 %v3919_v40, %v5349_v43 }
 0x1d8   : > { %v5448_v31 = vadd.f32 %v3983_v52, %v5352_v18 }
 0x1d9   : > { %v4074_v11 = vpop.f32.mrb[112].mxu0 }
 0x1da   : > { %v3984_v2 = vpop.f32.mrb[112].mxu1  ;;  %v2833_v41 = vadd.f32 %v4074_v11, %v5370_v1  ;;  %v2824_v23 = vpop.f32.mrb[113].mxu0 }
 0x1db   : > { %v3985_v48 = vpop.f32.mrb[113].mxu1  ;;  %v2825_v33 = vadd.f32 %v2824_v23, %v5358_v0  ;;  %v4075_v57 = vpop.f32.mrb[114].mxu0 }
 0x1dc   : > { %v3986_v42 = vadd.f32 %v3985_v48, %v3984_v2  ;;  %v3987_v44 = vpop.f32.mrb[114].mxu1  ;;  %v2836_v19 = vadd.f32 %v4075_v57, %v5376_v50  ;;  %v2827_v24 = vpop.f32.mrb[115].mxu0  ;;  %v3151_v60 = vmul.f32 %v2833_v41, %v2833_v41 }
 0x1dd   : > { %v3988_v10 = vpop.f32.mrb[115].mxu1  ;;  %v2828_v18 = vadd.f32 %v2827_v24, %v5364_v27  ;;  %v3149_v0 = vmul.f32 %v2825_v33, %v2825_v33 }
 0x1de   : > { %v3989_v43 = vadd.f32 %v3988_v10, %v3987_v44  ;;  %v5462_v1 = vadd.f32 %v3986_v42, %v5355_v26  ;;  %v3497_v53 = vpack.c.bf16 %v2836_v19, %v2833_v41  ;;  %v3152_v49 = vmul.f32 %v2836_v19, %v2836_v19 }
 0x1df   : > { %v3492_v38 = vpack.c.bf16 %v2828_v18, %v2825_v33  ;;  %v3111_v50 = vadd.f32 %v2828_v18, %v2825_v33  ;;  %v3150_v3 = vmul.f32 %v2828_v18, %v2828_v18 }
 0x1e0   : > { %v5465_v54 = vadd.f32 %v3989_v43, %v5361_v29  ;;  %3569 = vst [vmem:[%s5458_s7 + $0x8] sm:$0xff] %v3497_v53  }
 0x1e1   : > { %3493 = vst [vmem:[%s5458_s7] sm:$0xff] %v3492_v38   ;;  %v3112_v55 = vadd.f32 %v3111_v50, %v2833_v41  ;;  %v3181_v21 = vadd.f32 %v3150_v3, %v3149_v0  ;;  %v4078_v45 = vpop.f32.mrb[116].mxu0 }
 0x1e2   : > { %v3990_v63 = vpop.f32.mrb[116].mxu1  ;;  %v2849_v27 = vadd.f32 %v4078_v45, %v5394_v14  ;;  %v2840_v4 = vpop.f32.mrb[117].mxu0 }
 0x1e3   : > { %v3991_v26 = vpop.f32.mrb[117].mxu1  ;;  %v3182_v12 = vadd.f32 %v3181_v21, %v3151_v60  ;;  %v2841_v9 = vadd.f32 %v2840_v4, %v5382_v56  ;;  %v3113_v62 = vadd.f32 %v3112_v55, %v2836_v19  ;;  %v4079_v6 = vpop.f32.mrb[118].mxu0 }
 0x1e4   : > { %v3992_v39 = vadd.f32 %v3991_v26, %v3990_v63  ;;  %v3993_v29 = vpop.f32.mrb[118].mxu1  ;;  %v2852_v40 = vadd.f32 %v4079_v6, %v5400_v30  ;;  %v2843_v2 = vpop.f32.mrb[119].mxu0  ;;  %v3155_v43 = vmul.f32 %v2849_v27, %v2849_v27 }
 0x1e5   : > { %v3994_v52 = vpop.f32.mrb[119].mxu1  ;;  %v3114_v11 = vadd.f32 %v3113_v62, %v2841_v9  ;;  %v3153_v41 = vmul.f32 %v2841_v9, %v2841_v9  ;;  %v3183_v48 = vadd.f32 %v3182_v12, %v3152_v49  ;;  %v2844_v42 = vadd.f32 %v2843_v2, %v5388_v34 }
 0x1e6   : > { %v3995_v23 = vadd.f32 %v3994_v52, %v3993_v29  ;;  %v3507_v14 = vpack.c.bf16 %v2852_v40, %v2849_v27  ;;  %v5474_v33 = vadd.f32 %v3992_v39, %v5367_v22  ;;  %v3156_v60 = vmul.f32 %v2852_v40, %v2852_v40 }
 0x1e7   : > { %v3184_v56 = vadd.f32 %v3183_v48, %v3153_v41  ;;  %v3502_v57 = vpack.c.bf16 %v2844_v42, %v2841_v9  ;;  %v3115_v30 = vadd.f32 %v3114_v11, %v2844_v42  ;;  %v3154_v19 = vmul.f32 %v2844_v42, %v2844_v42 }
 0x1e8   : > { %v5477_v44 = vadd.f32 %v3995_v23, %v5373_v58  ;;  %3571 = vst [vmem:[%s5458_s7 + $0x18] sm:$0xff] %v3507_v14  }
 0x1e9   : > { %v4082_v24 = vpop.f32.mrb[120].mxu0  ;;  %3570 = vst [vmem:[%s5458_s7 + $0x10] sm:$0xff] %v3502_v57   ;;  %v3116_v18 = vadd.f32 %v3115_v30, %v2849_v27  ;;  %v3185_v0 = vadd.f32 %v3184_v56, %v3154_v19 }
 0x1ea   : > { %v3996_v10 = vpop.f32.mrb[120].mxu1  ;;  %v2865_v53 = vadd.f32 %v4082_v24, %v5418_v51  ;;  %v2856_v38 = vpop.f32.mrb[121].mxu0 }
 0x1eb   : > { %v3997_v34 = vpop.f32.mrb[121].mxu1  ;;  %v2857_v50 = vadd.f32 %v2856_v38, %v5406_v37  ;;  %v4083_v58 = vpop.f32.mrb[122].mxu0  ;;  %v3186_v55 = vadd.f32 %v3185_v0, %v3155_v43  ;;  %v3117_v21 = vadd.f32 %v3116_v18, %v2852_v40 }
 0x1ec   : > { %v3998_v22 = vadd.f32 %v3997_v34, %v3996_v10  ;;  %v3999_v3 = vpop.f32.mrb[122].mxu1  ;;  %v2868_v63 = vadd.f32 %v4083_v58, %v5424_v36  ;;  %v2859_v49 = vpop.f32.mrb[123].mxu0  ;;  %v3159_v2 = vmul.f32 %v2865_v53, %v2865_v53 }
 0x1ed   : > { %v4000_v45 = vpop.f32.mrb[123].mxu1  ;;  %v3157_v27 = vmul.f32 %v2857_v50, %v2857_v50  ;;  %v2860_v51 = vadd.f32 %v2859_v49, %v5412_v13  ;;  %v3118_v12 = vadd.f32 %v3117_v21, %v2857_v50  ;;  %v3187_v37 = vadd.f32 %v3186_v55, %v3156_v60 }
 0x1ee   : > { %v4001_v26 = vadd.f32 %v4000_v45, %v3999_v3  ;;  %v5486_v4 = vadd.f32 %v3998_v22, %v5379_v17  ;;  %v3517_v39 = vpack.c.bf16 %v2868_v63, %v2865_v53 }
 0x1ef   : > { %v3512_v9 = vpack.c.bf16 %v2860_v51, %v2857_v50  ;;  %v3158_v62 = vmul.f32 %v2860_v51, %v2860_v51  ;;  %v3188_v6 = vadd.f32 %v3187_v37, %v3157_v27  ;;  %v3119_v36 = vadd.f32 %v3118_v12, %v2860_v51 }
 0x1f0   : > { %v5489_v29 = vadd.f32 %v4001_v26, %v5385_v47  ;;  %3573 = vst [vmem:[%s5458_s7 + $0x28] sm:$0xff] %v3517_v39   ;;  %v3160_v47 = vmul.f32 %v2868_v63, %v2868_v63 }
 0x1f1   : > { %3572 = vst [vmem:[%s5458_s7 + $0x20] sm:$0xff] %v3512_v9   ;;  %v4086_v52 = vpop.f32.mrb[124].mxu0  ;;  %v3120_v11 = vadd.f32 %v3119_v36, %v2865_v53  ;;  %v3189_v13 = vadd.f32 %v3188_v6, %v3158_v62 }
 0x1f2   : > { %v4002_v40 = vpop.f32.mrb[124].mxu1  ;;  %v2881_v17 = vadd.f32 %v4086_v52, %v5442_v28  ;;  %v2872_v48 = vpop.f32.mrb[125].mxu0 }
 0x1f3   : > { %v4003_v41 = vpop.f32.mrb[125].mxu1  ;;  %v2873_v14 = vadd.f32 %v2872_v48, %v5430_v25  ;;  %v4087_v56 = vpop.f32.mrb[126].mxu0  ;;  %v3190_v57 = vadd.f32 %v3189_v13, %v3159_v2  ;;  %v3121_v30 = vadd.f32 %v3120_v11, %v2868_v63 }
 0x1f4   : > { %v4004_v23 = vadd.f32 %v4003_v41, %v4002_v40  ;;  %v4005_v42 = vpop.f32.mrb[126].mxu1  ;;  %v2884_v19 = vadd.f32 %v4087_v56, %v5448_v31  ;;  %v2875_v24 = vpop.f32.mrb[127].mxu0  ;;  %v3163_v55 = vmul.f32 %v2881_v17, %v2881_v17 }
 0x1f5   : > { %v4006_v10 = vpop.f32.mrb[127].mxu1  ;;  %v3161_v43 = vmul.f32 %v2873_v14, %v2873_v14  ;;  %v2876_v28 = vadd.f32 %v2875_v24, %v5436_v46  ;;  %v3122_v53 = vadd.f32 %v3121_v30, %v2873_v14  ;;  %v3191_v34 = vadd.f32 %v3190_v57, %v3160_v47 }
 0x1f6   : > { %v4007_v18 = vadd.f32 %v4006_v10, %v4005_v42  ;;  %v2752_v0 = vadd.f32 %v4004_v23, %v5391_v61  ;;  %v3527_v25 = vpack.c.bf16 %v2884_v19, %v2881_v17  ;;  %v3164_v12 = vmul.f32 %v2884_v19, %v2884_v19 }
 0x1f7   : > { %v3522_v38 = vpack.c.bf16 %v2876_v28, %v2873_v14  ;;  %v3162_v22 = vmul.f32 %v2876_v28, %v2876_v28  ;;  %v3192_v3 = vadd.f32 %v3191_v34, %v3161_v43  ;;  %v3123_v58 = vadd.f32 %v3122_v53, %v2876_v28 }
 0x1f8   : > { %v2755_v50 = vadd.f32 %v4007_v18, %v5397_v35  ;;  %3575 = vst [vmem:[%s5458_s7 + $0x38] sm:$0xff] %v3527_v25  }
 0x1f9   : > { %3574 = vst [vmem:[%s5458_s7 + $0x30] sm:$0xff] %v3522_v38   ;;  %v4090_v60 = vpop.f32.mrb[128].mxu0  ;;  %v3124_v21 = vadd.f32 %v3123_v58, %v2881_v17  ;;  %v3193_v63 = vadd.f32 %v3192_v3, %v3162_v22 }
 0x1fa   : > { %v4008_v31 = vpop.f32.mrb[128].mxu1  ;;  %v2897_v46 = vadd.f32 %v4090_v60, %v5474_v33  ;;  %v2888_v61 = vpop.f32.mrb[129].mxu0 }
 0x1fb   : > { %v4009_v45 = vpop.f32.mrb[129].mxu1  ;;  %v2889_v27 = vadd.f32 %v2888_v61, %v5462_v1  ;;  %v4091_v51 = vpop.f32.mrb[130].mxu0  ;;  %v3194_v35 = vadd.f32 %v3193_v63, %v3163_v55  ;;  %v3125_v37 = vadd.f32 %v3124_v21, %v2884_v19 }
 0x1fc   : > { %v4010_v49 = vadd.f32 %v4009_v45, %v4008_v31  ;;  %v4011_v26 = vpop.f32.mrb[130].mxu1  ;;  %v2900_v39 = vadd.f32 %v4091_v51, %v5477_v44  ;;  %v2891_v62 = vpop.f32.mrb[131].mxu0  ;;  %v3167_v14 = vmul.f32 %v2897_v46, %v2897_v46 }
 0x1fd   : > { %v4012_v9 = vpop.f32.mrb[131].mxu1  ;;  %v3165_v6 = vmul.f32 %v2889_v27, %v2889_v27  ;;  %v2892_v33 = vadd.f32 %v2891_v62, %v5465_v54  ;;  %v3126_v52 = vadd.f32 %v3125_v37, %v2889_v27  ;;  %v3195_v2 = vadd.f32 %v3194_v35, %v3164_v12 }
 0x1fe   : > { %v4013_v36 = vadd.f32 %v4012_v9, %v4011_v26  ;;  %v2760_v40 = vadd.f32 %v4010_v49, %v5403_v59  ;;  %v3537_v1 = vpack.c.bf16 %v2900_v39, %v2897_v46  ;;  %v3168_v24 = vmul.f32 %v2900_v39, %v2900_v39 }
 0x1ff   : > { %v3532_v11 = vpack.c.bf16 %v2892_v33, %v2889_v27  ;;  %v3166_v13 = vmul.f32 %v2892_v33, %v2892_v33  ;;  %v3196_v41 = vadd.f32 %v3195_v2, %v3165_v6  ;;  %v3127_v48 = vadd.f32 %v3126_v52, %v2892_v33 }
 0x200   : > { %v2763_v17 = vadd.f32 %v4013_v36, %v5409_v5  ;;  %3577 = vst [vmem:[%s5458_s7 + $0x48] sm:$0xff] %v3537_v1  }
 0x201   : > { %3576 = vst [vmem:[%s5458_s7 + $0x40] sm:$0xff] %v3532_v11   ;;  %v4094_v23 = vpop.f32.mrb[132].mxu0  ;;  %v3128_v42 = vadd.f32 %v3127_v48, %v2897_v46  ;;  %v3197_v56 = vadd.f32 %v3196_v41, %v3166_v13 }
 0x202   : > { %v4014_v44 = vpop.f32.mrb[132].mxu1  ;;  %v2913_v47 = vadd.f32 %v4094_v23, %v2752_v0  ;;  %v2904_v57 = vpop.f32.mrb[133].mxu0 }
 0x203   : > { %v4015_v54 = vpop.f32.mrb[133].mxu1  ;;  %v2905_v30 = vadd.f32 %v2904_v57, %v5486_v4  ;;  %v4095_v10 = vpop.f32.mrb[134].mxu0  ;;  %v3198_v43 = vadd.f32 %v3197_v56, %v3167_v14  ;;  %v3129_v5 = vadd.f32 %v3128_v42, %v2900_v39 }
 0x204   : > { %v4016_v59 = vadd.f32 %v4015_v54, %v4014_v44  ;;  %v4017_v19 = vpop.f32.mrb[134].mxu1  ;;  %v2916_v18 = vadd.f32 %v4095_v10, %v2755_v50  ;;  %v2907_v53 = vpop.f32.mrb[135].mxu0  ;;  %v3171_v46 = vmul.f32 %v2913_v47, %v2913_v47 }
 0x205   : > { %v4018_v28 = vpop.f32.mrb[135].mxu1  ;;  %v3169_v34 = vmul.f32 %v2905_v30, %v2905_v30  ;;  %v2908_v38 = vadd.f32 %v2907_v53, %v5489_v29  ;;  %v3130_v22 = vadd.f32 %v3129_v5, %v2905_v30  ;;  %v3199_v3 = vadd.f32 %v3198_v43, %v3168_v24 }
 0x206   : > { %v4019_v25 = vadd.f32 %v4018_v28, %v4017_v19  ;;  %v2768_v0 = vadd.f32 %v4016_v59, %v5415_v7  ;;  %v3547_v58 = vpack.c.bf16 %v2916_v18, %v2913_v47  ;;  %v3172_v35 = vmul.f32 %v2916_v18, %v2916_v18 }
 0x207   : > { %v3542_v4 = vpack.c.bf16 %v2908_v38, %v2905_v30  ;;  %v3170_v31 = vmul.f32 %v2908_v38, %v2908_v38  ;;  %v3200_v55 = vadd.f32 %v3199_v3, %v3169_v34  ;;  %v3131_v21 = vadd.f32 %v3130_v22, %v2908_v38 }
 0x208   : > { %v2771_v60 = vadd.f32 %v4019_v25, %v5421_v32  ;;  %3579 = vst [vmem:[%s5458_s7 + $0x58] sm:$0xff] %v3547_v58  }
 0x209   : > { %3578 = vst [vmem:[%s5458_s7 + $0x50] sm:$0xff] %v3542_v4   ;;  %v4098_v63 = vpop.f32.mrb[136].mxu0  ;;  %v3132_v45 = vadd.f32 %v3131_v21, %v2913_v47  ;;  %v3201_v61 = vadd.f32 %v3200_v55, %v3170_v31 }
 0x20a   : > { %v4020_v50 = vpop.f32.mrb[136].mxu1  ;;  %v2929_v49 = vadd.f32 %v4098_v63, %v2768_v0  ;;  %v2920_v27 = vpop.f32.mrb[137].mxu0 }
 0x20b   : > { %v4021_v29 = vpop.f32.mrb[137].mxu1  ;;  %v2921_v26 = vadd.f32 %v2920_v27, %v2760_v40  ;;  %v4099_v12 = vpop.f32.mrb[138].mxu0  ;;  %v3202_v37 = vadd.f32 %v3201_v61, %v3171_v46  ;;  %v3133_v32 = vadd.f32 %v3132_v45, %v2916_v18 }
 0x20c   : > { %v4022_v7 = vadd.f32 %v4021_v29, %v4020_v50  ;;  %v4023_v51 = vpop.f32.mrb[138].mxu1  ;;  %v2932_v39 = vadd.f32 %v4099_v12, %v2771_v60  ;;  %v2923_v62 = vpop.f32.mrb[139].mxu0  ;;  %v3175_v42 = vmul.f32 %v2929_v49, %v2929_v49 }
 0x20d   : > { %v4024_v9 = vpop.f32.mrb[139].mxu1  ;;  %v3173_v6 = vmul.f32 %v2921_v26, %v2921_v26  ;;  %v2924_v33 = vadd.f32 %v2923_v62, %v2763_v17  ;;  %v3134_v2 = vadd.f32 %v3133_v32, %v2921_v26  ;;  %v3203_v1 = vadd.f32 %v3202_v37, %v3172_v35 }
 0x20e   : > { %v4025_v36 = vadd.f32 %v4024_v9, %v4023_v51  ;;  %v2776_v52 = vadd.f32 %v4022_v7, %v5427_v15  ;;  %v3557_v11 = vpack.c.bf16 %v2932_v39, %v2929_v49  ;;  %v3176_v19 = vmul.f32 %v2932_v39, %v2932_v39 }
 0x20f   : > { %v3552_v13 = vpack.c.bf16 %v2924_v33, %v2921_v26  ;;  %v3174_v40 = vmul.f32 %v2924_v33, %v2924_v33  ;;  %v3204_v48 = vadd.f32 %v3203_v1, %v3173_v6  ;;  %v3135_v44 = vadd.f32 %v3134_v2, %v2924_v33 }
 0x210   : > { %v2779_v41 = vadd.f32 %v4025_v36, %v5433_v20  ;;  %3581 = vst [vmem:[%s5458_s7 + $0x68] sm:$0xff] %v3557_v11  }
 0x211   : > { %3580 = vst [vmem:[%s5458_s7 + $0x60] sm:$0xff] %v3552_v13   ;;  %v4102_v14 = vpop.f32.mrb[140].mxu0  ;;  %v3136_v56 = vadd.f32 %v3135_v44, %v2929_v49  ;;  %v3205_v47 = vadd.f32 %v3204_v48, %v3174_v40 }
 0x212   : > { %v4026_v23 = vpop.f32.mrb[140].mxu1  ;;  %v2936_v17 = vpop.f32.mrb[141].mxu0 }
 0x213   : > { %v4027_v54 = vpop.f32.mrb[141].mxu1  ;;  %v2937_v15 = vadd.f32 %v2936_v17, %v2776_v52  ;;  %v4103_v30 = vpop.f32.mrb[142].mxu0  ;;  %v3206_v10 = vadd.f32 %v3205_v47, %v3175_v42  ;;  %v3137_v24 = vadd.f32 %v3136_v56, %v2932_v39 }
 0x214   : > { %v4028_v57 = vadd.f32 %v4027_v54, %v4026_v23  ;;  %v4029_v59 = vpop.f32.mrb[142].mxu1  ;;  %v2939_v20 = vpop.f32.mrb[143].mxu0 }
 0x215   : > { %v4030_v43 = vpop.f32.mrb[143].mxu1  ;;  %v3177_v18 = vmul.f32 %v2937_v15, %v2937_v15  ;;  %v2940_v53 = vadd.f32 %v2939_v20, %v2779_v41  ;;  %v3138_v34 = vadd.f32 %v3137_v24, %v2937_v15  ;;  %v3207_v25 = vadd.f32 %v3206_v10, %v3176_v19 }
 0x216   : > { %v2784_v5 = vadd.f32 %v4028_v57, %v5439_v16  ;;  %v4031_v28 = vadd.f32 %v4030_v43, %v4029_v59 }
 0x217   : > { %v3562_v22 = vpack.c.bf16 %v2940_v53, %v2937_v15  ;;  %v3178_v3 = vmul.f32 %v2940_v53, %v2940_v53  ;;  %v3208_v58 = vadd.f32 %v3207_v25, %v3177_v18  ;;  %v3139_v4 = vadd.f32 %v3138_v34, %v2940_v53 }
 0x218   : > { %v2945_v38 = vadd.f32 %v4102_v14, %v2784_v5  ;;  %v2787_v0 = vadd.f32 %v4031_v28, %v5445_v8 }
 0x219   : > { %3582 = vst [vmem:[%s5458_s7 + $0x70] sm:$0xff] %v3562_v22   ;;  %v3209_v21 = vadd.f32 %v3208_v58, %v3178_v3 }
 0x21a   : > { %v3179_v31 = vmul.f32 %v2945_v38, %v2945_v38  ;;  %v2948_v60 = vadd.f32 %v4103_v30, %v2787_v0  ;;  %v3140_v55 = vadd.f32 %v3139_v4, %v2945_v38 }
 0x21c   : > { %v3567_v16 = vpack.c.bf16 %v2948_v60, %v2945_v38  ;;  %v3180_v50 = vmul.f32 %v2948_v60, %v2948_v60  ;;  %v3141_v63 = vadd.f32 %v3140_v55, %v2948_v60  ;;  %v3210_v46 = vadd.f32 %v3209_v21, %v3179_v31 }
 0x21e   : > { %3583 = vst [vmem:[%s5458_s7 + $0x78] sm:$0xff] %v3567_v16   ;;  %v3142_v45 = vrot.slane %v3141_v63, 4  ;;  %v3211_v61 = vadd.f32 %v3210_v46, %v3180_v50 }
 0x220   : > { %v3143_v49 = vadd.f32 %v3142_v45, %v3141_v63  ;;  %v3212_v8 = vrot.slane %v3211_v61, 4 }
 0x222   : > { %v3144_v29 = vrot.slane %v3143_v49, 2  ;;  %v3213_v27 = vadd.f32 %v3212_v8, %v3211_v61 }
 0x224   : > { %v3145_v7 = vadd.f32 %v3144_v29, %v3143_v49  ;;  %v3214_v26 = vrot.slane %v3213_v27, 2 }
 0x226   : > { %v3146_v51 = vrot.slane %v3145_v7, 1  ;;  %v3215_v12 = vadd.f32 %v3214_v26, %v3213_v27 }
 0x228   : > { %v3147_v35 = vadd.f32 %v3146_v51, %v3145_v7  ;;  %v3216_v37 = vrot.slane %v3215_v12, 1 }
 0x22a   : > { %3148 = vst [vmem:[%s211_s9] sm:$0x1] %v3147_v35  ;;  %v3217_v32 = vadd.f32 %v3216_v37, %v3215_v12 }
 0x22c   : > { %3218 = vst [vmem:[%s214_s13] sm:$0x1] %v3217_v32 }
 0x22d PF: > { %s15_s15 = sadd.s32 1, %s4226_s15  }
 0x22e   : > { %p12_p4 = scmp.ge.s32.totalorder %s15_s15, 4  }
 0x230   :  { %14 = sbr.rel (!%p12_p4) target bundleno = 1 (0x1), region = 84 }

</bundles_post_ra>
